<compile_context>
chip_gen: v7x
topology: tpu7x:2x2x1
jax: 0.10.0
libtpu: 0.0.40
codegen_flags: <defaults>
</compile_context>

<pallas_src>
import functools

import jax
import jax.numpy as jnp
import numpy as np
from jax.experimental import pallas as pl
from jax.experimental.pallas import tpu as pltpu

C1P = 8          # conv1 output channels padded 6 -> 8 (one f32 sublane)
C2 = 16          # conv2 output channels (fc1 expects 16 * 13 * 13 = 2704)
PLANE = 256      # one 16x16 parity plane, lane-flattened


# ---------------------------------------------------------------------------
# The single fused kernel: conv1+pool -> conv2+pool -> fc1 -> fc2 -> fc3
# Activations live as (channels on sublanes, TB images side-by-side on lanes).
# ---------------------------------------------------------------------------
def _mydnn_kernel(x_ref, w1s_ref, b1_ref, w2s_ref, b2_ref,
                  w1f_ref, b1f_ref, w2f_ref, b2f_ref, w3f_ref, b3f_ref,
                  o_ref, *, tb, cin):
    ntl = tb * PLANE
    xp = x_ref[0]                                      # (16*cin, ntl) bf16

    def shift(v, d):
        # out[:, L] = v[:, L + d] (zero fill past the end).  Only ever read at
        # lanes that stay inside the same image's 256-lane plane.
        if d == 0:
            return v
        tail = jnp.zeros((v.shape[0], d), v.dtype)
        return jnp.concatenate([v[:, d:], tail], axis=1)

    # ---- conv1(5x5) + ReLU + 2x2 maxpool ----------------------------------
    # Emitted directly as the 4 parity planes of the pooled 30x30 grid
    # (15x15 valid inside each 16x16 lane-flat tile) -- exactly the layout the
    # conv2 stage consumes, so no stride-2 regather is needed anywhere.
    rhs1 = jnp.concatenate(
        [shift(xp, a * 16 + b) for a in range(2) for b in range(2)], axis=0)
    z1 = jnp.dot(w1s_ref[...], rhs1,
                 preferred_element_type=jnp.float32)   # (4*4*C1P, ntl)
    planes = []
    for p in range(4):                                 # conv2-parity plane
        blk = z1[p * 4 * C1P:(p + 1) * 4 * C1P]        # 4 pool quadrants x C1P
        q = jnp.maximum(jnp.maximum(blk[0:C1P], blk[C1P:2 * C1P]),
                        jnp.maximum(blk[2 * C1P:3 * C1P], blk[3 * C1P:4 * C1P]))
        # max before (bias + ReLU) is exact: bias is position-invariant and
        # ReLU is monotone.
        planes.append(jnp.maximum(q + b1_ref[...], 0.0))
    y2 = jnp.concatenate(planes, axis=0).astype(jnp.bfloat16)   # (4*C1P, ntl)

    # ---- conv2(5x5) + ReLU + 2x2 maxpool ----------------------------------
    rhs2 = jnp.concatenate(
        [shift(y2, a * 16 + b) for a in range(3) for b in range(3)], axis=0)
    z2 = jnp.dot(w2s_ref[...], rhs2,
                 preferred_element_type=jnp.float32)   # (4*C2, ntl)
    q2 = jnp.maximum(jnp.maximum(z2[0:C2], z2[C2:2 * C2]),
                     jnp.maximum(z2[2 * C2:3 * C2], z2[3 * C2:4 * C2]))
    act = jnp.maximum(q2 + b2_ref[...], 0.0)           # (C2, ntl) f32

    # ---- flatten (torch (C,H,W) order folded into w1f) + fc1/fc2/fc3 ------
    rows = []
    for t in range(tb):                                # batch -> sublane axis
        rows.append(jnp.concatenate(
            [act[c:c + 1, t * PLANE:(t + 1) * PLANE] for c in range(C2)],
            axis=1))
    a_flat = jnp.concatenate(rows, axis=0).astype(jnp.bfloat16)  # (tb, C2*256)
    h = jnp.dot(a_flat, w1f_ref[...], preferred_element_type=jnp.float32)
    h = jnp.maximum(h + b1f_ref[...], 0.0).astype(jnp.bfloat16)
    h = jnp.dot(h, w2f_ref[...], preferred_element_type=jnp.float32)
    h = jnp.maximum(h + b2f_ref[...], 0.0).astype(jnp.bfloat16)
    o_ref[0] = (jnp.dot(h, w3f_ref[...], preferred_element_type=jnp.float32)
                + b3f_ref[...])


# ---------------------------------------------------------------------------
# One-time parameter folding (host / numpy).
# ---------------------------------------------------------------------------
def prepare_params(p):
    w1 = np.asarray(p['conv1_w'], np.float32)          # (6, cin, 5, 5)
    b1 = np.asarray(p['conv1_b'], np.float32)
    w2 = np.asarray(p['conv2_w'], np.float32)          # (16, 6, 5, 5)
    b2 = np.asarray(p['conv2_b'], np.float32)
    c1, cin = w1.shape[0], w1.shape[1]
    assert w2.shape[0] == C2 and c1 <= C1P

    # conv1 stage: out rows = (conv2-parity plane, pool quadrant, channel),
    # contraction = (input shift s, mod-4 input plane, input channel).
    w1s = np.zeros((16 * C1P, 4 * 16 * cin), np.float32)
    for pa2 in range(2):
        for pb2 in range(2):
            for dh in range(2):
                for dw in range(2):
                    orow = ((pa2 * 2 + pb2) * 4 + (dh * 2 + dw)) * C1P
                    for kh in range(5):
                        for kw in range(5):
                            u = 2 * pa2 + dh + kh
                            v = 2 * pb2 + dw + kw
                            s = (u // 4) * 2 + (v // 4)
                            icol = (s * 16 + (u % 4) * 4 + (v % 4)) * cin
                            w1s[orow:orow + c1, icol:icol + cin] = w1[:, :, kh, kw]
    b1c = np.zeros((C1P, 1), np.float32)
    b1c[:c1, 0] = b1

    # conv2 stage: out rows = (pool quadrant, channel),
    # contraction = (shift s, conv2-parity plane, conv1 channel).
    w2s = np.zeros((4 * C2, 9 * 4 * C1P), np.float32)
    for dh in range(2):
        for dw in range(2):
            orow = (dh * 2 + dw) * C2
            for kh in range(5):
                for kw in range(5):
                    u = dh + kh
                    v = dw + kw
                    s = (u // 2) * 3 + (v // 2)
                    icol = (s * 4 + (u % 2) * 2 + (v % 2)) * C1P
                    w2s[orow:orow + C2, icol:icol + c1] = w2[:, :, kh, kw]
    b2c = b2.reshape(C2, 1).astype(np.float32)

    # fc1: torch flatten order (c, i, j) over (16, 13, 13), scattered into the
    # kernel's padded (16, 16, 16) spatial tile; feature dims padded to 128.
    f1w = np.asarray(p['fc1_w'], np.float32)            # (2704, 120)
    f1 = f1w.shape[1]
    w1f = np.zeros((C2, 16, 16, 128), np.float32)
    w1f[:, :13, :13, :f1] = f1w.reshape(C2, 13, 13, f1)
    w1f = w1f.reshape(C2 * PLANE, 128)
    b1f = np.zeros((1, 128), np.float32)
    b1f[0, :f1] = np.asarray(p['fc1_b'], np.float32)

    f2w = np.asarray(p['fc2_w'], np.float32)             # (120, 84)
    f2 = f2w.shape[1]
    w2f = np.zeros((128, 128), np.float32)
    w2f[:f1, :f2] = f2w
    b2f = np.zeros((1, 128), np.float32)
    b2f[0, :f2] = np.asarray(p['fc2_b'], np.float32)

    f3w = np.asarray(p['fc3_w'], np.float32)             # (84, 10)
    f3 = f3w.shape[1]
    w3f = np.zeros((128, 128), np.float32)
    w3f[:f2, :f3] = f3w
    b3f = np.zeros((1, 128), np.float32)
    b3f[0, :f3] = np.asarray(p['fc3_b'], np.float32)

    bf = jnp.bfloat16
    return {
        'w1s': jnp.asarray(w1s, bf), 'b1': jnp.asarray(b1c),
        'w2s': jnp.asarray(w2s, bf), 'b2': jnp.asarray(b2c),
        'w1f': jnp.asarray(w1f, bf), 'b1f': jnp.asarray(b1f),
        'w2f': jnp.asarray(w2f, bf), 'b2f': jnp.asarray(b2f),
        'w3f': jnp.asarray(w3f, bf), 'b3f': jnp.asarray(b3f),
    }


# ---------------------------------------------------------------------------
# Forward pass (matches MyDNN.forward), single pallas_call.
# ---------------------------------------------------------------------------
def mydnn_forward(x_nchw, prep, *, tb=4, n_out=10):
    b, cin, h, w = x_nchw.shape
    assert h == 64 and w == 64, "MyDNN's fc1 (2704 = 16*13*13) implies 64x64 input"
    nblk = -(-b // tb)
    bp = nblk * tb
    if bp != b:
        x_nchw = jnp.pad(x_nchw, ((0, bp - b), (0, 0), (0, 0), (0, 0)))

    # TODO(synk): this mod-4 parity re-layout of the input (and the [:, :10]
    # slice below) is the only XLA glue left outside the single pallas_call.
    xp = x_nchw.reshape(bp, cin, 16, 4, 16, 4).transpose(0, 3, 5, 1, 2, 4)
    xp = xp.reshape(bp, 16 * cin, PLANE)
    xp = xp.reshape(nblk, tb, 16 * cin, PLANE).transpose(0, 2, 1, 3)
    xp = xp.reshape(nblk, 16 * cin, tb * PLANE).astype(jnp.bfloat16)

    def wspec(a):
        return pl.BlockSpec(a.shape, lambda i: (0, 0))   # resident, fetched once

    kern = functools.partial(_mydnn_kernel, tb=tb, cin=cin)
    out = pl.pallas_call(
        kern,
        out_shape=jax.ShapeDtypeStruct((nblk, tb, 128), jnp.float32),
        grid=(nblk,),
        in_specs=[pl.BlockSpec((1, 16 * cin, tb * PLANE), lambda i: (i, 0, 0)),
                  wspec(prep['w1s']), wspec(prep['b1']),
                  wspec(prep['w2s']), wspec(prep['b2']),
                  wspec(prep['w1f']), wspec(prep['b1f']),
                  wspec(prep['w2f']), wspec(prep['b2f']),
                  wspec(prep['w3f']), wspec(prep['b3f'])],
        out_specs=pl.BlockSpec((1, tb, 128), lambda i: (i, 0, 0)),
        compiler_params=pltpu.CompilerParams(
            dimension_semantics=("parallel",)),
    )(xp, prep['w1s'], prep['b1'], prep['w2s'], prep['b2'],
      prep['w1f'], prep['b1f'], prep['w2f'], prep['b2f'],
      prep['w3f'], prep['b3f'])
    return out.reshape(bp, 128)[:b, :n_out]


# ---------------------------------------------------------------------------
# Pure-JAX reference of MyDNN.forward (for a bf16-tolerance check).
# ---------------------------------------------------------------------------
def reference_forward(x, p):
    dn = ('NCHW', 'OIHW', 'NCHW')
    y = jax.lax.conv_general_dilated(x, p['conv1_w'], (1, 1), 'VALID',
                                     dimension_numbers=dn)
    y = jax.nn.relu(y + p['conv1_b'][None, :, None, None])
    b, c, hh, ww = y.shape
    y = y.reshape(b, c, hh // 2, 2, ww // 2, 2).max(axis=(3, 5))
    y = jax.lax.conv_general_dilated(y, p['conv2_w'], (1, 1), 'VALID',
                                     dimension_numbers=dn)
    y = jax.nn.relu(y + p['conv2_b'][None, :, None, None])
    b, c, hh, ww = y.shape
    y = y.reshape(b, c, hh // 2, 2, ww // 2, 2).max(axis=(3, 5))
    y = y.reshape(b, -1)
    y = jax.nn.relu(y @ p['fc1_w'] + p['fc1_b'])
    y = jax.nn.relu(y @ p['fc2_w'] + p['fc2_b'])
    return y @ p['fc3_w'] + p['fc3_b']


if __name__ == "__main__":
    # layers = [in_ch, conv1_out, conv2_out, fc1_out, fc2_out, fc3_out]
    layers = [3, 6, 16, 120, 84, 10]
    key = jax.random.PRNGKey(0)
    keys = jax.random.split(key, 11)

    def u(k, shape, fan_in):
        bound = 1.0 / float(fan_in) ** 0.5
        return jax.random.uniform(k, shape, jnp.float32, -bound, bound)

    params = {
        'conv1_w': u(keys[0], (layers[1], layers[0], 5, 5), layers[0] * 25),
        'conv1_b': u(keys[1], (layers[1],), layers[0] * 25),
        'conv2_w': u(keys[2], (layers[2], layers[1], 5, 5), layers[1] * 25),
        'conv2_b': u(keys[3], (layers[2],), layers[1] * 25),
        'fc1_w':   u(keys[4], (2704, layers[3]), 2704),
        'fc1_b':   u(keys[5], (layers[3],), 2704),
        'fc2_w':   u(keys[6], (layers[3], layers[4]), layers[3]),
        'fc2_b':   u(keys[7], (layers[4],), layers[3]),
        'fc3_w':   u(keys[8], (layers[4], layers[5]), layers[4]),
        'fc3_b':   u(keys[9], (layers[5],), layers[4]),
    }
    x = jax.random.normal(keys[10], (8, layers[0], 64, 64), jnp.float32)

    prep = prepare_params(params)           # one-time weight folding (host)
    fwd = jax.jit(functools.partial(mydnn_forward, tb=4, n_out=layers[5]))
    out = jax.block_until_ready(fwd(x, prep))
    assert out.shape == (8, layers[5]), out.shape

    ref = jax.block_until_ready(reference_forward(x, params))
    err = float(jnp.max(jnp.abs(out - ref)))
    assert err < 5e-2, f"max abs err vs reference: {err}"
    print("KERNEL_OK")
</pallas_src>

<mosaic_0001>
module attributes {stable_mosaic.version = 11 : i64} {
  func.func @_mydnn_kernel(%arg0: i32, %arg1: memref<1x48x1024xbf16, #tpu.memory_space<vmem>>, %arg2: memref<128x192xbf16, #tpu.memory_space<vmem>>, %arg3: memref<8x1xf32, #tpu.memory_space<vmem>>, %arg4: memref<64x288xbf16, #tpu.memory_space<vmem>>, %arg5: memref<16x1xf32, #tpu.memory_space<vmem>>, %arg6: memref<4096x128xbf16, #tpu.memory_space<vmem>>, %arg7: memref<1x128xf32, #tpu.memory_space<vmem>>, %arg8: memref<128x128xbf16, #tpu.memory_space<vmem>>, %arg9: memref<1x128xf32, #tpu.memory_space<vmem>>, %arg10: memref<128x128xbf16, #tpu.memory_space<vmem>>, %arg11: memref<1x128xf32, #tpu.memory_space<vmem>>, %arg12: memref<1x4x128xf32, #tpu.memory_space<vmem>>) attributes {dimension_semantics = [#tpu.dimension_semantics<parallel>], iteration_bounds = array<i64: 2>, scalar_prefetch = 0 : i64, scratch_operands = 0 : i64, tpu.core_type = #tpu.core_type<tc>, window_params = [{transform_indices = @transform_0, window_bounds = array<i64: 1, 48, 1024>}, {pipeline_mode = #tpu.pipeline_mode<synchronous>, transform_indices = @transform_1, window_bounds = array<i64: 128, 192>}, {pipeline_mode = #tpu.pipeline_mode<synchronous>, transform_indices = @transform_2, window_bounds = array<i64: 8, 1>}, {pipeline_mode = #tpu.pipeline_mode<synchronous>, transform_indices = @transform_3, window_bounds = array<i64: 64, 288>}, {pipeline_mode = #tpu.pipeline_mode<synchronous>, transform_indices = @transform_4, window_bounds = array<i64: 16, 1>}, {pipeline_mode = #tpu.pipeline_mode<synchronous>, transform_indices = @transform_5, window_bounds = array<i64: 4096, 128>}, {pipeline_mode = #tpu.pipeline_mode<synchronous>, transform_indices = @transform_6, window_bounds = array<i64: 1, 128>}, {pipeline_mode = #tpu.pipeline_mode<synchronous>, transform_indices = @transform_7, window_bounds = array<i64: 128, 128>}, {pipeline_mode = #tpu.pipeline_mode<synchronous>, transform_indices = @transform_8, window_bounds = array<i64: 1, 128>}, {pipeline_mode = #tpu.pipeline_mode<synchronous>, transform_indices = @transform_9, window_bounds = array<i64: 128, 128>}, {pipeline_mode = #tpu.pipeline_mode<synchronous>, transform_indices = @transform_10, window_bounds = array<i64: 1, 128>}, {transform_indices = @transform_11, window_bounds = array<i64: 1, 4, 128>}]} {
    %c0 = arith.constant 0 : index
    %c0_0 = arith.constant 0 : index
    %c0_1 = arith.constant 0 : index
    %0 = vector.load %arg1[%c0, %c0_0, %c0_1] : memref<1x48x1024xbf16, #tpu.memory_space<vmem>>, vector<1x48x1024xbf16>
    %1 = vector.shape_cast %0 : vector<1x48x1024xbf16> to vector<48x1024xbf16>
    %cst = arith.constant 0.000000e+00 : bf16
    %2 = vector.broadcast %cst : bf16 to vector<48x1xbf16>
    %3 = vector.extract_strided_slice %1 {offsets = [0, 1], sizes = [48, 1023], strides = [1, 1]} : vector<48x1024xbf16> to vector<48x1023xbf16>
    %4 = tpu.concatenate %3, %2 in 1 : vector<48x1023xbf16>, vector<48x1xbf16> -> vector<48x1024xbf16>
    %cst_2 = arith.constant 0.000000e+00 : bf16
    %5 = vector.broadcast %cst_2 : bf16 to vector<48x16xbf16>
    %6 = vector.extract_strided_slice %1 {offsets = [0, 16], sizes = [48, 1008], strides = [1, 1]} : vector<48x1024xbf16> to vector<48x1008xbf16>
    %7 = tpu.concatenate %6, %5 in 1 : vector<48x1008xbf16>, vector<48x16xbf16> -> vector<48x1024xbf16>
    %cst_3 = arith.constant 0.000000e+00 : bf16
    %8 = vector.broadcast %cst_3 : bf16 to vector<48x17xbf16>
    %9 = vector.extract_strided_slice %1 {offsets = [0, 17], sizes = [48, 1007], strides = [1, 1]} : vector<48x1024xbf16> to vector<48x1007xbf16>
    %10 = tpu.concatenate %9, %8 in 1 : vector<48x1007xbf16>, vector<48x17xbf16> -> vector<48x1024xbf16>
    %11 = tpu.concatenate %1, %4, %7, %10 in 0 : vector<48x1024xbf16>, vector<48x1024xbf16>, vector<48x1024xbf16>, vector<48x1024xbf16> -> vector<192x1024xbf16>
    %c0_4 = arith.constant 0 : index
    %c0_5 = arith.constant 0 : index
    %12 = vector.load %arg2[%c0_4, %c0_5] : memref<128x192xbf16, #tpu.memory_space<vmem>>, vector<128x192xbf16>
    %cst_6 = arith.constant dense<0.000000e+00> : vector<128x1024xf32>
    %13 = tpu.matmul %12, %11, %cst_6 {dimension_numbers = #tpu.dot_dimension_numbers<[1], [0], [0], [1], [0, 0, 1, 1], [], []>} : vector<128x192xbf16>, vector<192x1024xbf16>, vector<128x1024xf32> -> vector<128x1024xf32>
    %14 = vector.extract_strided_slice %13 {offsets = [0, 0], sizes = [32, 1024], strides = [1, 1]} : vector<128x1024xf32> to vector<32x1024xf32>
    %15 = vector.extract_strided_slice %14 {offsets = [0, 0], sizes = [8, 1024], strides = [1, 1]} : vector<32x1024xf32> to vector<8x1024xf32>
    %16 = vector.extract_strided_slice %14 {offsets = [8, 0], sizes = [8, 1024], strides = [1, 1]} : vector<32x1024xf32> to vector<8x1024xf32>
    %17 = arith.maximumf %15, %16 : vector<8x1024xf32>
    %18 = vector.extract_strided_slice %14 {offsets = [16, 0], sizes = [8, 1024], strides = [1, 1]} : vector<32x1024xf32> to vector<8x1024xf32>
    %19 = vector.extract_strided_slice %14 {offsets = [24, 0], sizes = [8, 1024], strides = [1, 1]} : vector<32x1024xf32> to vector<8x1024xf32>
    %20 = arith.maximumf %18, %19 : vector<8x1024xf32>
    %21 = arith.maximumf %17, %20 : vector<8x1024xf32>
    %c0_7 = arith.constant 0 : index
    %c0_8 = arith.constant 0 : index
    %22 = vector.load %arg3[%c0_7, %c0_8] : memref<8x1xf32, #tpu.memory_space<vmem>>, vector<8x1xf32>
    %23 = vector.broadcast %22 : vector<8x1xf32> to vector<8x1024xf32>
    %24 = arith.addf %21, %23 : vector<8x1024xf32>
    %cst_9 = arith.constant 0.000000e+00 : f32
    %25 = vector.broadcast %cst_9 : f32 to vector<8x1024xf32>
    %26 = arith.maximumf %24, %25 : vector<8x1024xf32>
    %27 = vector.extract_strided_slice %13 {offsets = [32, 0], sizes = [32, 1024], strides = [1, 1]} : vector<128x1024xf32> to vector<32x1024xf32>
    %28 = vector.extract_strided_slice %27 {offsets = [0, 0], sizes = [8, 1024], strides = [1, 1]} : vector<32x1024xf32> to vector<8x1024xf32>
    %29 = vector.extract_strided_slice %27 {offsets = [8, 0], sizes = [8, 1024], strides = [1, 1]} : vector<32x1024xf32> to vector<8x1024xf32>
    %30 = arith.maximumf %28, %29 : vector<8x1024xf32>
    %31 = vector.extract_strided_slice %27 {offsets = [16, 0], sizes = [8, 1024], strides = [1, 1]} : vector<32x1024xf32> to vector<8x1024xf32>
    %32 = vector.extract_strided_slice %27 {offsets = [24, 0], sizes = [8, 1024], strides = [1, 1]} : vector<32x1024xf32> to vector<8x1024xf32>
    %33 = arith.maximumf %31, %32 : vector<8x1024xf32>
    %34 = arith.maximumf %30, %33 : vector<8x1024xf32>
    %c0_10 = arith.constant 0 : index
    %c0_11 = arith.constant 0 : index
    %35 = vector.load %arg3[%c0_10, %c0_11] : memref<8x1xf32, #tpu.memory_space<vmem>>, vector<8x1xf32>
    %36 = vector.broadcast %35 : vector<8x1xf32> to vector<8x1024xf32>
    %37 = arith.addf %34, %36 : vector<8x1024xf32>
    %cst_12 = arith.constant 0.000000e+00 : f32
    %38 = vector.broadcast %cst_12 : f32 to vector<8x1024xf32>
    %39 = arith.maximumf %37, %38 : vector<8x1024xf32>
    %40 = vector.extract_strided_slice %13 {offsets = [64, 0], sizes = [32, 1024], strides = [1, 1]} : vector<128x1024xf32> to vector<32x1024xf32>
    %41 = vector.extract_strided_slice %40 {offsets = [0, 0], sizes = [8, 1024], strides = [1, 1]} : vector<32x1024xf32> to vector<8x1024xf32>
    %42 = vector.extract_strided_slice %40 {offsets = [8, 0], sizes = [8, 1024], strides = [1, 1]} : vector<32x1024xf32> to vector<8x1024xf32>
    %43 = arith.maximumf %41, %42 : vector<8x1024xf32>
    %44 = vector.extract_strided_slice %40 {offsets = [16, 0], sizes = [8, 1024], strides = [1, 1]} : vector<32x1024xf32> to vector<8x1024xf32>
    %45 = vector.extract_strided_slice %40 {offsets = [24, 0], sizes = [8, 1024], strides = [1, 1]} : vector<32x1024xf32> to vector<8x1024xf32>
    %46 = arith.maximumf %44, %45 : vector<8x1024xf32>
    %47 = arith.maximumf %43, %46 : vector<8x1024xf32>
    %c0_13 = arith.constant 0 : index
    %c0_14 = arith.constant 0 : index
    %48 = vector.load %arg3[%c0_13, %c0_14] : memref<8x1xf32, #tpu.memory_space<vmem>>, vector<8x1xf32>
    %49 = vector.broadcast %48 : vector<8x1xf32> to vector<8x1024xf32>
    %50 = arith.addf %47, %49 : vector<8x1024xf32>
    %cst_15 = arith.constant 0.000000e+00 : f32
    %51 = vector.broadcast %cst_15 : f32 to vector<8x1024xf32>
    %52 = arith.maximumf %50, %51 : vector<8x1024xf32>
    %53 = vector.extract_strided_slice %13 {offsets = [96, 0], sizes = [32, 1024], strides = [1, 1]} : vector<128x1024xf32> to vector<32x1024xf32>
    %54 = vector.extract_strided_slice %53 {offsets = [0, 0], sizes = [8, 1024], strides = [1, 1]} : vector<32x1024xf32> to vector<8x1024xf32>
    %55 = vector.extract_strided_slice %53 {offsets = [8, 0], sizes = [8, 1024], strides = [1, 1]} : vector<32x1024xf32> to vector<8x1024xf32>
    %56 = arith.maximumf %54, %55 : vector<8x1024xf32>
    %57 = vector.extract_strided_slice %53 {offsets = [16, 0], sizes = [8, 1024], strides = [1, 1]} : vector<32x1024xf32> to vector<8x1024xf32>
    %58 = vector.extract_strided_slice %53 {offsets = [24, 0], sizes = [8, 1024], strides = [1, 1]} : vector<32x1024xf32> to vector<8x1024xf32>
    %59 = arith.maximumf %57, %58 : vector<8x1024xf32>
    %60 = arith.maximumf %56, %59 : vector<8x1024xf32>
    %c0_16 = arith.constant 0 : index
    %c0_17 = arith.constant 0 : index
    %61 = vector.load %arg3[%c0_16, %c0_17] : memref<8x1xf32, #tpu.memory_space<vmem>>, vector<8x1xf32>
    %62 = vector.broadcast %61 : vector<8x1xf32> to vector<8x1024xf32>
    %63 = arith.addf %60, %62 : vector<8x1024xf32>
    %cst_18 = arith.constant 0.000000e+00 : f32
    %64 = vector.broadcast %cst_18 : f32 to vector<8x1024xf32>
    %65 = arith.maximumf %63, %64 : vector<8x1024xf32>
    %66 = tpu.concatenate %26, %39, %52, %65 in 0 : vector<8x1024xf32>, vector<8x1024xf32>, vector<8x1024xf32>, vector<8x1024xf32> -> vector<32x1024xf32>
    %67 = arith.truncf %66 : vector<32x1024xf32> to vector<32x1024xbf16>
    %cst_19 = arith.constant 0.000000e+00 : bf16
    %68 = vector.broadcast %cst_19 : bf16 to vector<32x1xbf16>
    %69 = vector.extract_strided_slice %67 {offsets = [0, 1], sizes = [32, 1023], strides = [1, 1]} : vector<32x1024xbf16> to vector<32x1023xbf16>
    %70 = tpu.concatenate %69, %68 in 1 : vector<32x1023xbf16>, vector<32x1xbf16> -> vector<32x1024xbf16>
    %cst_20 = arith.constant 0.000000e+00 : bf16
    %71 = vector.broadcast %cst_20 : bf16 to vector<32x2xbf16>
    %72 = vector.extract_strided_slice %67 {offsets = [0, 2], sizes = [32, 1022], strides = [1, 1]} : vector<32x1024xbf16> to vector<32x1022xbf16>
    %73 = tpu.concatenate %72, %71 in 1 : vector<32x1022xbf16>, vector<32x2xbf16> -> vector<32x1024xbf16>
    %cst_21 = arith.constant 0.000000e+00 : bf16
    %74 = vector.broadcast %cst_21 : bf16 to vector<32x16xbf16>
    %75 = vector.extract_strided_slice %67 {offsets = [0, 16], sizes = [32, 1008], strides = [1, 1]} : vector<32x1024xbf16> to vector<32x1008xbf16>
    %76 = tpu.concatenate %75, %74 in 1 : vector<32x1008xbf16>, vector<32x16xbf16> -> vector<32x1024xbf16>
    %cst_22 = arith.constant 0.000000e+00 : bf16
    %77 = vector.broadcast %cst_22 : bf16 to vector<32x17xbf16>
    %78 = vector.extract_strided_slice %67 {offsets = [0, 17], sizes = [32, 1007], strides = [1, 1]} : vector<32x1024xbf16> to vector<32x1007xbf16>
    %79 = tpu.concatenate %78, %77 in 1 : vector<32x1007xbf16>, vector<32x17xbf16> -> vector<32x1024xbf16>
    %cst_23 = arith.constant 0.000000e+00 : bf16
    %80 = vector.broadcast %cst_23 : bf16 to vector<32x18xbf16>
    %81 = vector.extract_strided_slice %67 {offsets = [0, 18], sizes = [32, 1006], strides = [1, 1]} : vector<32x1024xbf16> to vector<32x1006xbf16>
    %82 = tpu.concatenate %81, %80 in 1 : vector<32x1006xbf16>, vector<32x18xbf16> -> vector<32x1024xbf16>
    %cst_24 = arith.constant 0.000000e+00 : bf16
    %83 = vector.broadcast %cst_24 : bf16 to vector<32x32xbf16>
    %84 = vector.extract_strided_slice %67 {offsets = [0, 32], sizes = [32, 992], strides = [1, 1]} : vector<32x1024xbf16> to vector<32x992xbf16>
    %85 = tpu.concatenate %84, %83 in 1 : vector<32x992xbf16>, vector<32x32xbf16> -> vector<32x1024xbf16>
    %cst_25 = arith.constant 0.000000e+00 : bf16
    %86 = vector.broadcast %cst_25 : bf16 to vector<32x33xbf16>
    %87 = vector.extract_strided_slice %67 {offsets = [0, 33], sizes = [32, 991], strides = [1, 1]} : vector<32x1024xbf16> to vector<32x991xbf16>
    %88 = tpu.concatenate %87, %86 in 1 : vector<32x991xbf16>, vector<32x33xbf16> -> vector<32x1024xbf16>
    %cst_26 = arith.constant 0.000000e+00 : bf16
    %89 = vector.broadcast %cst_26 : bf16 to vector<32x34xbf16>
    %90 = vector.extract_strided_slice %67 {offsets = [0, 34], sizes = [32, 990], strides = [1, 1]} : vector<32x1024xbf16> to vector<32x990xbf16>
    %91 = tpu.concatenate %90, %89 in 1 : vector<32x990xbf16>, vector<32x34xbf16> -> vector<32x1024xbf16>
    %92 = tpu.concatenate %67, %70, %73, %76, %79, %82, %85, %88, %91 in 0 : vector<32x1024xbf16>, vector<32x1024xbf16>, vector<32x1024xbf16>, vector<32x1024xbf16>, vector<32x1024xbf16>, vector<32x1024xbf16>, vector<32x1024xbf16>, vector<32x1024xbf16>, vector<32x1024xbf16> -> vector<288x1024xbf16>
    %c0_27 = arith.constant 0 : index
    %c0_28 = arith.constant 0 : index
    %93 = vector.load %arg4[%c0_27, %c0_28] : memref<64x288xbf16, #tpu.memory_space<vmem>>, vector<64x288xbf16>
    %cst_29 = arith.constant dense<0.000000e+00> : vector<64x1024xf32>
    %94 = tpu.matmul %93, %92, %cst_29 {dimension_numbers = #tpu.dot_dimension_numbers<[1], [0], [0], [1], [0, 0, 1, 1], [], []>} : vector<64x288xbf16>, vector<288x1024xbf16>, vector<64x1024xf32> -> vector<64x1024xf32>
    %95 = vector.extract_strided_slice %94 {offsets = [0, 0], sizes = [16, 1024], strides = [1, 1]} : vector<64x1024xf32> to vector<16x1024xf32>
    %96 = vector.extract_strided_slice %94 {offsets = [16, 0], sizes = [16, 1024], strides = [1, 1]} : vector<64x1024xf32> to vector<16x1024xf32>
    %97 = arith.maximumf %95, %96 : vector<16x1024xf32>
    %98 = vector.extract_strided_slice %94 {offsets = [32, 0], sizes = [16, 1024], strides = [1, 1]} : vector<64x1024xf32> to vector<16x1024xf32>
    %99 = vector.extract_strided_slice %94 {offsets = [48, 0], sizes = [16, 1024], strides = [1, 1]} : vector<64x1024xf32> to vector<16x1024xf32>
    %100 = arith.maximumf %98, %99 : vector<16x1024xf32>
    %101 = arith.maximumf %97, %100 : vector<16x1024xf32>
    %c0_30 = arith.constant 0 : index
    %c0_31 = arith.constant 0 : index
    %102 = vector.load %arg5[%c0_30, %c0_31] : memref<16x1xf32, #tpu.memory_space<vmem>>, vector<16x1xf32>
    %103 = vector.broadcast %102 : vector<16x1xf32> to vector<16x1024xf32>
    %104 = arith.addf %101, %103 : vector<16x1024xf32>
    %cst_32 = arith.constant 0.000000e+00 : f32
    %105 = vector.broadcast %cst_32 : f32 to vector<16x1024xf32>
    %106 = arith.maximumf %104, %105 : vector<16x1024xf32>
    %107 = vector.extract_strided_slice %106 {offsets = [0, 0], sizes = [1, 256], strides = [1, 1]} : vector<16x1024xf32> to vector<1x256xf32>
    %108 = vector.extract_strided_slice %106 {offsets = [1, 0], sizes = [1, 256], strides = [1, 1]} : vector<16x1024xf32> to vector<1x256xf32>
    %109 = vector.extract_strided_slice %106 {offsets = [2, 0], sizes = [1, 256], strides = [1, 1]} : vector<16x1024xf32> to vector<1x256xf32>
    %110 = vector.extract_strided_slice %106 {offsets = [3, 0], sizes = [1, 256], strides = [1, 1]} : vector<16x1024xf32> to vector<1x256xf32>
    %111 = vector.extract_strided_slice %106 {offsets = [4, 0], sizes = [1, 256], strides = [1, 1]} : vector<16x1024xf32> to vector<1x256xf32>
    %112 = vector.extract_strided_slice %106 {offsets = [5, 0], sizes = [1, 256], strides = [1, 1]} : vector<16x1024xf32> to vector<1x256xf32>
    %113 = vector.extract_strided_slice %106 {offsets = [6, 0], sizes = [1, 256], strides = [1, 1]} : vector<16x1024xf32> to vector<1x256xf32>
    %114 = vector.extract_strided_slice %106 {offsets = [7, 0], sizes = [1, 256], strides = [1, 1]} : vector<16x1024xf32> to vector<1x256xf32>
    %115 = vector.extract_strided_slice %106 {offsets = [8, 0], sizes = [1, 256], strides = [1, 1]} : vector<16x1024xf32> to vector<1x256xf32>
    %116 = vector.extract_strided_slice %106 {offsets = [9, 0], sizes = [1, 256], strides = [1, 1]} : vector<16x1024xf32> to vector<1x256xf32>
    %117 = vector.extract_strided_slice %106 {offsets = [10, 0], sizes = [1, 256], strides = [1, 1]} : vector<16x1024xf32> to vector<1x256xf32>
    %118 = vector.extract_strided_slice %106 {offsets = [11, 0], sizes = [1, 256], strides = [1, 1]} : vector<16x1024xf32> to vector<1x256xf32>
    %119 = vector.extract_strided_slice %106 {offsets = [12, 0], sizes = [1, 256], strides = [1, 1]} : vector<16x1024xf32> to vector<1x256xf32>
    %120 = vector.extract_strided_slice %106 {offsets = [13, 0], sizes = [1, 256], strides = [1, 1]} : vector<16x1024xf32> to vector<1x256xf32>
    %121 = vector.extract_strided_slice %106 {offsets = [14, 0], sizes = [1, 256], strides = [1, 1]} : vector<16x1024xf32> to vector<1x256xf32>
    %122 = vector.extract_strided_slice %106 {offsets = [15, 0], sizes = [1, 256], strides = [1, 1]} : vector<16x1024xf32> to vector<1x256xf32>
    %123 = tpu.concatenate %107, %108, %109, %110, %111, %112, %113, %114, %115, %116, %117, %118, %119, %120, %121, %122 in 1 : vector<1x256xf32>, vector<1x256xf32>, vector<1x256xf32>, vector<1x256xf32>, vector<1x256xf32>, vector<1x256xf32>, vector<1x256xf32>, vector<1x256xf32>, vector<1x256xf32>, vector<1x256xf32>, vector<1x256xf32>, vector<1x256xf32>, vector<1x256xf32>, vector<1x256xf32>, vector<1x256xf32>, vector<1x256xf32> -> vector<1x4096xf32>
    %124 = vector.extract_strided_slice %106 {offsets = [0, 256], sizes = [1, 256], strides = [1, 1]} : vector<16x1024xf32> to vector<1x256xf32>
    %125 = vector.extract_strided_slice %106 {offsets = [1, 256], sizes = [1, 256], strides = [1, 1]} : vector<16x1024xf32> to vector<1x256xf32>
    %126 = vector.extract_strided_slice %106 {offsets = [2, 256], sizes = [1, 256], strides = [1, 1]} : vector<16x1024xf32> to vector<1x256xf32>
    %127 = vector.extract_strided_slice %106 {offsets = [3, 256], sizes = [1, 256], strides = [1, 1]} : vector<16x1024xf32> to vector<1x256xf32>
    %128 = vector.extract_strided_slice %106 {offsets = [4, 256], sizes = [1, 256], strides = [1, 1]} : vector<16x1024xf32> to vector<1x256xf32>
    %129 = vector.extract_strided_slice %106 {offsets = [5, 256], sizes = [1, 256], strides = [1, 1]} : vector<16x1024xf32> to vector<1x256xf32>
    %130 = vector.extract_strided_slice %106 {offsets = [6, 256], sizes = [1, 256], strides = [1, 1]} : vector<16x1024xf32> to vector<1x256xf32>
    %131 = vector.extract_strided_slice %106 {offsets = [7, 256], sizes = [1, 256], strides = [1, 1]} : vector<16x1024xf32> to vector<1x256xf32>
    %132 = vector.extract_strided_slice %106 {offsets = [8, 256], sizes = [1, 256], strides = [1, 1]} : vector<16x1024xf32> to vector<1x256xf32>
    %133 = vector.extract_strided_slice %106 {offsets = [9, 256], sizes = [1, 256], strides = [1, 1]} : vector<16x1024xf32> to vector<1x256xf32>
    %134 = vector.extract_strided_slice %106 {offsets = [10, 256], sizes = [1, 256], strides = [1, 1]} : vector<16x1024xf32> to vector<1x256xf32>
    %135 = vector.extract_strided_slice %106 {offsets = [11, 256], sizes = [1, 256], strides = [1, 1]} : vector<16x1024xf32> to vector<1x256xf32>
    %136 = vector.extract_strided_slice %106 {offsets = [12, 256], sizes = [1, 256], strides = [1, 1]} : vector<16x1024xf32> to vector<1x256xf32>
    %137 = vector.extract_strided_slice %106 {offsets = [13, 256], sizes = [1, 256], strides = [1, 1]} : vector<16x1024xf32> to vector<1x256xf32>
    %138 = vector.extract_strided_slice %106 {offsets = [14, 256], sizes = [1, 256], strides = [1, 1]} : vector<16x1024xf32> to vector<1x256xf32>
    %139 = vector.extract_strided_slice %106 {offsets = [15, 256], sizes = [1, 256], strides = [1, 1]} : vector<16x1024xf32> to vector<1x256xf32>
    %140 = tpu.concatenate %124, %125, %126, %127, %128, %129, %130, %131, %132, %133, %134, %135, %136, %137, %138, %139 in 1 : vector<1x256xf32>, vector<1x256xf32>, vector<1x256xf32>, vector<1x256xf32>, vector<1x256xf32>, vector<1x256xf32>, vector<1x256xf32>, vector<1x256xf32>, vector<1x256xf32>, vector<1x256xf32>, vector<1x256xf32>, vector<1x256xf32>, vector<1x256xf32>, vector<1x256xf32>, vector<1x256xf32>, vector<1x256xf32> -> vector<1x4096xf32>
    %141 = vector.extract_strided_slice %106 {offsets = [0, 512], sizes = [1, 256], strides = [1, 1]} : vector<16x1024xf32> to vector<1x256xf32>
    %142 = vector.extract_strided_slice %106 {offsets = [1, 512], sizes = [1, 256], strides = [1, 1]} : vector<16x1024xf32> to vector<1x256xf32>
    %143 = vector.extract_strided_slice %106 {offsets = [2, 512], sizes = [1, 256], strides = [1, 1]} : vector<16x1024xf32> to vector<1x256xf32>
    %144 = vector.extract_strided_slice %106 {offsets = [3, 512], sizes = [1, 256], strides = [1, 1]} : vector<16x1024xf32> to vector<1x256xf32>
    %145 = vector.extract_strided_slice %106 {offsets = [4, 512], sizes = [1, 256], strides = [1, 1]} : vector<16x1024xf32> to vector<1x256xf32>
    %146 = vector.extract_strided_slice %106 {offsets = [5, 512], sizes = [1, 256], strides = [1, 1]} : vector<16x1024xf32> to vector<1x256xf32>
    %147 = vector.extract_strided_slice %106 {offsets = [6, 512], sizes = [1, 256], strides = [1, 1]} : vector<16x1024xf32> to vector<1x256xf32>
    %148 = vector.extract_strided_slice %106 {offsets = [7, 512], sizes = [1, 256], strides = [1, 1]} : vector<16x1024xf32> to vector<1x256xf32>
    %149 = vector.extract_strided_slice %106 {offsets = [8, 512], sizes = [1, 256], strides = [1, 1]} : vector<16x1024xf32> to vector<1x256xf32>
    %150 = vector.extract_strided_slice %106 {offsets = [9, 512], sizes = [1, 256], strides = [1, 1]} : vector<16x1024xf32> to vector<1x256xf32>
    %151 = vector.extract_strided_slice %106 {offsets = [10, 512], sizes = [1, 256], strides = [1, 1]} : vector<16x1024xf32> to vector<1x256xf32>
    %152 = vector.extract_strided_slice %106 {offsets = [11, 512], sizes = [1, 256], strides = [1, 1]} : vector<16x1024xf32> to vector<1x256xf32>
    %153 = vector.extract_strided_slice %106 {offsets = [12, 512], sizes = [1, 256], strides = [1, 1]} : vector<16x1024xf32> to vector<1x256xf32>
    %154 = vector.extract_strided_slice %106 {offsets = [13, 512], sizes = [1, 256], strides = [1, 1]} : vector<16x1024xf32> to vector<1x256xf32>
    %155 = vector.extract_strided_slice %106 {offsets = [14, 512], sizes = [1, 256], strides = [1, 1]} : vector<16x1024xf32> to vector<1x256xf32>
    %156 = vector.extract_strided_slice %106 {offsets = [15, 512], sizes = [1, 256], strides = [1, 1]} : vector<16x1024xf32> to vector<1x256xf32>
    %157 = tpu.concatenate %141, %142, %143, %144, %145, %146, %147, %148, %149, %150, %151, %152, %153, %154, %155, %156 in 1 : vector<1x256xf32>, vector<1x256xf32>, vector<1x256xf32>, vector<1x256xf32>, vector<1x256xf32>, vector<1x256xf32>, vector<1x256xf32>, vector<1x256xf32>, vector<1x256xf32>, vector<1x256xf32>, vector<1x256xf32>, vector<1x256xf32>, vector<1x256xf32>, vector<1x256xf32>, vector<1x256xf32>, vector<1x256xf32> -> vector<1x4096xf32>
    %158 = vector.extract_strided_slice %106 {offsets = [0, 768], sizes = [1, 256], strides = [1, 1]} : vector<16x1024xf32> to vector<1x256xf32>
    %159 = vector.extract_strided_slice %106 {offsets = [1, 768], sizes = [1, 256], strides = [1, 1]} : vector<16x1024xf32> to vector<1x256xf32>
    %160 = vector.extract_strided_slice %106 {offsets = [2, 768], sizes = [1, 256], strides = [1, 1]} : vector<16x1024xf32> to vector<1x256xf32>
    %161 = vector.extract_strided_slice %106 {offsets = [3, 768], sizes = [1, 256], strides = [1, 1]} : vector<16x1024xf32> to vector<1x256xf32>
    %162 = vector.extract_strided_slice %106 {offsets = [4, 768], sizes = [1, 256], strides = [1, 1]} : vector<16x1024xf32> to vector<1x256xf32>
    %163 = vector.extract_strided_slice %106 {offsets = [5, 768], sizes = [1, 256], strides = [1, 1]} : vector<16x1024xf32> to vector<1x256xf32>
    %164 = vector.extract_strided_slice %106 {offsets = [6, 768], sizes = [1, 256], strides = [1, 1]} : vector<16x1024xf32> to vector<1x256xf32>
    %165 = vector.extract_strided_slice %106 {offsets = [7, 768], sizes = [1, 256], strides = [1, 1]} : vector<16x1024xf32> to vector<1x256xf32>
    %166 = vector.extract_strided_slice %106 {offsets = [8, 768], sizes = [1, 256], strides = [1, 1]} : vector<16x1024xf32> to vector<1x256xf32>
    %167 = vector.extract_strided_slice %106 {offsets = [9, 768], sizes = [1, 256], strides = [1, 1]} : vector<16x1024xf32> to vector<1x256xf32>
    %168 = vector.extract_strided_slice %106 {offsets = [10, 768], sizes = [1, 256], strides = [1, 1]} : vector<16x1024xf32> to vector<1x256xf32>
    %169 = vector.extract_strided_slice %106 {offsets = [11, 768], sizes = [1, 256], strides = [1, 1]} : vector<16x1024xf32> to vector<1x256xf32>
    %170 = vector.extract_strided_slice %106 {offsets = [12, 768], sizes = [1, 256], strides = [1, 1]} : vector<16x1024xf32> to vector<1x256xf32>
    %171 = vector.extract_strided_slice %106 {offsets = [13, 768], sizes = [1, 256], strides = [1, 1]} : vector<16x1024xf32> to vector<1x256xf32>
    %172 = vector.extract_strided_slice %106 {offsets = [14, 768], sizes = [1, 256], strides = [1, 1]} : vector<16x1024xf32> to vector<1x256xf32>
    %173 = vector.extract_strided_slice %106 {offsets = [15, 768], sizes = [1, 256], strides = [1, 1]} : vector<16x1024xf32> to vector<1x256xf32>
    %174 = tpu.concatenate %158, %159, %160, %161, %162, %163, %164, %165, %166, %167, %168, %169, %170, %171, %172, %173 in 1 : vector<1x256xf32>, vector<1x256xf32>, vector<1x256xf32>, vector<1x256xf32>, vector<1x256xf32>, vector<1x256xf32>, vector<1x256xf32>, vector<1x256xf32>, vector<1x256xf32>, vector<1x256xf32>, vector<1x256xf32>, vector<1x256xf32>, vector<1x256xf32>, vector<1x256xf32>, vector<1x256xf32>, vector<1x256xf32> -> vector<1x4096xf32>
    %175 = tpu.concatenate %123, %140, %157, %174 in 0 : vector<1x4096xf32>, vector<1x4096xf32>, vector<1x4096xf32>, vector<1x4096xf32> -> vector<4x4096xf32>
    %176 = arith.truncf %175 : vector<4x4096xf32> to vector<4x4096xbf16>
    %c0_33 = arith.constant 0 : index
    %c0_34 = arith.constant 0 : index
    %177 = vector.load %arg6[%c0_33, %c0_34] : memref<4096x128xbf16, #tpu.memory_space<vmem>>, vector<4096x128xbf16>
    %cst_35 = arith.constant dense<0.000000e+00> : vector<4x128xf32>
    %178 = tpu.matmul %176, %177, %cst_35 {dimension_numbers = #tpu.dot_dimension_numbers<[1], [0], [0], [1], [0, 0, 1, 1], [], []>} : vector<4x4096xbf16>, vector<4096x128xbf16>, vector<4x128xf32> -> vector<4x128xf32>
    %c0_36 = arith.constant 0 : index
    %c0_37 = arith.constant 0 : index
    %179 = vector.load %arg7[%c0_36, %c0_37] : memref<1x128xf32, #tpu.memory_space<vmem>>, vector<1x128xf32>
    %180 = vector.broadcast %179 : vector<1x128xf32> to vector<4x128xf32>
    %181 = arith.addf %178, %180 : vector<4x128xf32>
    %cst_38 = arith.constant 0.000000e+00 : f32
    %182 = vector.broadcast %cst_38 : f32 to vector<4x128xf32>
    %183 = arith.maximumf %181, %182 : vector<4x128xf32>
    %184 = arith.truncf %183 : vector<4x128xf32> to vector<4x128xbf16>
    %c0_39 = arith.constant 0 : index
    %c0_40 = arith.constant 0 : index
    %185 = vector.load %arg8[%c0_39, %c0_40] : memref<128x128xbf16, #tpu.memory_space<vmem>>, vector<128x128xbf16>
    %cst_41 = arith.constant dense<0.000000e+00> : vector<4x128xf32>
    %186 = tpu.matmul %184, %185, %cst_41 {dimension_numbers = #tpu.dot_dimension_numbers<[1], [0], [0], [1], [0, 0, 1, 1], [], []>} : vector<4x128xbf16>, vector<128x128xbf16>, vector<4x128xf32> -> vector<4x128xf32>
    %c0_42 = arith.constant 0 : index
    %c0_43 = arith.constant 0 : index
    %187 = vector.load %arg9[%c0_42, %c0_43] : memref<1x128xf32, #tpu.memory_space<vmem>>, vector<1x128xf32>
    %188 = vector.broadcast %187 : vector<1x128xf32> to vector<4x128xf32>
    %189 = arith.addf %186, %188 : vector<4x128xf32>
    %cst_44 = arith.constant 0.000000e+00 : f32
    %190 = vector.broadcast %cst_44 : f32 to vector<4x128xf32>
    %191 = arith.maximumf %189, %190 : vector<4x128xf32>
    %192 = arith.truncf %191 : vector<4x128xf32> to vector<4x128xbf16>
    %c0_45 = arith.constant 0 : index
    %c0_46 = arith.constant 0 : index
    %193 = vector.load %arg10[%c0_45, %c0_46] : memref<128x128xbf16, #tpu.memory_space<vmem>>, vector<128x128xbf16>
    %cst_47 = arith.constant dense<0.000000e+00> : vector<4x128xf32>
    %194 = tpu.matmul %192, %193, %cst_47 {dimension_numbers = #tpu.dot_dimension_numbers<[1], [0], [0], [1], [0, 0, 1, 1], [], []>} : vector<4x128xbf16>, vector<128x128xbf16>, vector<4x128xf32> -> vector<4x128xf32>
    %c0_48 = arith.constant 0 : index
    %c0_49 = arith.constant 0 : index
    %195 = vector.load %arg11[%c0_48, %c0_49] : memref<1x128xf32, #tpu.memory_space<vmem>>, vector<1x128xf32>
    %196 = vector.broadcast %195 : vector<1x128xf32> to vector<4x128xf32>
    %197 = arith.addf %194, %196 : vector<4x128xf32>
    %c0_50 = arith.constant 0 : index
    %c0_51 = arith.constant 0 : index
    %c0_52 = arith.constant 0 : index
    %198 = vector.load %arg12[%c0_50, %c0_51, %c0_52] : memref<1x4x128xf32, #tpu.memory_space<vmem>>, vector<1x4x128xf32>
    %199 = vector.shape_cast %198 : vector<1x4x128xf32> to vector<4x128xf32>
    %200 = vector.shape_cast %197 : vector<4x128xf32> to vector<1x4x128xf32>
    tpu.vector_store %arg12[%c0_50, %c0_51, %c0_52], %200 {strides = array<i32>} : memref<1x4x128xf32, #tpu.memory_space<vmem>>, vector<1x4x128xf32>,
    return
  }
  func.func @transform_0(%arg0: i32) -> (i32, i32, i32) {
    %c0_i32 = arith.constant 0 : i32
    %c0_i32_0 = arith.constant 0 : i32
    %c0_i32_1 = arith.constant 0 : i32
    return %arg0, %c0_i32, %c0_i32_0 : i32, i32, i32
  }
  func.func @transform_1(%arg0: i32) -> (i32, i32) {
    %c0_i32 = arith.constant 0 : i32
    %c0_i32_0 = arith.constant 0 : i32
    %c0_i32_1 = arith.constant 0 : i32
    return %c0_i32, %c0_i32_0 : i32, i32
  }
  func.func @transform_2(%arg0: i32) -> (i32, i32) {
    %c0_i32 = arith.constant 0 : i32
    %c0_i32_0 = arith.constant 0 : i32
    %c0_i32_1 = arith.constant 0 : i32
    return %c0_i32, %c0_i32_0 : i32, i32
  }
  func.func @transform_3(%arg0: i32) -> (i32, i32) {
    %c0_i32 = arith.constant 0 : i32
    %c0_i32_0 = arith.constant 0 : i32
    %c0_i32_1 = arith.constant 0 : i32
    return %c0_i32, %c0_i32_0 : i32, i32
  }
  func.func @transform_4(%arg0: i32) -> (i32, i32) {
    %c0_i32 = arith.constant 0 : i32
    %c0_i32_0 = arith.constant 0 : i32
    %c0_i32_1 = arith.constant 0 : i32
    return %c0_i32, %c0_i32_0 : i32, i32
  }
  func.func @transform_5(%arg0: i32) -> (i32, i32) {
    %c0_i32 = arith.constant 0 : i32
    %c0_i32_0 = arith.constant 0 : i32
    %c0_i32_1 = arith.constant 0 : i32
    return %c0_i32, %c0_i32_0 : i32, i32
  }
  func.func @transform_6(%arg0: i32) -> (i32, i32) {
    %c0_i32 = arith.constant 0 : i32
    %c0_i32_0 = arith.constant 0 : i32
    %c0_i32_1 = arith.constant 0 : i32
    return %c0_i32, %c0_i32_0 : i32, i32
  }
  func.func @transform_7(%arg0: i32) -> (i32, i32) {
    %c0_i32 = arith.constant 0 : i32
    %c0_i32_0 = arith.constant 0 : i32
    %c0_i32_1 = arith.constant 0 : i32
    return %c0_i32, %c0_i32_0 : i32, i32
  }
  func.func @transform_8(%arg0: i32) -> (i32, i32) {
    %c0_i32 = arith.constant 0 : i32
    %c0_i32_0 = arith.constant 0 : i32
    %c0_i32_1 = arith.constant 0 : i32
    return %c0_i32, %c0_i32_0 : i32, i32
  }
  func.func @transform_9(%arg0: i32) -> (i32, i32) {
    %c0_i32 = arith.constant 0 : i32
    %c0_i32_0 = arith.constant 0 : i32
    %c0_i32_1 = arith.constant 0 : i32
    return %c0_i32, %c0_i32_0 : i32, i32
  }
  func.func @transform_10(%arg0: i32) -> (i32, i32) {
    %c0_i32 = arith.constant 0 : i32
    %c0_i32_0 = arith.constant 0 : i32
    %c0_i32_1 = arith.constant 0 : i32
    return %c0_i32, %c0_i32_0 : i32, i32
  }
  func.func @transform_11(%arg0: i32) -> (i32, i32, i32) {
    %c0_i32 = arith.constant 0 : i32
    %c0_i32_0 = arith.constant 0 : i32
    %c0_i32_1 = arith.constant 0 : i32
    return %arg0, %c0_i32, %c0_i32_0 : i32, i32, i32
  }
}

</mosaic_0001>

<bundles_post_ra>
// kernel: mydnn_forward.1
= control target key start
LH: loop header
LB: loop body
LE: loop exit
PB: predicated region body
PF: predicated region fallthrough
CT: control target
= control target key end

     0   :  { %16 = vsyncpa [#allocation3], 0  ;;  %s10691_s0 = inlined_call_operand.vmem [shape: bf16[2,48,1024], index: 0, kind: input, shape index: {}]   ;;  %s10692_s1 = inlined_call_operand.vmem [shape: bf16[128,192], index: 1, kind: input, shape index: {}]   ;;  %s10693_s2 = inlined_call_operand.vmem [shape: f32[8,1], index: 2, kind: input, shape index: {}]   ;;  %s10694_s3 = inlined_call_operand.vmem [shape: bf16[64,288], index: 3, kind: input, shape index: {}]   ;;  %s10695_s4 = inlined_call_operand.vmem [shape: f32[16,1], index: 4, kind: input, shape index: {}]   ;;  %s10696_s5 = inlined_call_operand.vmem [shape: bf16[4096,128], index: 5, kind: input, shape index: {}]   ;;  %s10697_s6 = inlined_call_operand.vmem [shape: f32[1,128], index: 6, kind: input, shape index: {}]   ;;  %s10698_s7 = inlined_call_operand.vmem [shape: bf16[128,128], index: 7, kind: input, shape index: {}]   ;;  %s10699_s8 = inlined_call_operand.vmem [shape: f32[1,128], index: 8, kind: input, shape index: {}]   ;;  %s10700_s9 = inlined_call_operand.vmem [shape: bf16[128,128], index: 9, kind: input, shape index: {}]   ;;  %s10701_s10 = inlined_call_operand.vmem [shape: f32[1,128], index: 10, kind: input, shape index: {}]   ;;  %s10702_s11 = inlined_call_operand.hbm [shape: f32[2,4,128], index: 11, kind: output, shape index: {}]  }
   0x1   :  { %18 = vsyncpa [#allocation3 + $0x1], 0  ;;  %s7820_s17 = smov 0   ;;  %s7822_s18 = smov 0  }
   0x2   :  { %s7824_s19 = smov 0   ;;  %s7826_s20 = smov 0  }
   0x3 LB: > { %s7841_s21 = sadd.s32 4294967295, %s7746_s20   ;;  %s6362_s22 = sadd.s32 4294967294, %s7746_s20   ;;  %s7746_s20 = sphi %s7826_s20, %s10718_s20   ;;  %s7742_s19 = sphi %s7824_s19, %s10717_s19   ;;  %s7738_s18 = sphi %s7822_s18, %s10716_s18   ;;  %s7734_s17 = sphi %s7820_s17, %s10715_s17  }
   0x4   : > { %s7845_s23 = sadd.s32 1, %s7746_s20   ;;  %s267_s24 = sadd.s32 1, %s7742_s19 }
   0x5   : > { %s264_s25 = ssub.s32 %s7746_s20, %s7845_s23  ;;  %p277_p0 = scmp.ne.s32.totalorder %s7742_s19, %s7738_s18 }
   0x6   : > { %p265_p1 = scmp.eq.s32.totalorder %s264_s25, 0  ;;  %p278_p2 = scmp.eq.s32.totalorder %s7841_s21, 1 }
   0x7   : > { %p283_p3 = scmp.ne.s32.totalorder %s7738_s18, %s7734_s17  ;;  %p284_p4 = scmp.eq.s32.totalorder %s6362_s22, 1 }
   0x8   : > { %s7856_s26 = scalar_select %p265_p1, %s7742_s19, %s267_s24  }
   0x9   : > { %p7858_p5 = por %p278_p2, %p277_p0  ;;  %p7862_p6 = por %p284_p4, %p283_p3 }
   0xa   : > { %p6365_p7 = scmp.ge.s32.totalorder %s7746_s20, 1  ;;  %p340_p8 = scmp.lt.s32.totalorder %s7746_s20, 3 }
   0xc   : > { %p341_p9 = pnand %p6365_p7, %p340_p8 }
   0xe   : > { %344 = sbr.rel (%p341_p9) target bundleno = 2061 (0x80d), region = 64 }
  0x15   : > { %p380_p10 = scmp.lt.s32.totalorder %s7841_s21, 1  ;;  %s7748_s15 = smov 127   ;;  %v7371_v27 = vld [vmem:[%s10692_s1 + $0x4] ss:$8 sps:$4 sm:$0xff]   ;;  %vm922_vm0 = vcmask 523264   ;;  %vm554_vm1 = vcmask 1039360  }
  0x16   : > { %s7749_s16 = smov 112   ;;  %s7750_s22 = smov 111   ;;  %6408 = vmatprep.mubr.msk.bf16.mxu0 %vm922_vm0, %v7371_v27  ;;  %6416 = vmatprep.mubr.msk.bf16.mxu1 %vm922_vm0, %v7371_v27  ;;  %vm656_vm2 = vcmask 916480   ;;  %vm757_vm3 = vcmask 908288   ;;  %v7751_v27 = vmov 0   ;;  %vm1695_vm4 = vcmask 1031168  }
  0x17   : > { %s381_s29 = scalar_select %p380_p10, %s7841_s21, 1  ;;  %7369 = vset.pattern.permute.xlu0 %v7751_v27  ;;  %7370 = vset.pattern.permute.xlu1 %v7751_v27  ;;  %vm1895_vm5 = vcmask 900096   ;;  %vm1963_vm6 = vcmask 785408   ;;  %vm2031_vm7 = vcmask 777216   ;;  %vm2099_vm8 = vcmask 769024  }
  0x18   : > { %s7752_s25 = smov 126   ;;  %s7755_s12 = smov 95   ;;  %vm2211_vm9 = vcmask 261120   ;;  %vm3236_vm10 = vcmask 1040384   ;;  %vm3269_vm11 = vcmask 1041408   ;;  %vm3302_vm12 = vcmask 1042432  }
  0x19   : > { %s7318_s30 = smul.u32 192, %s381_s29  ;;  %s7753_s29 = smov 110   ;;  %vm7758_vm13 = vmmov 0  }
  0x1a   : > { %s7756_s24 = smov 94  }
  0x1b   : > { %s7873_s14 = scalar_lea.vmem %s10691_s0, %s7318_s30  ;;  %s7754_s30 = smov 96  }
  0x1c   : > { %v386_v0 = vld [vmem:[%s7873_s14] sm:$0xff]  ;;  %v387_v2 = vld [vmem:[%s7873_s14 + $0x8] sm:$0xff]  ;;  %v389_v15 = vld [vmem:[%s7873_s14 + $0x18] sm:$0xff] }
  0x1d   : > { %v390_v1 = vld [vmem:[%s7873_s14 + $0x20] sm:$0xff]  ;;  %v391_v5 = vld [vmem:[%s7873_s14 + $0x28] sm:$0xff]  ;;  %v393_v16 = vld [vmem:[%s7873_s14 + $0x38] sm:$0xff] }
  0x1e   : > { %v6369_v3 = vcombine.high %v386_v0, %v390_v1  ;;  %v6368_v4 = vcombine.low %v386_v0, %v390_v1  ;;  %v394_v6 = vld [vmem:[%s7873_s14 + $0x40] sm:$0xff]  ;;  %v7881_v8 = vcombine.high %v387_v2, %v391_v5  ;;  %v6370_v9 = vcombine.low %v387_v2, %v391_v5  ;;  %v395_v11 = vld [vmem:[%s7873_s14 + $0x48] sm:$0xff]  ;;  %v388_v28 = vld [vmem:[%s7873_s14 + $0x10] sm:$0xff] }
  0x1f   : > { %v398_v7 = vld [vmem:[%s7873_s14 + $0x60] sm:$0xff]  ;;  %v399_v12 = vld [vmem:[%s7873_s14 + $0x68] sm:$0xff]  ;;  %v7894_v18 = vcombine.high %v389_v15, %v393_v16  ;;  %v392_v29 = vld [vmem:[%s7873_s14 + $0x30] sm:$0xff]  ;;  %v7944_v32 = vcombine.low %v389_v15, %v393_v16 }
  0x20   : > { %508 = vrot.lane.b32.xlu0 %v6369_v3, %s7748_s15  ;;  %506 = vrot.lane.b32.xlu1 %v6368_v4, %s7748_s15  ;;  %v6377_v10 = vcombine.high %v394_v6, %v398_v7  ;;  %v402_v13 = vld [vmem:[%s7873_s14 + $0x80] sm:$0xff]  ;;  %v7892_v17 = vcombine.high %v395_v11, %v399_v12  ;;  %v6378_v19 = vcombine.low %v395_v11, %v399_v12  ;;  %v403_v22 = vld [vmem:[%s7873_s14 + $0x88] sm:$0xff] }
  0x21   : > { %947 = vmatprep.subr.bf16.mxu0 %v6369_v3  ;;  %1060 = vmatprep.subr.bf16.mxu1 %v7881_v8  ;;  %v406_v14 = vld [vmem:[%s7873_s14 + $0xa0] sm:$0xff]  ;;  %v6376_v20 = vcombine.low %v394_v6, %v398_v7  ;;  %v407_v23 = vld [vmem:[%s7873_s14 + $0xa8] sm:$0xff]  ;;  %v7936_v30 = vcombine.low %v388_v28, %v392_v29  ;;  %v7938_v31 = vcombine.high %v388_v28, %v392_v29  ;;  %v396_v33 = vld [vmem:[%s7873_s14 + $0x50] sm:$0xff] }
  0x22   : > { %948 = vmatpush1.bf16.msra.mxu0 %v6368_v4  ;;  %1061 = vmatpush1.bf16.msra.mxu1 %v6370_v9  ;;  %v6385_v21 = vcombine.high %v402_v13, %v406_v14  ;;  %v7901_v24 = vcombine.high %v403_v22, %v407_v23  ;;  %v6386_v25 = vcombine.low %v403_v22, %v407_v23  ;;  %v400_v34 = vld [vmem:[%s7873_s14 + $0x70] sm:$0xff]  ;;  %v397_v35 = vld [vmem:[%s7873_s14 + $0x58] sm:$0xff] }
  0x23   : > { %949 = vmatprep.subr.bf16.mxu0 %v6377_v10  ;;  %1062 = vmatprep.subr.bf16.mxu1 %v7892_v17  ;;  %v6384_v26 = vcombine.low %v402_v13, %v406_v14  ;;  %v401_v36 = vld [vmem:[%s7873_s14 + $0x78] sm:$0xff]  ;;  %v7954_v37 = vcombine.low %v396_v33, %v400_v34  ;;  %v7956_v38 = vcombine.high %v396_v33, %v400_v34  ;;  %v404_v40 = vld [vmem:[%s7873_s14 + $0x90] sm:$0xff]  ;;  %v8106_v34 = vld [vmem:[%s10692_s1] ss:$8 sps:$4 sm:$0xff]  }
  0x24   : > { %510 = vrot.lane.b32.xlu0 %v6370_v9, %s7748_s15  ;;  %524 = vrot.lane.b32.xlu1 %v6377_v10, %s7748_s15  ;;  %v7962_v39 = vcombine.low %v397_v35, %v401_v36  ;;  %v408_v41 = vld [vmem:[%s7873_s14 + $0xb0] sm:$0xff]  ;;  %v405_v42 = vld [vmem:[%s7873_s14 + $0x98] sm:$0xff]  ;;  %v8044_v57 = vcombine.high %v397_v35, %v401_v36 }
  0x25   : > { %v409_v43 = vld [vmem:[%s7873_s14 + $0xb8] sm:$0xff]  ;;  %v7972_v44 = vcombine.low %v404_v40, %v408_v41  ;;  %v7974_v45 = vcombine.high %v404_v40, %v408_v41  ;;  %s6841_s14 = sshll.u32 %s7841_s21, 6 }
  0x26   : > { %950 = vmatpush1.bf16.msra.mxu0 %v6376_v20  ;;  %1063 = vmatpush1.bf16.msra.mxu1 %v6378_v19  ;;  %v7980_v46 = vcombine.low %v405_v42, %v409_v43  ;;  %v8046_v58 = vcombine.high %v405_v42, %v409_v43  ;;  %v8112_v41 = vld [vmem:[%s10692_s1 + $0x14] ss:$8 sps:$4 sm:$0xff]  }
  0x27   : > { %951 = vmatprep.subr.bf16.mxu0 %v6385_v21  ;;  %1064 = vmatprep.subr.bf16.mxu1 %v7901_v24 }
  0x28   : > { %526 = vrot.lane.b32.xlu0 %v6378_v19, %s7748_s15  ;;  %522 = vrot.lane.b32.xlu1 %v6376_v20, %s7748_s15 }
  0x2a   : > { %952 = vmatpush1.bf16.msra.mxu0 %v6384_v26  ;;  %1065 = vmatpush1.bf16.msra.mxu1 %v6386_v25 }
  0x2c   : > { %540 = vrot.lane.b32.xlu0 %v6385_v21, %s7748_s15  ;;  %542 = vrot.lane.b32.xlu1 %v6386_v25, %s7748_s15 }
  0x30   : > { %538 = vrot.lane.b32.xlu0 %v6384_v26, %s7748_s15  ;;  %610 = vrot.lane.b32.xlu1 %v6369_v3, %s7749_s16 }
  0x34   : > { %612 = vrot.lane.b32.xlu0 %v6370_v9, %s7749_s16  ;;  %608 = vrot.lane.b32.xlu1 %v6368_v4, %s7749_s16 }
  0x38   : > { %626 = vrot.lane.b32.xlu0 %v6377_v10, %s7749_s16  ;;  %628 = vrot.lane.b32.xlu1 %v6378_v19, %s7749_s16 }
  0x3c   : > { %624 = vrot.lane.b32.xlu0 %v6376_v20, %s7749_s16  ;;  %642 = vrot.lane.b32.xlu1 %v6385_v21, %s7749_s16 }
  0x40   : > { %644 = vrot.lane.b32.xlu0 %v6386_v25, %s7749_s16  ;;  %640 = vrot.lane.b32.xlu1 %v6384_v26, %s7749_s16 }
  0x44   : > { %711 = vrot.lane.b32.xlu0 %v6369_v3, %s7750_s22  ;;  %713 = vrot.lane.b32.xlu1 %v6370_v9, %s7750_s22 }
  0x48   : > { %709 = vrot.lane.b32.xlu0 %v6368_v4, %s7750_s22  ;;  %727 = vrot.lane.b32.xlu1 %v6377_v10, %s7750_s22 }
  0x4c   : > { %729 = vrot.lane.b32.xlu0 %v6378_v19, %s7750_s22  ;;  %725 = vrot.lane.b32.xlu1 %v6376_v20, %s7750_s22 }
  0x50   : > { %743 = vrot.lane.b32.xlu0 %v6385_v21, %s7750_s22  ;;  %745 = vrot.lane.b32.xlu1 %v6386_v25, %s7750_s22 }
  0x54   : > { %741 = vrot.lane.b32.xlu0 %v6384_v26, %s7750_s22  ;;  %512 = vrot.lane.b32.xlu1 %v7881_v8, %s7748_s15  ;;  %v1423_v26 = vld [vmem:[%s10693_s2] sm:$0xff] }
  0x58   : > { %514 = vrot.lane.b32.xlu0 %v7936_v30, %s7748_s15  ;;  %516 = vrot.lane.b32.xlu1 %v7938_v31, %s7748_s15 }
  0x5c   : > { %518 = vrot.lane.b32.xlu0 %v7944_v32, %s7748_s15  ;;  %528 = vrot.lane.b32.xlu1 %v7892_v17, %s7748_s15 }
  0x60   : > { %530 = vrot.lane.b32.xlu0 %v7954_v37, %s7748_s15  ;;  %532 = vrot.lane.b32.xlu1 %v7956_v38, %s7748_s15 }
  0x64   : > { %534 = vrot.lane.b32.xlu0 %v7962_v39, %s7748_s15  ;;  %544 = vrot.lane.b32.xlu1 %v7901_v24, %s7748_s15 }
  0x68   : > { %546 = vrot.lane.b32.xlu0 %v7972_v44, %s7748_s15  ;;  %548 = vrot.lane.b32.xlu1 %v7974_v45, %s7748_s15 }
  0x6c   : > { %550 = vrot.lane.b32.xlu0 %v7980_v46, %s7748_s15  ;;  %614 = vrot.lane.b32.xlu1 %v7881_v8, %s7749_s16 }
  0x70   : > { %616 = vrot.lane.b32.xlu0 %v7936_v30, %s7749_s16  ;;  %618 = vrot.lane.b32.xlu1 %v7938_v31, %s7749_s16 }
  0x74   : > { %620 = vrot.lane.b32.xlu0 %v7944_v32, %s7749_s16  ;;  %630 = vrot.lane.b32.xlu1 %v7892_v17, %s7749_s16 }
  0x78   : > { %632 = vrot.lane.b32.xlu0 %v7954_v37, %s7749_s16  ;;  %634 = vrot.lane.b32.xlu1 %v7956_v38, %s7749_s16 }
  0x7c   : > { %636 = vrot.lane.b32.xlu0 %v7962_v39, %s7749_s16  ;;  %646 = vrot.lane.b32.xlu1 %v7901_v24, %s7749_s16 }
  0x80   : > { %648 = vrot.lane.b32.xlu0 %v7972_v44, %s7749_s16  ;;  %650 = vrot.lane.b32.xlu1 %v7974_v45, %s7749_s16 }
  0x84   : > { %652 = vrot.lane.b32.xlu0 %v7980_v46, %s7749_s16  ;;  %715 = vrot.lane.b32.xlu1 %v7881_v8, %s7750_s22 }
  0x88   : > { %717 = vrot.lane.b32.xlu0 %v7936_v30, %s7750_s22  ;;  %719 = vrot.lane.b32.xlu1 %v7938_v31, %s7750_s22 }
  0x8c   : > { %721 = vrot.lane.b32.xlu0 %v7944_v32, %s7750_s22  ;;  %731 = vrot.lane.b32.xlu1 %v7892_v17, %s7750_s22 }
  0x90   : > { %733 = vrot.lane.b32.xlu0 %v7954_v37, %s7750_s22  ;;  %735 = vrot.lane.b32.xlu1 %v7956_v38, %s7750_s22 }
  0x92   : > { %v509_v47 = vpop.permute.xlu0 %508  ;;  %v507_v48 = vpop.permute.xlu1 %506 }
  0x93   : > { %v555_v52 = vsel %vm554_vm1, %v507_v48, %v509_v47 }
  0x94   : > { %737 = vrot.lane.b32.xlu0 %v7962_v39, %s7750_s22  ;;  %747 = vrot.lane.b32.xlu1 %v7901_v24, %s7750_s22 }
  0x96   : > { %v8026_v49 = vpop.permute.xlu0 %510  ;;  %v525_v50 = vpop.permute.xlu1 %524 }
  0x97   : > { %v556_v51 = vsel %vm554_vm1, %v509_v47, %v8026_v49 }
  0x98   : > { %749 = vrot.lane.b32.xlu0 %v7972_v44, %s7750_s22  ;;  %751 = vrot.lane.b32.xlu1 %v7974_v45, %s7750_s22 }
  0x99   : > { %953 = vmatprep.subr.bf16.mxu0 %v556_v51 }
  0x9a   : > { %954 = vmatpush1.bf16.msra.mxu0 %v555_v52  ;;  %v8035_v53 = vpop.permute.xlu0 %526  ;;  %v523_v54 = vpop.permute.xlu1 %522 }
  0x9b   : > { %v563_v55 = vsel %vm554_vm1, %v525_v50, %v8035_v53  ;;  %v562_v56 = vsel %vm554_vm1, %v523_v54, %v525_v50  ;;  %v8124_v50 = vld [vmem:[%s10692_s1 + $0x10] ss:$8 sps:$4 sm:$0xff]  }
  0x9c   : > { %753 = vrot.lane.b32.xlu0 %v7980_v46, %s7750_s22  ;;  %520 = vrot.lane.b32.xlu1 %v7894_v18, %s7748_s15 }
  0x9d   : > { %955 = vmatprep.subr.bf16.mxu0 %v563_v55 }
  0x9e   : > { %956 = vmatpush1.bf16.msra.mxu0 %v562_v56  ;;  %v541_v59 = vpop.permute.xlu0 %540  ;;  %v8048_v60 = vpop.permute.xlu1 %542 }
  0x9f   : > { %v570_v61 = vsel %vm554_vm1, %v541_v59, %v8048_v60 }
  0xa0   : > { %536 = vrot.lane.b32.xlu0 %v8044_v57, %s7748_s15  ;;  %552 = vrot.lane.b32.xlu1 %v8046_v58, %s7748_s15 }
  0xa1   : > { %957 = vmatprep.subr.bf16.mxu0 %v570_v61 }
  0xa2   : > { %v539_v62 = vpop.permute.xlu0 %538  ;;  %v611_v63 = vpop.permute.xlu1 %610 }
  0xa3   : > { %v569_v0 = vsel %vm554_vm1, %v539_v62, %v541_v59  ;;  %v8159_v59 = vld [vmem:[%s10692_s1 + $0x34] ss:$8 sps:$4 sm:$0xff]  }
  0xa4   : > { %622 = vrot.lane.b32.xlu0 %v7894_v18, %s7749_s16  ;;  %638 = vrot.lane.b32.xlu1 %v8044_v57, %s7749_s16 }
  0xa5   : > { %958 = vmatpush1.bf16.msra.mxu0 %v569_v0 }
  0xa6   : > { %v8061_v1 = vpop.permute.xlu0 %612  ;;  %v609_v2 = vpop.permute.xlu1 %608 }
  0xa7   : > { %v658_v3 = vsel %vm656_vm2, %v611_v63, %v8061_v1  ;;  %v657_v4 = vsel %vm656_vm2, %v609_v2, %v611_v63 }
  0xa8   : > { %654 = vrot.lane.b32.xlu0 %v8046_v58, %s7749_s16  ;;  %723 = vrot.lane.b32.xlu1 %v7894_v18, %s7750_s22 }
  0xa9   : > { %959 = vmatprep.subr.bf16.mxu0 %v658_v3  ;;  %v8171_v3 = vld [vmem:[%s10692_s1 + $0x30] ss:$8 sps:$4 sm:$0xff]  }
  0xaa   : > { %960 = vmatpush1.bf16.msra.mxu0 %v657_v4  ;;  %v627_v5 = vpop.permute.xlu0 %626  ;;  %v8070_v6 = vpop.permute.xlu1 %628 }
  0xab   : > { %v665_v7 = vsel %vm656_vm2, %v627_v5, %v8070_v6 }
  0xac   : > { %739 = vrot.lane.b32.xlu0 %v8044_v57, %s7750_s22  ;;  %961 = vmatprep.subr.bf16.mxu0 %v665_v7  ;;  %v8178_v7 = vld [vmem:[%s10692_s1 + $0x44] ss:$8 sps:$4 sm:$0xff]  }
  0xad   : > { %755 = vrot.lane.b32.xlu1 %v8046_v58, %s7750_s22 }
  0xae   : > { %v625_v8 = vpop.permute.xlu0 %624  ;;  %v643_v9 = vpop.permute.xlu1 %642 }
  0xaf   : > { %v664_v10 = vsel %vm656_vm2, %v625_v8, %v627_v5 }
  0xb0   : > { %962 = vmatpush1.bf16.msra.mxu0 %v664_v10  ;;  %1426 = vperm.xlu0 %7369, %v1423_v26   ;;  %v8213_v26 = vld [vmem:[%s10692_s1 + $0x50] ss:$8 sps:$4 sm:$0xff]  }
  0xb2   : > { %v8079_v11 = vpop.permute.xlu0 %644  ;;  %v641_v12 = vpop.permute.xlu1 %640 }
  0xb3   : > { %v672_v13 = vsel %vm656_vm2, %v643_v9, %v8079_v11  ;;  %v671_v14 = vsel %vm656_vm2, %v641_v12, %v643_v9 }
  0xb4   : > { %963 = vmatprep.subr.bf16.mxu0 %v672_v13 }
  0xb5   : > { %964 = vmatpush1.bf16.msra.mxu0 %v671_v14  ;;  %v8192_v14 = vld [vmem:[%s10692_s1 + $0x40] ss:$8 sps:$4 sm:$0xff]  }
  0xb6   : > { %v712_v15 = vpop.permute.xlu0 %711  ;;  %v8084_v16 = vpop.permute.xlu1 %713 }
  0xb7   : > { %v759_v17 = vsel %vm757_vm3, %v712_v15, %v8084_v16 }
  0xb8   : > { %965 = vmatprep.subr.bf16.mxu0 %v759_v17 }
  0xba   : > { %v710_v19 = vpop.permute.xlu0 %709  ;;  %v728_v20 = vpop.permute.xlu1 %727 }
  0xbb   : > { %v758_v21 = vsel %vm757_vm3, %v710_v19, %v712_v15  ;;  %v8199_v19 = vld [vmem:[%s10692_s1 + $0x54] ss:$8 sps:$4 sm:$0xff]  }
  0xbc   : > { %966 = vmatpush1.bf16.msra.mxu0 %v758_v21 }
  0xbe   : > { %v8089_v22 = vpop.permute.xlu0 %729  ;;  %v726_v23 = vpop.permute.xlu1 %725 }
  0xbf   : > { %v766_v24 = vsel %vm757_vm3, %v728_v20, %v8089_v22  ;;  %v765_v25 = vsel %vm757_vm3, %v726_v23, %v728_v20 }
  0xc0   : > { %967 = vmatprep.subr.bf16.mxu0 %v766_v24 }
  0xc1   : > { %968 = vmatpush1.bf16.msra.mxu0 %v765_v25 }
  0xc2   : > { %v744_v28 = vpop.permute.xlu0 %743  ;;  %v8098_v29 = vpop.permute.xlu1 %745 }
  0xc3   : > { %v773_v33 = vsel %vm757_vm3, %v744_v28, %v8098_v29 }
  0xc4   : > { %969 = vmatprep.subr.bf16.mxu0 %v773_v33 }
  0xc6   : > { %v742_v35 = vpop.permute.xlu0 %741  ;;  %v513_v36 = vpop.permute.xlu1 %512 }
  0xc7   : > { %v772_v40 = vsel %vm757_vm3, %v742_v35, %v744_v28  ;;  %v557_v48 = vsel %vm554_vm1, %v8026_v49, %v513_v36 }
  0xc8   : > { %970 = vmatpush1.bf16.msra.mxu0 %v772_v40 }
  0xc9   : > { %1173 = vmatprep.subr.bf16.mxu0 %v7938_v31 }
  0xca   : > { %v515_v42 = vpop.permute.xlu0 %514  ;;  %v517_v43 = vpop.permute.xlu1 %516 }
  0xcb   : > { %980 = vmatmul.mubr.bf16.vlgmr.msra.gmra.mrb[0].mxu0 %v8106_v34  ;;  %v558_v47 = vsel %vm554_vm1, %v513_v36, %v515_v42 }
  0xcc   : > { %1066 = vmatprep.subr.bf16.mxu1 %v558_v47  ;;  %1174 = vmatpush1.bf16.msra.mxu0 %v7936_v30  ;;  %v8134_v30 = vld [vmem:[%s10692_s1 + $0x24] ss:$8 sps:$4 sm:$0xff]  }
  0xcd   : > { %1067 = vmatpush1.bf16.msra.mxu1 %v557_v48  ;;  %1175 = vmatprep.subr.bf16.mxu0 %v7956_v38 }
  0xce   : > { %v8126_v31 = vpop.permute.xlu0 %518  ;;  %v529_v51 = vpop.permute.xlu1 %528  ;;  %6409 = vmatprep.mubr.msk.bf16.mxu0 %vm922_vm0, %v8112_v41 }
  0xcf   : > { %v564_v54 = vsel %vm554_vm1, %v8035_v53, %v529_v51 }
  0xd0   : > { %1176 = vmatpush1.bf16.msra.mxu0 %v7954_v37  ;;  %v560_v37 = vsel %vm554_vm1, %v517_v43, %v8126_v31 }
  0xd1   : > { %1177 = vmatprep.subr.bf16.mxu0 %v7974_v45  ;;  %v8147_v45 = vld [vmem:[%s10692_s1 + $0x20] ss:$8 sps:$4 sm:$0xff]  }
  0xd2   : > { %v531_v38 = vpop.permute.xlu0 %530  ;;  %v533_v49 = vpop.permute.xlu1 %532 }
  0xd3   : > { %v565_v52 = vsel %vm554_vm1, %v529_v51, %v531_v38  ;;  %990 = vmatmul.mubr.bf16.gmra.mrb[4].mxu0 %v8124_v50  ;;  %v566_v0 = vsel %vm554_vm1, %v531_v38, %v533_v49 }
  0xd4   : > { %1068 = vmatprep.subr.bf16.mxu1 %v565_v52  ;;  %1178 = vmatpush1.bf16.msra.mxu0 %v7972_v44  ;;  %v559_v44 = vsel %vm554_vm1, %v515_v42, %v517_v43 }
  0xd5   : > { %1069 = vmatpush1.bf16.msra.mxu1 %v564_v54  ;;  %1179 = vmatprep.subr.bf16.mxu0 %v560_v37 }
  0xd6   : > { %v8149_v55 = vpop.permute.xlu0 %534  ;;  %v545_v56 = vpop.permute.xlu1 %544  ;;  %6410 = vmatprep.mubr.msk.bf16.mxu0 %vm922_vm0, %v8134_v30 }
  0xd7   : > { %v567_v53 = vsel %vm554_vm1, %v533_v49, %v8149_v55  ;;  %v571_v2 = vsel %vm554_vm1, %v8048_v60, %v545_v56  ;;  %v8238_v49 = vld [vmem:[%s10692_s1 + $0x60] ss:$8 sps:$4 sm:$0xff]  }
  0xd8   : > { %1180 = vmatpush1.bf16.msra.mxu0 %v559_v44 }
  0xd9   : > { %1181 = vmatprep.subr.bf16.mxu0 %v567_v53 }
  0xda   : > { %v547_v61 = vpop.permute.xlu0 %546  ;;  %v549_v62 = vpop.permute.xlu1 %548 }
  0xdb   : > { %v572_v63 = vsel %vm554_vm1, %v545_v56, %v547_v61  ;;  %1000 = vmatmul.mubr.bf16.gmra.mrb[8].mxu0 %v8147_v45  ;;  %v573_v8 = vsel %vm554_vm1, %v547_v61, %v549_v62 }
  0xdc   : > { %1070 = vmatprep.subr.bf16.mxu1 %v572_v63  ;;  %1182 = vmatpush1.bf16.msra.mxu0 %v566_v0  ;;  %v8259_v63 = vld [vmem:[%s10692_s1 + $0x70] ss:$8 sps:$4 sm:$0xff]  }
  0xdd   : > { %1071 = vmatpush1.bf16.msra.mxu1 %v571_v2  ;;  %6411 = vmatprep.mubr.msk.bf16.mxu0 %vm922_vm0, %v8159_v59 }
  0xde   : > { %v8173_v4 = vpop.permute.xlu0 %550  ;;  %v615_v5 = vpop.permute.xlu1 %614 }
  0xdf   : > { %v574_v60 = vsel %vm554_vm1, %v549_v62, %v8173_v4  ;;  %v659_v13 = vsel %vm656_vm2, %v8061_v1, %v615_v5 }
  0xe0   : > { %1183 = vmatprep.subr.bf16.mxu0 %v574_v60 }
  0xe1   : > { %1184 = vmatpush1.bf16.msra.mxu0 %v573_v8  ;;  %v8269_v8 = vld [vmem:[%s10692_s1 + $0x4] ss:$8 sps:$4 sm:$0xff]  }
  0xe2   : > { %v617_v9 = vpop.permute.xlu0 %616  ;;  %v619_v10 = vpop.permute.xlu1 %618 }
  0xe3   : > { %v660_v12 = vsel %vm656_vm2, %v615_v5, %v617_v9  ;;  %1010 = vmatmul.mubr.bf16.gmra.mrb[12].mxu0 %v8171_v3  ;;  %v661_v20 = vsel %vm656_vm2, %v617_v9, %v619_v10 }
  0xe4   : > { %1072 = vmatprep.subr.bf16.mxu1 %v660_v12  ;;  %6412 = vmatprep.mubr.msk.bf16.mxu0 %vm922_vm0, %v8178_v7 }
  0xe5   : > { %1073 = vmatpush1.bf16.msra.mxu1 %v659_v13 }
  0xe6   : > { %v8194_v15 = vpop.permute.xlu0 %620  ;;  %v631_v17 = vpop.permute.xlu1 %630 }
  0xe7   : > { %v662_v1 = vsel %vm656_vm2, %v619_v10, %v8194_v15  ;;  %v666_v25 = vsel %vm656_vm2, %v8070_v6, %v631_v17  ;;  %v8223_v6 = vld [vmem:[%s10692_s1 + $0x64] ss:$8 sps:$4 sm:$0xff]  }
  0xe8   : > { %1185 = vmatprep.subr.bf16.mxu0 %v662_v1 }
  0xe9   : > { %1186 = vmatpush1.bf16.msra.mxu0 %v661_v20 }
  0xea   : > { %v633_v21 = vpop.permute.xlu0 %632  ;;  %v635_v23 = vpop.permute.xlu1 %634 }
  0xeb   : > { %v667_v24 = vsel %vm656_vm2, %v631_v17, %v633_v21  ;;  %1020 = vmatmul.mubr.bf16.gmra.mrb[16].mxu0 %v8192_v14  ;;  %v668_v36 = vsel %vm656_vm2, %v633_v21, %v635_v23 }
  0xec   : > { %1074 = vmatprep.subr.bf16.mxu1 %v667_v24  ;;  %6413 = vmatprep.mubr.msk.bf16.mxu0 %vm922_vm0, %v8199_v19 }
  0xed   : > { %1075 = vmatpush1.bf16.msra.mxu1 %v666_v25 }
  0xee   : > { %v8215_v28 = vpop.permute.xlu0 %636  ;;  %v647_v33 = vpop.permute.xlu1 %646 }
  0xef   : > { %v669_v35 = vsel %vm656_vm2, %v635_v23, %v8215_v28  ;;  %v673_v47 = vsel %vm656_vm2, %v8079_v11, %v647_v33  ;;  %v8244_v11 = vld [vmem:[%s10692_s1 + $0x74] ss:$8 sps:$4 sm:$0xff]  }
  0xf0   : > { %1187 = vmatprep.subr.bf16.mxu0 %v669_v35 }
  0xf1   : > { %1188 = vmatpush1.bf16.msra.mxu0 %v668_v36 }
  0xf2   : > { %v649_v40 = vpop.permute.xlu0 %648  ;;  %v651_v42 = vpop.permute.xlu1 %650 }
  0xf3   : > { %v674_v43 = vsel %vm656_vm2, %v647_v33, %v649_v40  ;;  %1030 = vmatmul.mubr.bf16.gmra.mrb[20].mxu0 %v8213_v26  ;;  %v675_v52 = vsel %vm656_vm2, %v649_v40, %v651_v42 }
  0xf4   : > { %1076 = vmatprep.subr.bf16.mxu1 %v674_v43  ;;  %6414 = vmatprep.mubr.msk.bf16.mxu0 %vm922_vm0, %v8223_v6 }
  0xf5   : > { %1077 = vmatpush1.bf16.msra.mxu1 %v673_v47 }
  0xf6   : > { %v8231_v48 = vpop.permute.xlu0 %652  ;;  %v716_v51 = vpop.permute.xlu1 %715 }
  0xf7   : > { %v676_v38 = vsel %vm656_vm2, %v651_v42, %v8231_v48  ;;  %v760_v44 = vsel %vm757_vm3, %v8084_v16, %v716_v51 }
  0xf8   : > { %1189 = vmatprep.subr.bf16.mxu0 %v676_v38 }
  0xf9   : > { %1190 = vmatpush1.bf16.msra.mxu0 %v675_v52 }
  0xfa   : > { %v718_v54 = vpop.permute.xlu0 %717  ;;  %v720_v37 = vpop.permute.xlu1 %719 }
  0xfb   : > { %v761_v56 = vsel %vm757_vm3, %v716_v51, %v718_v54  ;;  %1040 = vmatmul.mubr.bf16.gmra.mrb[24].mxu0 %v8238_v49  ;;  %v762_v0 = vsel %vm757_vm3, %v718_v54, %v720_v37 }
  0xfc   : > { %1078 = vmatprep.subr.bf16.mxu1 %v761_v56  ;;  %6415 = vmatprep.mubr.msk.bf16.mxu0 %vm922_vm0, %v8244_v11 }
  0xfd   : > { %1079 = vmatpush1.bf16.msra.mxu1 %v760_v44 }
  0xfe   : > { %v8252_v53 = vpop.permute.xlu0 %721  ;;  %v732_v61 = vpop.permute.xlu1 %731 }
  0xff   : > { %v763_v62 = vsel %vm757_vm3, %v720_v37, %v8252_v53  ;;  %v767_v60 = vsel %vm757_vm3, %v8089_v22, %v732_v61 }
 0x100   : > { %1191 = vmatprep.subr.bf16.mxu0 %v763_v62 }
 0x101   : > { %1192 = vmatpush1.bf16.msra.mxu0 %v762_v0 }
 0x102   : > { %v734_v16 = vpop.permute.xlu0 %733  ;;  %v736_v2 = vpop.permute.xlu1 %735 }
 0x103   : > { %v768_v5 = vsel %vm757_vm3, %v732_v61, %v734_v16  ;;  %1050 = vmatmul.mubr.bf16.gmra.mrb[28].mxu0 %v8259_v63  ;;  %v769_v13 = vsel %vm757_vm3, %v734_v16, %v736_v2 }
 0x104   : > { %1080 = vmatprep.subr.bf16.mxu1 %v768_v5  ;;  %6424 = vmatprep.mubr.msk.bf16.mxu0 %vm922_vm0, %v8269_v8 }
 0x105   : > { %1081 = vmatpush1.bf16.msra.mxu1 %v767_v60 }
 0x106   : > { %v8273_v9 = vpop.permute.xlu0 %737  ;;  %v748_v10 = vpop.permute.xlu1 %747 }
 0x107   : > { %v770_v12 = vsel %vm757_vm3, %v736_v2, %v8273_v9  ;;  %v774_v1 = vsel %vm757_vm3, %v8098_v29, %v748_v10 }
 0x108   : > { %1193 = vmatprep.subr.bf16.mxu0 %v770_v12 }
 0x109   : > { %1194 = vmatpush1.bf16.msra.mxu0 %v769_v13 }
 0x10a   : > { %v750_v22 = vpop.permute.xlu0 %749  ;;  %v752_v20 = vpop.permute.xlu1 %751 }
 0x10b   : > { %v775_v17 = vsel %vm757_vm3, %v748_v10, %v750_v22  ;;  %v776_v24 = vsel %vm757_vm3, %v750_v22, %v752_v20 }
 0x10c   : > { %1082 = vmatprep.subr.bf16.mxu1 %v775_v17 }
 0x10d   : > { %1083 = vmatpush1.bf16.msra.mxu1 %v774_v1 }
 0x10e   : > { %v8281_v21 = vpop.permute.xlu0 %753  ;;  %1286 = vmatprep.subr.bf16.mxu1 %v7894_v18  ;;  %v521_v18 = vpop.permute.xlu1 %520 }
 0x10f   : > { %v777_v23 = vsel %vm757_vm3, %v752_v20, %v8281_v21 }
 0x110   : > { %1093 = vmatmul.mubr.bf16.vlgmr.msra.gmra.mrb[0].mxu1 %v8106_v34  ;;  %1195 = vmatprep.subr.bf16.mxu0 %v777_v23 }
 0x111   : > { %1196 = vmatpush1.bf16.msra.mxu0 %v776_v24  ;;  %1287 = vmatpush1.bf16.msra.mxu1 %v7944_v32  ;;  %v561_v32 = vsel %vm554_vm1, %v8126_v31, %v521_v18 }
 0x112   : > { %1288 = vmatprep.subr.bf16.mxu1 %v8044_v57  ;;  %6417 = vmatprep.mubr.msk.bf16.mxu1 %vm922_vm0, %v8112_v41  ;;  %v553_v57 = vpop.permute.xlu1 %552 }
 0x114   : > { %1206 = vmatmul.mubr.bf16.vlgmr.msra.gmra.mrb[32].mxu0 %v8106_v34 }
 0x115   : > { %1289 = vmatpush1.bf16.msra.mxu1 %v7962_v39  ;;  %6425 = vmatprep.mubr.msk.bf16.mxu0 %vm922_vm0, %v8112_v41  ;;  %v537_v39 = vpop.permute.xlu0 %536 }
 0x116   : > { %1290 = vmatprep.subr.bf16.mxu1 %v8046_v58  ;;  %v575_v58 = vsel %vm554_vm1, %v8173_v4, %v553_v57 }
 0x118   : > { %1103 = vmatmul.mubr.bf16.gmra.mrb[4].mxu1 %v8124_v50 }
 0x119   : > { %1291 = vmatpush1.bf16.msra.mxu1 %v7980_v46  ;;  %6418 = vmatprep.mubr.msk.bf16.mxu1 %vm922_vm0, %v8134_v30  ;;  %v568_v46 = vsel %vm554_vm1, %v8149_v55, %v537_v39  ;;  %v623_v29 = vpop.permute.xlu0 %622  ;;  %v639_v55 = vpop.permute.xlu1 %638 }
 0x11a   : > { %6432 = vmatprep.subr.msk.bf16.mxu1 %vm554_vm1, %v521_v18  ;;  %v663_v31 = vsel %vm656_vm2, %v8194_v15, %v623_v29  ;;  %v670_v4 = vsel %vm656_vm2, %v8215_v28, %v639_v55 }
 0x11c   : > { %1216 = vmatmul.mubr.bf16.gmra.mrb[36].mxu0 %v8124_v50 }
 0x11d   : > { %1293 = vmatpush1.bf16.msra.mxu1 %v561_v32  ;;  %6426 = vmatprep.mubr.msk.bf16.mxu0 %vm922_vm0, %v8134_v30  ;;  %v655_v25 = vpop.permute.xlu0 %654  ;;  %v724_v33 = vpop.permute.xlu1 %723 }
 0x11e   : > { %6433 = vmatprep.subr.msk.bf16.mxu1 %vm554_vm1, %v537_v39  ;;  %v677_v15 = vsel %vm656_vm2, %v8231_v48, %v655_v25  ;;  %v764_v28 = vsel %vm757_vm3, %v8252_v53, %v724_v33 }
 0x120   : > { %1113 = vmatmul.mubr.bf16.gmra.mrb[8].mxu1 %v8147_v45 }
 0x121   : > { %1295 = vmatpush1.bf16.msra.mxu1 %v568_v46  ;;  %6419 = vmatprep.mubr.msk.bf16.mxu1 %vm922_vm0, %v8159_v59  ;;  %v740_v35 = vpop.permute.xlu0 %739  ;;  %v756_v36 = vpop.permute.xlu1 %755 }
 0x122   : > { %6434 = vmatprep.subr.msk.bf16.mxu1 %vm554_vm1, %v553_v57  ;;  %v771_v40 = vsel %vm757_vm3, %v8273_v9, %v740_v35  ;;  %v778_v42 = vsel %vm757_vm3, %v8281_v21, %v756_v36 }
 0x124   : > { %1226 = vmatmul.mubr.bf16.gmra.mrb[40].mxu0 %v8147_v45 }
 0x125   : > { %1297 = vmatpush1.bf16.msra.mxu1 %v575_v58  ;;  %6427 = vmatprep.mubr.msk.bf16.mxu0 %vm922_vm0, %v8159_v59 }
 0x126   : > { %6435 = vmatprep.subr.msk.bf16.mxu1 %vm656_vm2, %v623_v29 }
 0x128   : > { %1123 = vmatmul.mubr.bf16.gmra.mrb[12].mxu1 %v8171_v3 }
 0x129   : > { %1299 = vmatpush1.bf16.msra.mxu1 %v663_v31  ;;  %6420 = vmatprep.mubr.msk.bf16.mxu1 %vm922_vm0, %v8178_v7 }
 0x12a   : > { %6436 = vmatprep.subr.msk.bf16.mxu1 %vm656_vm2, %v639_v55 }
 0x12c   : > { %1236 = vmatmul.mubr.bf16.gmra.mrb[44].mxu0 %v8171_v3 }
 0x12d   : > { %1301 = vmatpush1.bf16.msra.mxu1 %v670_v4  ;;  %6428 = vmatprep.mubr.msk.bf16.mxu0 %vm922_vm0, %v8178_v7 }
 0x12e   : > { %6437 = vmatprep.subr.msk.bf16.mxu1 %vm656_vm2, %v655_v25 }
 0x12f   : > { %v8387_v37 = vpop.permute.xlu0 %1426 }
 0x130   : > { %1133 = vmatmul.mubr.bf16.gmra.mrb[16].mxu1 %v8192_v14 }
 0x131   : > { %1303 = vmatpush1.bf16.msra.mxu1 %v677_v15  ;;  %6421 = vmatprep.mubr.msk.bf16.mxu1 %vm922_vm0, %v8199_v19 }
 0x132   : > { %6438 = vmatprep.subr.msk.bf16.mxu1 %vm757_vm3, %v724_v33 }
 0x134   : > { %1246 = vmatmul.mubr.bf16.gmra.mrb[48].mxu0 %v8192_v14 }
 0x135   : > { %1305 = vmatpush1.bf16.msra.mxu1 %v764_v28  ;;  %6429 = vmatprep.mubr.msk.bf16.mxu0 %vm922_vm0, %v8199_v19 }
 0x136   : > { %6439 = vmatprep.subr.msk.bf16.mxu1 %vm757_vm3, %v740_v35 }
 0x138   : > { %1143 = vmatmul.mubr.bf16.gmra.mrb[20].mxu1 %v8213_v26 }
 0x139   : > { %1307 = vmatpush1.bf16.msra.mxu1 %v771_v40  ;;  %6422 = vmatprep.mubr.msk.bf16.mxu1 %vm922_vm0, %v8223_v6 }
 0x13a   : > { %6440 = vmatprep.subr.msk.bf16.mxu1 %vm757_vm3, %v756_v36 }
 0x13c   : > { %1256 = vmatmul.mubr.bf16.gmra.mrb[52].mxu0 %v8213_v26 }
 0x13d   : > { %6430 = vmatprep.mubr.msk.bf16.mxu0 %vm922_vm0, %v8223_v6  ;;  %1309 = vmatpush1.bf16.msra.mxu1 %v778_v42 }
 0x140   : > { %1153 = vmatmul.mubr.bf16.gmra.mrb[24].mxu1 %v8238_v49 }
 0x141   : > { %6423 = vmatprep.mubr.msk.bf16.mxu1 %vm922_vm0, %v8244_v11 }
 0x144   : > { %1266 = vmatmul.mubr.bf16.gmra.mrb[56].mxu0 %v8238_v49 }
 0x145   : > { %6431 = vmatprep.mubr.msk.bf16.mxu0 %vm922_vm0, %v8244_v11 }
 0x148   : > { %1163 = vmatmul.mubr.bf16.gmra.mrb[28].mxu1 %v8259_v63 }
 0x149   : > { %6441 = vmatprep.mubr.msk.bf16.mxu1 %vm922_vm0, %v8269_v8 }
 0x14c   : > { %1276 = vmatmul.mubr.bf16.gmra.mrb[60].mxu0 %v8259_v63 }
 0x150   : > { %1319 = vmatmul.mubr.bf16.vlgmr.msra.gmra.mrb[32].mxu1 %v8106_v34 }
 0x151   : > { %6442 = vmatprep.mubr.msk.bf16.mxu1 %vm922_vm0, %v8112_v41 }
 0x158   : > { %1329 = vmatmul.mubr.bf16.gmra.mrb[36].mxu1 %v8124_v50 }
 0x159   : > { %6443 = vmatprep.mubr.msk.bf16.mxu1 %vm922_vm0, %v8134_v30 }
 0x160   : > { %1339 = vmatmul.mubr.bf16.gmra.mrb[40].mxu1 %v8147_v45 }
 0x161   : > { %6444 = vmatprep.mubr.msk.bf16.mxu1 %vm922_vm0, %v8159_v59 }
 0x168   : > { %1349 = vmatmul.mubr.bf16.gmra.mrb[44].mxu1 %v8171_v3 }
 0x169   : > { %6445 = vmatprep.mubr.msk.bf16.mxu1 %vm922_vm0, %v8178_v7 }
 0x170   : > { %1359 = vmatmul.mubr.bf16.gmra.mrb[48].mxu1 %v8192_v14 }
 0x171   : > { %6446 = vmatprep.mubr.msk.bf16.mxu1 %vm922_vm0, %v8199_v19 }
 0x178   : > { %1369 = vmatmul.mubr.bf16.gmra.mrb[52].mxu1 %v8213_v26 }
 0x179   : > { %6447 = vmatprep.mubr.msk.bf16.mxu1 %vm922_vm0, %v8223_v6 }
 0x180   : > { %1379 = vmatmul.mubr.bf16.gmra.mrb[56].mxu1 %v8238_v49 }
 0x181   : > { %6448 = vmatprep.mubr.msk.bf16.mxu1 %vm922_vm0, %v8244_v11 }
 0x188   : > { %1389 = vmatmul.mubr.bf16.gmra.mrb[60].mxu1 %v8259_v63 }
 0x19e   : > { %v981_v34 = vpop.f32.mrb[0].mxu0 }
 0x19f   : > { %v983_v41 = vpop.f32.mrb[1].mxu0 }
 0x1a0   : > { %v985_v50 = vpop.f32.mrb[2].mxu0 }
 0x1a1   : > { %v1399_v30 = vmax.f32 %v981_v34, %v985_v50  ;;  %v987_v45 = vpop.f32.mrb[3].mxu0 }
 0x1a2   : > { %v1400_v59 = vmax.f32 %v983_v41, %v987_v45 }
 0x1a6   : > { %v991_v3 = vpop.f32.mrb[4].mxu0 }
 0x1a7   : > { %v993_v7 = vpop.f32.mrb[5].mxu0 }
 0x1a8   : > { %v995_v14 = vpop.f32.mrb[6].mxu0 }
 0x1a9   : > { %v1407_v19 = vmax.f32 %v991_v3, %v995_v14  ;;  %v997_v26 = vpop.f32.mrb[7].mxu0 }
 0x1aa   : > { %v1408_v43 = vmax.f32 %v993_v7, %v997_v26 }
 0x1ab   : > { %v1415_v6 = vmax.f32 %v1399_v30, %v1407_v19 }
 0x1ac   : > { %v1416_v47 = vmax.f32 %v1400_v59, %v1408_v43 }
 0x1ad   : > { %v1429_v61 = vadd.f32 %v8387_v37, %v1415_v6 }
 0x1ae   : > { %v1001_v48 = vpop.f32.mrb[8].mxu0  ;;  %v1430_v63 = vadd.f32 %v8387_v37, %v1416_v47 }
 0x1af   : > { %v1003_v51 = vpop.f32.mrb[9].mxu0  ;;  %v1437_v5 = vmax.f32 %v1429_v61, 0.0 }
 0x1b0   : > { %v1005_v38 = vpop.f32.mrb[10].mxu0  ;;  %v1438_v8 = vmax.f32 %v1430_v63, 0.0 }
 0x1b1   : > { %v1445_v49 = vmax.f32 %v1001_v48, %v1005_v38  ;;  %v1007_v52 = vpop.f32.mrb[11].mxu0 }
 0x1b2   : > { %v1446_v11 = vmax.f32 %v1003_v51, %v1007_v52 }
 0x1b6   : > { %v1011_v54 = vpop.f32.mrb[12].mxu0 }
 0x1b7   : > { %v1013_v56 = vpop.f32.mrb[13].mxu0 }
 0x1b8   : > { %v1015_v44 = vpop.f32.mrb[14].mxu0 }
 0x1b9   : > { %v1453_v53 = vmax.f32 %v1011_v54, %v1015_v44  ;;  %v1017_v62 = vpop.f32.mrb[15].mxu0 }
 0x1ba   : > { %v1454_v0 = vmax.f32 %v1013_v56, %v1017_v62 }
 0x1bb   : > { %v1461_v16 = vmax.f32 %v1445_v49, %v1453_v53 }
 0x1bc   : > { %v1462_v2 = vmax.f32 %v1446_v11, %v1454_v0 }
 0x1bd   : > { %v1469_v60 = vadd.f32 %v1461_v16, %v8387_v37 }
 0x1be   : > { %v1470_v9 = vadd.f32 %v1462_v2, %v8387_v37  ;;  %v1021_v10 = vpop.f32.mrb[16].mxu0 }
 0x1bf   : > { %v1477_v12 = vmax.f32 %v1469_v60, 0.0  ;;  %v1023_v13 = vpop.f32.mrb[17].mxu0 }
 0x1c0   : > { %v1478_v22 = vmax.f32 %v1470_v9, 0.0  ;;  %v1025_v17 = vpop.f32.mrb[18].mxu0 }
 0x1c1   : > { %v8393_v1 = vpack.c.bf16 %v1477_v12, %v1437_v5  ;;  %v1485_v20 = vmax.f32 %v1021_v10, %v1025_v17  ;;  %v1027_v21 = vpop.f32.mrb[19].mxu0 }
 0x1c2   : > { %v8395_v23 = vpack.c.bf16 %v1478_v22, %v1438_v8  ;;  %v1486_v24 = vmax.f32 %v1023_v13, %v1027_v21 }
 0x1c3   : > { %1597 = vrot.lane.b32.xlu0 %v8393_v1, %s7748_s15 }
 0x1c4   : > { %2224 = vmatprep.subr.bf16.mxu0 %v8395_v23 }
 0x1c5   : > { %2225 = vmatpush1.bf16.msra.mxu0 %v8393_v1 }
 0x1c6   : > { %v1031_v18 = vpop.f32.mrb[20].mxu0 }
 0x1c7   : > { %1663 = vrot.lane.b32.xlu0 %v8393_v1, %s7752_s25  ;;  %v1033_v32 = vpop.f32.mrb[21].mxu0 }
 0x1c8   : > { %v1035_v39 = vpop.f32.mrb[22].mxu0 }
 0x1c9   : > { %v1493_v46 = vmax.f32 %v1031_v18, %v1035_v39  ;;  %v1037_v57 = vpop.f32.mrb[23].mxu0 }
 0x1ca   : > { %v1494_v58 = vmax.f32 %v1033_v32, %v1037_v57 }
 0x1cb   : > { %1731 = vrot.lane.b32.xlu0 %v8393_v1, %s7749_s16  ;;  %v1501_v29 = vmax.f32 %v1485_v20, %v1493_v46 }
 0x1cc   : > { %v1502_v31 = vmax.f32 %v1486_v24, %v1494_v58 }
 0x1cd   : > { %v1509_v42 = vadd.f32 %v1501_v29, %v8387_v37 }
 0x1ce   : > { %v1041_v55 = vpop.f32.mrb[24].mxu0  ;;  %v1510_v50 = vadd.f32 %v1502_v31, %v8387_v37 }
 0x1cf   : > { %1797 = vrot.lane.b32.xlu0 %v8393_v1, %s7750_s22  ;;  %v1043_v4 = vpop.f32.mrb[25].mxu0  ;;  %v1517_v3 = vmax.f32 %v1509_v42, 0.0 }
 0x1d0   : > { %v1045_v25 = vpop.f32.mrb[26].mxu0  ;;  %v1518_v14 = vmax.f32 %v1510_v50, 0.0 }
 0x1d1   : > { %v1525_v15 = vmax.f32 %v1041_v55, %v1045_v25  ;;  %v1047_v33 = vpop.f32.mrb[27].mxu0 }
 0x1d2   : > { %v1526_v28 = vmax.f32 %v1043_v4, %v1047_v33 }
 0x1d3   : > { %1863 = vrot.lane.b32.xlu0 %v8393_v1, %s7753_s29 }
 0x1d6   : > { %v1051_v35 = vpop.f32.mrb[28].mxu0 }
 0x1d7   : > { %1931 = vrot.lane.b32.xlu0 %v8393_v1, %s7754_s30  ;;  %v1053_v36 = vpop.f32.mrb[29].mxu0 }
 0x1d8   : > { %v1055_v40 = vpop.f32.mrb[30].mxu0 }
 0x1d9   : > { %v1533_v34 = vmax.f32 %v1051_v35, %v1055_v40  ;;  %v1057_v41 = vpop.f32.mrb[31].mxu0 }
 0x1da   : > { %v1534_v30 = vmax.f32 %v1053_v36, %v1057_v41 }
 0x1db   : > { %1665 = vrot.lane.b32.xlu0 %v8395_v23, %s7752_s25  ;;  %v1541_v45 = vmax.f32 %v1525_v15, %v1533_v34 }
 0x1dc   : > { %v1542_v59 = vmax.f32 %v1526_v28, %v1534_v30 }
 0x1dd   : > { %v1549_v7 = vadd.f32 %v1541_v45, %v8387_v37 }
 0x1de   : > { %v1550_v19 = vadd.f32 %v1542_v59, %v8387_v37 }
 0x1df   : > { %1733 = vrot.lane.b32.xlu0 %v8395_v23, %s7749_s16  ;;  %v1557_v26 = vmax.f32 %v1549_v7, 0.0 }
 0x1e0   : > { %v1558_v43 = vmax.f32 %v1550_v19, 0.0 }
 0x1e1   : > { %v8419_v6 = vpack.c.bf16 %v1557_v26, %v1517_v3 }
 0x1e2   : > { %v8421_v47 = vpack.c.bf16 %v1558_v43, %v1518_v14 }
 0x1e3   : > { %v1094_v48 = vpop.f32.mrb[0].mxu1  ;;  %1799 = vrot.lane.b32.xlu0 %v8395_v23, %s7750_s22 }
 0x1e4   : > { %v1096_v51 = vpop.f32.mrb[1].mxu1  ;;  %2226 = vmatprep.subr.bf16.mxu0 %v8421_v47 }
 0x1e5   : > { %v1098_v38 = vpop.f32.mrb[2].mxu1  ;;  %2227 = vmatpush1.bf16.msra.mxu0 %v8419_v6 }
 0x1e6   : > { %v1401_v49 = vmax.f32 %v1094_v48, %v1098_v38  ;;  %v1100_v52 = vpop.f32.mrb[3].mxu1 }
 0x1e7   : > { %v1402_v11 = vmax.f32 %v1096_v51, %v1100_v52  ;;  %1865 = vrot.lane.b32.xlu0 %v8395_v23, %s7753_s29  ;;  %v1207_v54 = vpop.f32.mrb[32].mxu0 }
 0x1e8   : > { %v1209_v56 = vpop.f32.mrb[33].mxu0 }
 0x1e9   : > { %v1211_v44 = vpop.f32.mrb[34].mxu0 }
 0x1ea   : > { %v1403_v53 = vmax.f32 %v1207_v54, %v1211_v44  ;;  %v1213_v61 = vpop.f32.mrb[35].mxu0 }
 0x1eb   : > { %v1104_v62 = vpop.f32.mrb[4].mxu1  ;;  %1933 = vrot.lane.b32.xlu0 %v8395_v23, %s7754_s30  ;;  %v1404_v63 = vmax.f32 %v1209_v56, %v1213_v61 }
 0x1ec   : > { %v1106_v0 = vpop.f32.mrb[5].mxu1 }
 0x1ed   : > { %v1108_v16 = vpop.f32.mrb[6].mxu1 }
 0x1ee   : > { %v1409_v2 = vmax.f32 %v1104_v62, %v1108_v16  ;;  %v1110_v5 = vpop.f32.mrb[7].mxu1 }
 0x1ef   : > { %v1410_v60 = vmax.f32 %v1106_v0, %v1110_v5  ;;  %v1217_v8 = vpop.f32.mrb[36].mxu0 }
 0x1f0   : > { %v1417_v9 = vmax.f32 %v1401_v49, %v1409_v2  ;;  %v1219_v10 = vpop.f32.mrb[37].mxu0 }
 0x1f1   : > { %v1418_v12 = vmax.f32 %v1402_v11, %v1410_v60  ;;  %v1221_v13 = vpop.f32.mrb[38].mxu0 }
 0x1f2   : > { %v1411_v22 = vmax.f32 %v1217_v8, %v1221_v13  ;;  %v1223_v17 = vpop.f32.mrb[39].mxu0  ;;  %v1431_v41 = vadd.f32 %v8387_v37, %v1417_v9 }
 0x1f3   : > { %v1114_v20 = vpop.f32.mrb[8].mxu1  ;;  %v1412_v21 = vmax.f32 %v1219_v10, %v1223_v17  ;;  %v1432_v45 = vadd.f32 %v8387_v37, %v1418_v12 }
 0x1f4   : > { %v1116_v24 = vpop.f32.mrb[9].mxu1  ;;  %v1419_v18 = vmax.f32 %v1403_v53, %v1411_v22  ;;  %v1439_v51 = vmax.f32 %v1431_v41, 0.0 }
 0x1f5   : > { %v1118_v32 = vpop.f32.mrb[10].mxu1  ;;  %v1420_v39 = vmax.f32 %v1404_v63, %v1412_v21  ;;  %v1440_v54 = vmax.f32 %v1432_v45, 0.0 }
 0x1f6   : > { %v1447_v46 = vmax.f32 %v1114_v20, %v1118_v32  ;;  %v1120_v57 = vpop.f32.mrb[11].mxu1  ;;  %v1433_v38 = vadd.f32 %v8387_v37, %v1419_v18 }
 0x1f7   : > { %v1448_v58 = vmax.f32 %v1116_v24, %v1120_v57  ;;  %v1227_v29 = vpop.f32.mrb[40].mxu0  ;;  %v1434_v56 = vadd.f32 %v8387_v37, %v1420_v39 }
 0x1f8   : > { %v1229_v31 = vpop.f32.mrb[41].mxu0  ;;  %v1441_v9 = vmax.f32 %v1433_v38, 0.0 }
 0x1f9   : > { %v1231_v55 = vpop.f32.mrb[42].mxu0  ;;  %v1442_v13 = vmax.f32 %v1434_v56, 0.0 }
 0x1fa   : > { %v1449_v4 = vmax.f32 %v1227_v29, %v1231_v55  ;;  %v1233_v25 = vpop.f32.mrb[43].mxu0 }
 0x1fb   : > { %v1124_v15 = vpop.f32.mrb[12].mxu1  ;;  %v1450_v33 = vmax.f32 %v1229_v31, %v1233_v25 }
 0x1fc   : > { %v1126_v28 = vpop.f32.mrb[13].mxu1 }
 0x1fd   : > { %v1128_v35 = vpop.f32.mrb[14].mxu1 }
 0x1fe   : > { %v1455_v36 = vmax.f32 %v1124_v15, %v1128_v35  ;;  %v1130_v40 = vpop.f32.mrb[15].mxu1 }
 0x1ff   : > { %v1456_v42 = vmax.f32 %v1126_v28, %v1130_v40  ;;  %v1237_v34 = vpop.f32.mrb[44].mxu0 }
 0x200   : > { %v1463_v50 = vmax.f32 %v1447_v46, %v1455_v36  ;;  %v1239_v30 = vpop.f32.mrb[45].mxu0 }
 0x201   : > { %v1464_v59 = vmax.f32 %v1448_v58, %v1456_v42  ;;  %v1241_v3 = vpop.f32.mrb[46].mxu0 }
 0x202   : > { %v1471_v7 = vadd.f32 %v1463_v50, %v8387_v37  ;;  %v1457_v14 = vmax.f32 %v1237_v34, %v1241_v3  ;;  %v1243_v19 = vpop.f32.mrb[47].mxu0 }
 0x203   : > { %v1472_v26 = vadd.f32 %v1464_v59, %v8387_v37  ;;  %v1458_v43 = vmax.f32 %v1239_v30, %v1243_v19  ;;  %v1134_v48 = vpop.f32.mrb[16].mxu1 }
 0x204   : > { %v1479_v49 = vmax.f32 %v1471_v7, 0.0  ;;  %v1465_v52 = vmax.f32 %v1449_v4, %v1457_v14  ;;  %v1136_v11 = vpop.f32.mrb[17].mxu1 }
 0x205   : > { %v1480_v44 = vmax.f32 %v1472_v26, 0.0  ;;  %v1466_v53 = vmax.f32 %v1450_v33, %v1458_v43  ;;  %v1138_v61 = vpop.f32.mrb[18].mxu1 }
 0x206   : > { %v8437_v62 = vpack.c.bf16 %v1479_v49, %v1439_v51  ;;  %v1473_v63 = vadd.f32 %v1465_v52, %v8387_v37  ;;  %v1487_v0 = vmax.f32 %v1134_v48, %v1138_v61  ;;  %v1140_v16 = vpop.f32.mrb[19].mxu1 }
 0x207   : > { %v8440_v2 = vpack.c.bf16 %v1480_v44, %v1440_v54  ;;  %v1474_v5 = vadd.f32 %v1466_v53, %v8387_v37  ;;  %v1488_v60 = vmax.f32 %v1136_v11, %v1140_v16  ;;  %v1247_v8 = vpop.f32.mrb[48].mxu0 }
 0x208   : > { %v1481_v10 = vmax.f32 %v1473_v63, 0.0  ;;  %1601 = vrot.lane.b32.xlu1 %v8437_v62, %s7748_s15  ;;  %v1249_v12 = vpop.f32.mrb[49].mxu0 }
 0x209   : > { %v1482_v22 = vmax.f32 %v1474_v5, 0.0  ;;  %2370 = vmatprep.subr.bf16.mxu1 %v8440_v2  ;;  %v1251_v17 = vpop.f32.mrb[50].mxu0 }
 0x20a   : > { %v8446_v20 = vpack.c.bf16 %v1481_v10, %v1441_v9  ;;  %2371 = vmatpush1.bf16.msra.mxu1 %v8437_v62  ;;  %v1489_v21 = vmax.f32 %v1247_v8, %v1251_v17  ;;  %v1253_v24 = vpop.f32.mrb[51].mxu0 }
 0x20b   : > { %v8449_v18 = vpack.c.bf16 %v1482_v22, %v1442_v13  ;;  %v1144_v32 = vpop.f32.mrb[20].mxu1  ;;  %v1490_v39 = vmax.f32 %v1249_v12, %v1253_v24 }
 0x20c   : > { %1667 = vrot.lane.b32.xlu1 %v8437_v62, %s7752_s25  ;;  %v1146_v46 = vpop.f32.mrb[21].mxu1 }
 0x20d   : > { %v1148_v57 = vpop.f32.mrb[22].mxu1 }
 0x20e   : > { %v1495_v58 = vmax.f32 %v1144_v32, %v1148_v57  ;;  %v1150_v29 = vpop.f32.mrb[23].mxu1 }
 0x20f   : > { %v1496_v31 = vmax.f32 %v1146_v46, %v1150_v29  ;;  %v1257_v55 = vpop.f32.mrb[52].mxu0 }
 0x210   : > { %v1503_v4 = vmax.f32 %v1487_v0, %v1495_v58  ;;  %1735 = vrot.lane.b32.xlu1 %v8437_v62, %s7749_s16  ;;  %v1259_v25 = vpop.f32.mrb[53].mxu0 }
 0x211   : > { %v1504_v15 = vmax.f32 %v1488_v60, %v1496_v31  ;;  %v1261_v33 = vpop.f32.mrb[54].mxu0 }
 0x212   : > { %v1497_v28 = vmax.f32 %v1257_v55, %v1261_v33  ;;  %v1263_v35 = vpop.f32.mrb[55].mxu0  ;;  %v1511_v56 = vadd.f32 %v1503_v4, %v8387_v37 }
 0x213   : > { %v1498_v36 = vmax.f32 %v1259_v25, %v1263_v35  ;;  %v1154_v40 = vpop.f32.mrb[24].mxu1  ;;  %v1512_v61 = vadd.f32 %v1504_v15, %v8387_v37 }
 0x214   : > { %v1505_v42 = vmax.f32 %v1489_v21, %v1497_v28  ;;  %1801 = vrot.lane.b32.xlu1 %v8437_v62, %s7750_s22  ;;  %v1156_v34 = vpop.f32.mrb[25].mxu1  ;;  %v1519_v12 = vmax.f32 %v1511_v56, 0.0 }
 0x215   : > { %v1506_v41 = vmax.f32 %v1490_v39, %v1498_v36  ;;  %v1158_v50 = vpop.f32.mrb[26].mxu1  ;;  %v1520_v24 = vmax.f32 %v1512_v61, 0.0 }
 0x216   : > { %v1527_v30 = vmax.f32 %v1154_v40, %v1158_v50  ;;  %v1160_v45 = vpop.f32.mrb[27].mxu1  ;;  %v1513_v13 = vadd.f32 %v1505_v42, %v8387_v37 }
 0x217   : > { %v1528_v59 = vmax.f32 %v1156_v34, %v1160_v45  ;;  %v1267_v3 = vpop.f32.mrb[56].mxu0  ;;  %v1514_v32 = vadd.f32 %v1506_v41, %v8387_v37 }
 0x218   : > { %1867 = vrot.lane.b32.xlu1 %v8437_v62, %s7753_s29  ;;  %v1269_v7 = vpop.f32.mrb[57].mxu0  ;;  %v1521_v33 = vmax.f32 %v1513_v13, 0.0 }
 0x219   : > { %v1271_v14 = vpop.f32.mrb[58].mxu0  ;;  %v1522_v35 = vmax.f32 %v1514_v32, 0.0 }
 0x21a   : > { %v1529_v19 = vmax.f32 %v1267_v3, %v1271_v14  ;;  %v1273_v26 = vpop.f32.mrb[59].mxu0 }
 0x21b   : > { %v1164_v43 = vpop.f32.mrb[28].mxu1  ;;  %v1530_v48 = vmax.f32 %v1269_v7, %v1273_v26 }
 0x21c   : > { %1935 = vrot.lane.b32.xlu1 %v8437_v62, %s7754_s30  ;;  %v1166_v51 = vpop.f32.mrb[29].mxu1 }
 0x21d   : > { %v1168_v38 = vpop.f32.mrb[30].mxu1 }
 0x21e   : > { %v1535_v49 = vmax.f32 %v1164_v43, %v1168_v38  ;;  %v1170_v52 = vpop.f32.mrb[31].mxu1 }
 0x21f   : > { %v1536_v11 = vmax.f32 %v1166_v51, %v1170_v52  ;;  %v1277_v54 = vpop.f32.mrb[60].mxu0 }
 0x220   : > { %v1543_v44 = vmax.f32 %v1527_v30, %v1535_v49  ;;  %1599 = vrot.lane.b32.xlu1 %v8395_v23, %s7748_s15  ;;  %v1279_v53 = vpop.f32.mrb[61].mxu0 }
 0x221   : > { %v1544_v63 = vmax.f32 %v1528_v59, %v1536_v11  ;;  %v1281_v0 = vpop.f32.mrb[62].mxu0 }
 0x222   : > { %v1551_v16 = vadd.f32 %v1543_v44, %v8387_v37  ;;  %v1537_v5 = vmax.f32 %v1277_v54, %v1281_v0  ;;  %v1283_v60 = vpop.f32.mrb[63].mxu0 }
 0x223   : > { %v1552_v8 = vadd.f32 %v1544_v63, %v8387_v37  ;;  %v1538_v9 = vmax.f32 %v1279_v53, %v1283_v60  ;;  %v1320_v10 = vpop.f32.mrb[32].mxu1 }
 0x224   : > { %v1559_v22 = vmax.f32 %v1551_v16, 0.0  ;;  %v1545_v17 = vmax.f32 %v1529_v19, %v1537_v5  ;;  %1603 = vrot.lane.b32.xlu1 %v8440_v2, %s7748_s15  ;;  %v1322_v21 = vpop.f32.mrb[33].mxu1 }
 0x225   : > { %v1560_v39 = vmax.f32 %v1552_v8, 0.0  ;;  %v1546_v46 = vmax.f32 %v1530_v48, %v1538_v9  ;;  %v1324_v57 = vpop.f32.mrb[34].mxu1 }
 0x226   : > { %v8471_v58 = vpack.c.bf16 %v1559_v22, %v1519_v12  ;;  %v1553_v29 = vadd.f32 %v1545_v17, %v8387_v37  ;;  %v1405_v31 = vmax.f32 %v1320_v10, %v1324_v57  ;;  %v1326_v55 = vpop.f32.mrb[35].mxu1 }
 0x227   : > { %v8474_v4 = vpack.c.bf16 %v1560_v39, %v1520_v24  ;;  %v1554_v25 = vadd.f32 %v1546_v46, %v8387_v37  ;;  %v1406_v15 = vmax.f32 %v1322_v21, %v1326_v55 }
 0x228   : > { %v1561_v28 = vmax.f32 %v1553_v29, 0.0  ;;  %1617 = vrot.lane.b32.xlu0 %v8471_v58, %s7748_s15  ;;  %1669 = vrot.lane.b32.xlu1 %v8440_v2, %s7752_s25 }
 0x229   : > { %v1562_v36 = vmax.f32 %v1554_v25, 0.0  ;;  %2372 = vmatprep.subr.bf16.mxu1 %v8474_v4 }
 0x22a   : > { %v8482_v40 = vpack.c.bf16 %v1561_v28, %v1521_v33  ;;  %2373 = vmatpush1.bf16.msra.mxu1 %v8471_v58 }
 0x22b   : > { %v8485_v42 = vpack.c.bf16 %v1562_v36, %v1522_v35  ;;  %v1330_v34 = vpop.f32.mrb[36].mxu1 }
 0x22c   : > { %v1332_v41 = vpop.f32.mrb[37].mxu1  ;;  %1683 = vrot.lane.b32.xlu0 %v8471_v58, %s7752_s25  ;;  %1737 = vrot.lane.b32.xlu1 %v8440_v2, %s7749_s16 }
 0x22d   : > { %v1334_v50 = vpop.f32.mrb[38].mxu1 }
 0x22e   : > { %v1413_v30 = vmax.f32 %v1330_v34, %v1334_v50  ;;  %v1336_v45 = vpop.f32.mrb[39].mxu1 }
 0x22f   : > { %v1414_v59 = vmax.f32 %v1332_v41, %v1336_v45 }
 0x230   : > { %v1421_v3 = vmax.f32 %v1405_v31, %v1413_v30  ;;  %1751 = vrot.lane.b32.xlu0 %v8471_v58, %s7749_s16  ;;  %1803 = vrot.lane.b32.xlu1 %v8440_v2, %s7750_s22 }
 0x231   : > { %v1422_v7 = vmax.f32 %v1406_v15, %v1414_v59 }
 0x232   : > { %v1435_v44 = vadd.f32 %v8387_v37, %v1421_v3 }
 0x233   : > { %v1340_v14 = vpop.f32.mrb[40].mxu1  ;;  %v1436_v61 = vadd.f32 %v8387_v37, %v1422_v7 }
 0x234   : > { %1817 = vrot.lane.b32.xlu0 %v8471_v58, %s7750_s22  ;;  %1869 = vrot.lane.b32.xlu1 %v8440_v2, %s7753_s29  ;;  %v1342_v19 = vpop.f32.mrb[41].mxu1  ;;  %v1443_v60 = vmax.f32 %v1435_v44, 0.0 }
 0x235   : > { %v1344_v26 = vpop.f32.mrb[42].mxu1  ;;  %v1444_v10 = vmax.f32 %v1436_v61, 0.0  ;;  %v8543_v50 = vpop.permute.xlu0 %1597 }
 0x236   : > { %v1451_v43 = vmax.f32 %v1340_v14, %v1344_v26  ;;  %v1346_v48 = vpop.f32.mrb[43].mxu1 }
 0x237   : > { %v1452_v51 = vmax.f32 %v1342_v19, %v1346_v48 }
 0x238   : > { %1883 = vrot.lane.b32.xlu0 %v8471_v58, %s7753_s29  ;;  %1937 = vrot.lane.b32.xlu1 %v8440_v2, %s7754_s30 }
 0x239   : > { %v8549_v19 = vpop.permute.xlu0 %1663 }
 0x23b   : > { %v1350_v38 = vpop.f32.mrb[44].mxu1 }
 0x23c   : > { %v1352_v49 = vpop.f32.mrb[45].mxu1  ;;  %1951 = vrot.lane.b32.xlu0 %v8471_v58, %s7754_s30  ;;  %1613 = vrot.lane.b32.xlu1 %v8419_v6, %s7748_s15 }
 0x23d   : > { %v1354_v52 = vpop.f32.mrb[46].mxu1  ;;  %v8563_v44 = vpop.permute.xlu0 %1731 }
 0x23e   : > { %v1459_v11 = vmax.f32 %v1350_v38, %v1354_v52  ;;  %v1356_v54 = vpop.f32.mrb[47].mxu1 }
 0x23f   : > { %v1460_v56 = vmax.f32 %v1352_v49, %v1356_v54 }
 0x240   : > { %v1467_v53 = vmax.f32 %v1451_v43, %v1459_v11  ;;  %1619 = vrot.lane.b32.xlu0 %v8474_v4, %s7748_s15  ;;  %1679 = vrot.lane.b32.xlu1 %v8419_v6, %s7752_s25 }
 0x241   : > { %v1468_v63 = vmax.f32 %v1452_v51, %v1460_v56 }
 0x242   : > { %v1475_v0 = vadd.f32 %v1467_v53, %v8387_v37 }
 0x243   : > { %v1476_v16 = vadd.f32 %v1468_v63, %v8387_v37  ;;  %v1360_v5 = vpop.f32.mrb[48].mxu1 }
 0x244   : > { %v1483_v8 = vmax.f32 %v1475_v0, 0.0  ;;  %1685 = vrot.lane.b32.xlu0 %v8474_v4, %s7752_s25  ;;  %1747 = vrot.lane.b32.xlu1 %v8419_v6, %s7749_s16  ;;  %v1362_v9 = vpop.f32.mrb[49].mxu1 }
 0x245   : > { %v1484_v12 = vmax.f32 %v1476_v16, 0.0  ;;  %v1364_v13 = vpop.f32.mrb[50].mxu1 }
 0x246   : > { %v8519_v22 = vpack.c.bf16 %v1483_v8, %v1443_v60  ;;  %v1491_v17 = vmax.f32 %v1360_v5, %v1364_v13  ;;  %v1366_v21 = vpop.f32.mrb[51].mxu1  ;;  %v8604_v5 = vld [vmem:[%s10694_s3 + $0x4] ss:$12 sps:$4 sm:$0xff]  }
 0x247   : > { %v8521_v24 = vpack.c.bf16 %v1484_v12, %v1444_v10  ;;  %v1492_v32 = vmax.f32 %v1362_v9, %v1366_v21  ;;  %2256 = vmatprep.mubr.bf16.mxu0 %v8604_v5  ;;  %2402 = vmatprep.mubr.bf16.mxu1 %v8604_v5 }
 0x248   : > { %1753 = vrot.lane.b32.xlu0 %v8474_v4, %s7749_s16  ;;  %1813 = vrot.lane.b32.xlu1 %v8419_v6, %s7750_s22 }
 0x24b   : > { %v1370_v39 = vpop.f32.mrb[52].mxu1 }
 0x24c   : > { %v1372_v46 = vpop.f32.mrb[53].mxu1  ;;  %1819 = vrot.lane.b32.xlu0 %v8474_v4, %s7750_s22  ;;  %1879 = vrot.lane.b32.xlu1 %v8419_v6, %s7753_s29 }
 0x24d   : > { %v1374_v57 = vpop.f32.mrb[54].mxu1 }
 0x24e   : > { %v1499_v29 = vmax.f32 %v1370_v39, %v1374_v57  ;;  %v1376_v31 = vpop.f32.mrb[55].mxu1 }
 0x24f   : > { %v1500_v55 = vmax.f32 %v1372_v46, %v1376_v31 }
 0x250   : > { %v1507_v25 = vmax.f32 %v1491_v17, %v1499_v29  ;;  %1885 = vrot.lane.b32.xlu0 %v8474_v4, %s7753_s29  ;;  %1947 = vrot.lane.b32.xlu1 %v8419_v6, %s7754_s30 }
 0x251   : > { %v1508_v15 = vmax.f32 %v1492_v32, %v1500_v55 }
 0x252   : > { %v1515_v26 = vadd.f32 %v1507_v25, %v8387_v37 }
 0x253   : > { %v1380_v33 = vpop.f32.mrb[56].mxu1  ;;  %v1516_v48 = vadd.f32 %v1508_v15, %v8387_v37 }
 0x254   : > { %1615 = vrot.lane.b32.xlu1 %v8421_v47, %s7748_s15  ;;  %1605 = vrot.lane.b32.xlu0 %v8446_v20, %s7748_s15  ;;  %v1382_v28 = vpop.f32.mrb[57].mxu1  ;;  %v1523_v52 = vmax.f32 %v1515_v26, 0.0 }
 0x255   : > { %v1384_v35 = vpop.f32.mrb[58].mxu1  ;;  %v1524_v54 = vmax.f32 %v1516_v48, 0.0 }
 0x256   : > { %v1531_v36 = vmax.f32 %v1380_v33, %v1384_v35  ;;  %v1386_v34 = vpop.f32.mrb[59].mxu1 }
 0x257   : > { %v1532_v41 = vmax.f32 %v1382_v28, %v1386_v34 }
 0x258   : > { %1681 = vrot.lane.b32.xlu1 %v8421_v47, %s7752_s25  ;;  %1953 = vrot.lane.b32.xlu0 %v8474_v4, %s7754_s30 }
 0x25b   : > { %v1390_v30 = vpop.f32.mrb[60].mxu1 }
 0x25c   : > { %v1392_v45 = vpop.f32.mrb[61].mxu1  ;;  %1749 = vrot.lane.b32.xlu1 %v8421_v47, %s7749_s16  ;;  %1671 = vrot.lane.b32.xlu0 %v8446_v20, %s7752_s25 }
 0x25d   : > { %v1394_v59 = vpop.f32.mrb[62].mxu1 }
 0x25e   : > { %v1539_v3 = vmax.f32 %v1390_v30, %v1394_v59  ;;  %v1396_v7 = vpop.f32.mrb[63].mxu1 }
 0x25f   : > { %v1540_v14 = vmax.f32 %v1392_v45, %v1396_v7 }
 0x260   : > { %v1547_v43 = vmax.f32 %v1531_v36, %v1539_v3  ;;  %1815 = vrot.lane.b32.xlu1 %v8421_v47, %s7750_s22  ;;  %2001 = vrot.lane.b32.xlu0 %v8395_v23, %s7755_s12 }
 0x261   : > { %v1548_v51 = vmax.f32 %v1532_v41, %v1540_v14 }
 0x262   : > { %v1555_v38 = vadd.f32 %v1547_v43, %v8387_v37 }
 0x263   : > { %v1556_v49 = vadd.f32 %v1548_v51, %v8387_v37  ;;  %v8573_v37 = vpop.permute.xlu0 %1797 }
 0x264   : > { %v1563_v11 = vmax.f32 %v1555_v38, 0.0  ;;  %1881 = vrot.lane.b32.xlu1 %v8421_v47, %s7753_s29  ;;  %1739 = vrot.lane.b32.xlu0 %v8446_v20, %s7749_s16 }
 0x265   : > { %v1564_v56 = vmax.f32 %v1556_v49, 0.0 }
 0x266   : > { %v8565_v53 = vpack.c.bf16 %v1563_v11, %v1523_v52 }
 0x267   : > { %v8567_v61 = vpack.c.bf16 %v1564_v56, %v1524_v54  ;;  %v8583_v63 = vpop.permute.xlu0 %1863 }
 0x268   : > { %1949 = vrot.lane.b32.xlu1 %v8421_v47, %s7754_s30  ;;  %1805 = vrot.lane.b32.xlu0 %v8446_v20, %s7750_s22 }
 0x26b   : > { %v8589_v0 = vpop.permute.xlu0 %1931 }
 0x26c   : > { %1871 = vrot.lane.b32.xlu0 %v8446_v20, %s7753_s29  ;;  %1621 = vrot.lane.b32.xlu1 %v8482_v40, %s7748_s15 }
 0x26f   : > { %v8606_v60 = vpop.permute.xlu0 %1665 }
 0x270   : > { %1939 = vrot.lane.b32.xlu0 %v8446_v20, %s7754_s30  ;;  %2003 = vrot.lane.b32.xlu1 %v8437_v62, %s7755_s12  ;;  %v1696_v11 = vsel %vm1695_vm4, %v8549_v19, %v8606_v60 }
 0x273   : > { %v8618_v10 = vpop.permute.xlu0 %1733 }
 0x274   : > { %1999 = vrot.lane.b32.xlu0 %v8393_v1, %s7755_s12  ;;  %1687 = vrot.lane.b32.xlu1 %v8482_v40, %s7752_s25 }
 0x277   : > { %v8630_v13 = vpop.permute.xlu0 %1799 }
 0x278   : > { %2007 = vrot.lane.b32.xlu0 %v8446_v20, %s7755_s12  ;;  %2005 = vrot.lane.b32.xlu1 %v8440_v2, %s7755_s12 }
 0x27a   : > { %v8595_v16 = vpop.permute.xlu1 %1601 }
 0x27b   : > { %v8640_v21 = vpop.permute.xlu0 %1865 }
 0x27c   : > { %2019 = vrot.lane.b32.xlu0 %v8471_v58, %s7755_s12  ;;  %1755 = vrot.lane.b32.xlu1 %v8482_v40, %s7749_s16 }
 0x27e   : > { %v8608_v8 = vpop.permute.xlu1 %1667 }
 0x27f   : > { %v8654_v46 = vpop.permute.xlu0 %1933  ;;  %v1697_v49 = vsel %vm1695_vm4, %v8606_v60, %v8608_v8 }
 0x280   : > { %2021 = vrot.lane.b32.xlu0 %v8474_v4, %s7755_s12  ;;  %2017 = vrot.lane.b32.xlu1 %v8421_v47, %s7755_s12 }
 0x282   : > { %v8616_v9 = vpop.permute.xlu1 %1735 }
 0x283   : > { %v1764_v19 = vsel %vm656_vm2, %v8618_v10, %v8616_v9 }
 0x284   : > { %2069 = vrot.lane.b32.xlu0 %v8395_v23, %s7756_s24  ;;  %1821 = vrot.lane.b32.xlu1 %v8482_v40, %s7750_s22 }
 0x286   : > { %v8624_v12 = vpop.permute.xlu1 %1801 }
 0x288   : > { %2067 = vrot.lane.b32.xlu0 %v8393_v1, %s7756_s24  ;;  %2015 = vrot.lane.b32.xlu1 %v8419_v6, %s7755_s12 }
 0x28a   : > { %v8632_v17 = vpop.permute.xlu1 %1867 }
 0x28c   : > { %2075 = vrot.lane.b32.xlu0 %v8446_v20, %s7756_s24  ;;  %1887 = vrot.lane.b32.xlu1 %v8482_v40, %s7753_s29 }
 0x28e   : > { %v8638_v23 = vpop.permute.xlu1 %1935 }
 0x290   : > { %2087 = vrot.lane.b32.xlu0 %v8471_v58, %s7756_s24  ;;  %2071 = vrot.lane.b32.xlu1 %v8437_v62, %s7756_s24 }
 0x292   : > { %v1600_v1 = vpop.permute.xlu1 %1599 }
 0x293   : > { %v1630_v32 = vsel %vm554_vm1, %v1600_v1, %v8595_v16  ;;  %v1629_v39 = vsel %vm554_vm1, %v8543_v50, %v1600_v1 }
 0x294   : > { %2228 = vmatprep.subr.bf16.mxu0 %v1630_v32  ;;  %2089 = vrot.lane.b32.xlu0 %v8474_v4, %s7756_s24 }
 0x295   : > { %1955 = vrot.lane.b32.xlu1 %v8482_v40, %s7754_s30  ;;  %2229 = vmatpush1.bf16.msra.mxu0 %v1629_v39  ;;  %v1763_v39 = vsel %vm656_vm2, %v8563_v44, %v8618_v10  ;;  %v1830_v44 = vsel %vm757_vm3, %v8630_v13, %v8624_v12 }
 0x296   : > { %v1604_v58 = vpop.permute.xlu1 %1603 }
 0x297   : > { %v1631_v51 = vsel %vm554_vm1, %v8595_v16, %v1604_v58 }
 0x298   : > { %1607 = vrot.lane.b32.xlu0 %v8449_v18, %s7748_s15 }
 0x299   : > { %2073 = vrot.lane.b32.xlu1 %v8440_v2, %s7756_s24 }
 0x29a   : > { %v8660_v62 = vpop.permute.xlu0 %1617  ;;  %v8662_v57 = vpop.permute.xlu1 %1669 }
 0x29c   : > { %1611 = vrot.lane.b32.xlu0 %v8521_v24, %s7748_s15 }
 0x29d   : > { %2023 = vrot.lane.b32.xlu1 %v8482_v40, %s7755_s12 }
 0x29e   : > { %v8668_v4 = vpop.permute.xlu0 %1683  ;;  %v8670_v29 = vpop.permute.xlu1 %1737 }
 0x2a0   : > { %1673 = vrot.lane.b32.xlu0 %v8449_v18, %s7752_s25 }
 0x2a1   : > { %2085 = vrot.lane.b32.xlu1 %v8421_v47, %s7756_s24 }
 0x2a2   : > { %v8676_v2 = vpop.permute.xlu0 %1751  ;;  %v8678_v31 = vpop.permute.xlu1 %1803 }
 0x2a4   : > { %1677 = vrot.lane.b32.xlu0 %v8521_v24, %s7752_s25 }
 0x2a5   : > { %2083 = vrot.lane.b32.xlu1 %v8419_v6, %s7756_s24 }
 0x2a6   : > { %v8684_v55 = vpop.permute.xlu0 %1817  ;;  %v8686_v25 = vpop.permute.xlu1 %1869 }
 0x2a8   : > { %1741 = vrot.lane.b32.xlu0 %v8449_v18, %s7749_s16 }
 0x2a9   : > { %1609 = vrot.lane.b32.xlu1 %v8519_v22, %s7748_s15 }
 0x2aa   : > { %v8692_v47 = vpop.permute.xlu0 %1883  ;;  %v8694_v15 = vpop.permute.xlu1 %1937 }
 0x2ac   : > { %1745 = vrot.lane.b32.xlu0 %v8521_v24, %s7749_s16 }
 0x2ad   : > { %1675 = vrot.lane.b32.xlu1 %v8519_v22, %s7752_s25 }
 0x2ae   : > { %v8700_v6 = vpop.permute.xlu0 %1951  ;;  %v1614_v33 = vpop.permute.xlu1 %1613 }
 0x2b0   : > { %1807 = vrot.lane.b32.xlu0 %v8449_v18, %s7750_s22 }
 0x2b1   : > { %1743 = vrot.lane.b32.xlu1 %v8519_v22, %s7749_s16 }
 0x2b2   : > { %v8706_v28 = vpop.permute.xlu0 %1619  ;;  %v1680_v35 = vpop.permute.xlu1 %1679 }
 0x2b4   : > { %1811 = vrot.lane.b32.xlu0 %v8521_v24, %s7750_s22 }
 0x2b5   : > { %1809 = vrot.lane.b32.xlu1 %v8519_v22, %s7750_s22 }
 0x2b6   : > { %v8712_v36 = vpop.permute.xlu0 %1685  ;;  %v1748_v34 = vpop.permute.xlu1 %1747 }
 0x2b8   : > { %1625 = vrot.lane.b32.xlu0 %v8565_v53, %s7748_s15 }
 0x2b9   : > { %2091 = vrot.lane.b32.xlu1 %v8482_v40, %s7756_s24 }
 0x2ba   : > { %v8718_v41 = vpop.permute.xlu0 %1753  ;;  %v8720_v50 = vpop.permute.xlu1 %1813 }
 0x2bc   : > { %1873 = vrot.lane.b32.xlu0 %v8449_v18, %s7753_s29 }
 0x2bd   : > { %1875 = vrot.lane.b32.xlu1 %v8519_v22, %s7753_s29 }
 0x2be   : > { %v8726_v30 = vpop.permute.xlu0 %1819  ;;  %v8728_v45 = vpop.permute.xlu1 %1879 }
 0x2c0   : > { %1691 = vrot.lane.b32.xlu0 %v8565_v53, %s7752_s25 }
 0x2c1   : > { %1943 = vrot.lane.b32.xlu1 %v8519_v22, %s7754_s30 }
 0x2c2   : > { %v8734_v59 = vpop.permute.xlu0 %1885  ;;  %v8736_v3 = vpop.permute.xlu1 %1947 }
 0x2c4   : > { %1877 = vrot.lane.b32.xlu0 %v8521_v24, %s7753_s29 }
 0x2c5   : > { %2011 = vrot.lane.b32.xlu1 %v8519_v22, %s7755_s12 }
 0x2c6   : > { %v1616_v7 = vpop.permute.xlu1 %1615  ;;  %v8742_v14 = vpop.permute.xlu0 %1605 }
 0x2c7   : > { %v1636_v26 = vsel %vm554_vm1, %v1614_v33, %v1616_v7  ;;  %v1637_v43 = vsel %vm554_vm1, %v1616_v7, %v8660_v62  ;;  %v1632_v48 = vsel %vm554_vm1, %v1604_v58, %v8742_v14 }
 0x2c8   : > { %2230 = vmatprep.subr.bf16.mxu0 %v1637_v43  ;;  %2374 = vmatprep.subr.bf16.mxu1 %v1632_v48 }
 0x2c9   : > { %1759 = vrot.lane.b32.xlu0 %v8565_v53, %s7749_s16  ;;  %1623 = vrot.lane.b32.xlu1 %v8485_v42, %s7748_s15 }
 0x2ca   : > { %2231 = vmatpush1.bf16.msra.mxu0 %v1636_v26  ;;  %2375 = vmatpush1.bf16.msra.mxu1 %v1631_v51  ;;  %v1682_v38 = vpop.permute.xlu1 %1681  ;;  %v8758_v52 = vpop.permute.xlu0 %1953 }
 0x2cb   : > { %2232 = vmatprep.subr.bf16.mxu0 %v1697_v49  ;;  %v1704_v56 = vsel %vm1695_vm4, %v1682_v38, %v8668_v4  ;;  %v1703_v1 = vsel %vm1695_vm4, %v1680_v35, %v1682_v38  ;;  %v1638_v49 = vsel %vm554_vm1, %v8660_v62, %v8706_v28 }
 0x2cd   : > { %1941 = vrot.lane.b32.xlu0 %v8449_v18, %s7754_s30  ;;  %1627 = vrot.lane.b32.xlu1 %v8567_v61, %s7748_s15 }
 0x2ce   : > { %2233 = vmatpush1.bf16.msra.mxu0 %v1696_v11  ;;  %v1750_v54 = vpop.permute.xlu1 %1749  ;;  %v8769_v16 = vpop.permute.xlu0 %1671 }
 0x2cf   : > { %2234 = vmatprep.subr.bf16.mxu0 %v1704_v56  ;;  %v1771_v33 = vsel %vm656_vm2, %v1750_v54, %v8676_v2  ;;  %v1770_v7 = vsel %vm656_vm2, %v1748_v34, %v1750_v54  ;;  %v1829_v34 = vsel %vm757_vm3, %v8573_v37, %v8630_v13  ;;  %v1897_v13 = vsel %vm1895_vm5, %v8640_v21, %v8632_v17 }
 0x2d0   : > { %v1699_v62 = vsel %vm1695_vm4, %v8662_v57, %v8769_v16  ;;  %v1698_v54 = vsel %vm1695_vm4, %v8608_v8, %v8662_v57 }
 0x2d1   : > { %1825 = vrot.lane.b32.xlu0 %v8565_v53, %s7750_s22  ;;  %1689 = vrot.lane.b32.xlu1 %v8485_v42, %s7752_s25 }
 0x2d2   : > { %2235 = vmatpush1.bf16.msra.mxu0 %v1703_v1  ;;  %v1816_v32 = vpop.permute.xlu1 %1815  ;;  %v8779_v60 = vpop.permute.xlu0 %2001 }
 0x2d3   : > { %2236 = vmatprep.subr.bf16.mxu0 %v1764_v19  ;;  %v1837_v43 = vsel %vm757_vm3, %v1816_v32, %v8684_v55  ;;  %v1836_v37 = vsel %vm757_vm3, %v8720_v50, %v1816_v32  ;;  %v1896_v50 = vsel %vm1895_vm5, %v8583_v63, %v8640_v21  ;;  %v1705_v63 = vsel %vm1695_vm4, %v8668_v4, %v8712_v36 }
 0x2d4   : > { %v1965_v21 = vsel %vm1963_vm6, %v8654_v46, %v8638_v23 }
 0x2d5   : > { %1945 = vrot.lane.b32.xlu0 %v8521_v24, %s7754_s30  ;;  %1693 = vrot.lane.b32.xlu1 %v8567_v61, %s7752_s25 }
 0x2d6   : > { %2237 = vmatpush1.bf16.msra.mxu0 %v1763_v39  ;;  %v1882_v58 = vpop.permute.xlu1 %1881  ;;  %v8790_v35 = vpop.permute.xlu0 %1739  ;;  %v1765_v39 = vsel %vm656_vm2, %v8616_v9, %v8670_v29  ;;  %v1772_v9 = vsel %vm656_vm2, %v8676_v2, %v8718_v41 }
 0x2d7   : > { %2238 = vmatprep.subr.bf16.mxu0 %v1771_v33  ;;  %v1904_v56 = vsel %vm1895_vm5, %v1882_v58, %v8692_v47  ;;  %v1903_v8 = vsel %vm1895_vm5, %v8728_v45, %v1882_v58  ;;  %v1766_v4 = vsel %vm656_vm2, %v8670_v29, %v8790_v35  ;;  %v1964_v45 = vsel %vm1963_vm6, %v8589_v0, %v8654_v46 }
 0x2d9   : > { %1891 = vrot.lane.b32.xlu0 %v8565_v53, %s7753_s29  ;;  %1757 = vrot.lane.b32.xlu1 %v8485_v42, %s7749_s16 }
 0x2da   : > { %2239 = vmatpush1.bf16.msra.mxu0 %v1770_v7  ;;  %v8797_v26 = vpop.permute.xlu1 %1949  ;;  %v8802_v10 = vpop.permute.xlu0 %1805 }
 0x2db   : > { %2240 = vmatprep.subr.bf16.mxu0 %v1830_v44  ;;  %v1972_v58 = vsel %vm1963_vm6, %v8797_v26, %v8700_v6  ;;  %v1971_v46 = vsel %vm1963_vm6, %v8736_v3, %v8797_v26  ;;  %v1832_v2 = vsel %vm757_vm3, %v8678_v31, %v8802_v10  ;;  %v1831_v26 = vsel %vm757_vm3, %v8624_v12, %v8678_v31 }
 0x2dc   : > { %v1838_v12 = vsel %vm757_vm3, %v8684_v55, %v8726_v30  ;;  %v8949_v55 = vld [vmem:[%s10694_s3 + $0x1c] ss:$12 sps:$4 sm:$0xff]  }
 0x2dd   : > { %2009 = vrot.lane.b32.xlu0 %v8449_v18, %s7755_s12  ;;  %1761 = vrot.lane.b32.xlu1 %v8567_v61, %s7749_s16 }
 0x2de   : > { %2241 = vmatpush1.bf16.msra.mxu0 %v1829_v34  ;;  %v8813_v48 = vpop.permute.xlu0 %1871  ;;  %v8815_v51 = vpop.permute.xlu1 %1621 }
 0x2df   : > { %2242 = vmatprep.subr.bf16.mxu0 %v1837_v43  ;;  %v1639_v38 = vsel %vm554_vm1, %v8706_v28, %v8815_v51 }
 0x2e0   : > { %2376 = vmatprep.subr.bf16.mxu1 %v1639_v38 }
 0x2e1   : > { %1959 = vrot.lane.b32.xlu0 %v8565_v53, %s7754_s30  ;;  %1823 = vrot.lane.b32.xlu1 %v8485_v42, %s7750_s22 }
 0x2e2   : > { %2243 = vmatpush1.bf16.msra.mxu0 %v1836_v37  ;;  %2377 = vmatpush1.bf16.msra.mxu1 %v1638_v49  ;;  %v8832_v11 = vpop.permute.xlu0 %1939  ;;  %v8837_v28 = vpop.permute.xlu1 %2003  ;;  %v1899_v37 = vsel %vm1895_vm5, %v8686_v25, %v8813_v48 }
 0x2e3   : > { %2244 = vmatprep.subr.bf16.mxu0 %v1897_v13  ;;  %2378 = vmatprep.subr.bf16.mxu1 %v1699_v62  ;;  %v2033_v44 = vsel %vm2031_vm7, %v8779_v60, %v8837_v28 }
 0x2e5   : > { %2013 = vrot.lane.b32.xlu0 %v8521_v24, %s7755_s12  ;;  %1827 = vrot.lane.b32.xlu1 %v8567_v61, %s7750_s22 }
 0x2e6   : > { %2245 = vmatpush1.bf16.msra.mxu0 %v1896_v50  ;;  %2379 = vmatpush1.bf16.msra.mxu1 %v1698_v54  ;;  %v2000_v1 = vpop.permute.xlu0 %1999  ;;  %v8851_v32 = vpop.permute.xlu1 %1687  ;;  %v8944_v50 = vld [vmem:[%s10694_s3] ss:$12 sps:$4 sm:$0xff]  }
 0x2e7   : > { %2246 = vmatprep.subr.bf16.mxu0 %v1904_v56  ;;  %v1706_v19 = vsel %vm1695_vm4, %v8712_v36, %v8851_v32  ;;  %v2032_v3 = vsel %vm2031_vm7, %v2000_v1, %v8779_v60  ;;  %v2856_v60 = vld [vmem:[%s10695_s4] sm:$0xff] }
 0x2e8   : > { %2380 = vmatprep.subr.bf16.mxu1 %v1706_v19  ;;  %v1905_v19 = vsel %vm1895_vm5, %v8692_v47, %v8734_v59 }
 0x2e9   : > { %2027 = vrot.lane.b32.xlu0 %v8565_v53, %s7755_s12  ;;  %1889 = vrot.lane.b32.xlu1 %v8485_v42, %s7753_s29 }
 0x2ea   : > { %2247 = vmatpush1.bf16.msra.mxu0 %v1903_v8  ;;  %2381 = vmatpush1.bf16.msra.mxu1 %v1705_v63  ;;  %v8868_v57 = vpop.permute.xlu0 %2007  ;;  %v8873_v36 = vpop.permute.xlu1 %2005 }
 0x2eb   : > { %2248 = vmatprep.subr.bf16.mxu0 %v1965_v21  ;;  %2382 = vmatprep.subr.bf16.mxu1 %v1766_v4  ;;  %v8979_v21 = vld [vmem:[%s10694_s3 + $0x18] ss:$12 sps:$4 sm:$0xff]   ;;  %v1966_v4 = vsel %vm1963_vm6, %v8638_v23, %v8694_v15 }
 0x2ed   : > { %2077 = vrot.lane.b32.xlu0 %v8449_v18, %s7756_s24  ;;  %1893 = vrot.lane.b32.xlu1 %v8567_v61, %s7753_s29  ;;  %s10649_s29 = scalar_lea.hbm %s10702_s11, %s6841_s14 }
 0x2ee   : > { %2249 = vmatpush1.bf16.msra.mxu0 %v1964_v45  ;;  %2383 = vmatpush1.bf16.msra.mxu1 %v1765_v39  ;;  %v8888_v33 = vpop.permute.xlu0 %2019  ;;  %v8890_v7 = vpop.permute.xlu1 %1755 }
 0x2ef   : > { %2250 = vmatprep.subr.bf16.mxu0 %v1972_v58  ;;  %v1773_v0 = vsel %vm656_vm2, %v8718_v41, %v8890_v7 }
 0x2f0   : > { %2384 = vmatprep.subr.bf16.mxu1 %v1773_v0  ;;  %v1973_v0 = vsel %vm1963_vm6, %v8700_v6, %v8758_v52  ;;  %v9017_v6 = vld [vmem:[%s10694_s3 + $0x4c] ss:$12 sps:$4 sm:$0xff]  }
 0x2f1   : > { %2081 = vrot.lane.b32.xlu0 %v8521_v24, %s7756_s24  ;;  %1957 = vrot.lane.b32.xlu1 %v8485_v42, %s7754_s30 }
 0x2f2   : > { %2251 = vmatpush1.bf16.msra.mxu0 %v1971_v46  ;;  %2385 = vmatpush1.bf16.msra.mxu1 %v1772_v9  ;;  %v8905_v29 = vpop.permute.xlu0 %2021  ;;  %v2018_v41 = vpop.permute.xlu1 %2017  ;;  %v9012_v46 = vld [vmem:[%s10694_s3 + $0x30] ss:$12 sps:$4 sm:$0xff]  }
 0x2f3   : > { %2252 = vmatprep.subr.bf16.mxu0 %v2033_v44  ;;  %2386 = vmatprep.subr.bf16.mxu1 %v1832_v2  ;;  %v2040_v43 = vsel %vm2031_vm7, %v2018_v41, %v8888_v33 }
 0x2f5   : > { %2095 = vrot.lane.b32.xlu0 %v8565_v53, %s7756_s24  ;;  %1961 = vrot.lane.b32.xlu1 %v8567_v61, %s7754_s30 }
 0x2f6   : > { %2253 = vmatpush1.bf16.msra.mxu0 %v2032_v3  ;;  %2387 = vmatpush1.bf16.msra.mxu1 %v1831_v26  ;;  %v2070_v34 = vpop.permute.xlu0 %2069  ;;  %v8924_v38 = vpop.permute.xlu1 %1821  ;;  %v2041_v3 = vsel %vm2031_vm7, %v8888_v33, %v8905_v29 }
 0x2f7   : > { %2254 = vmatprep.subr.bf16.mxu0 %v2040_v43  ;;  %v1839_v49 = vsel %vm757_vm3, %v8726_v30, %v8924_v38  ;;  %v1898_v30 = vsel %vm1895_vm5, %v8632_v17, %v8686_v25  ;;  %v1967_v25 = vsel %vm1963_vm6, %v8694_v15, %v8832_v11  ;;  %v2035_v15 = vsel %vm2031_vm7, %v8873_v36, %v8868_v57  ;;  %v9044_v43 = vld [vmem:[%s10694_s3 + $0x48] ss:$12 sps:$4 sm:$0xff]  }
 0x2f8   : > { %2388 = vmatprep.subr.bf16.mxu1 %v1839_v49 }
 0x2f9   : > { %2860 = vperm.xlu0 %7369, %v2856_v60   ;;  %2025 = vrot.lane.b32.xlu1 %v8485_v42, %s7755_s12 }
 0x2fa   : > { %2389 = vmatpush1.bf16.msra.mxu1 %v1838_v12  ;;  %v2068_v31 = vpop.permute.xlu0 %2067  ;;  %v2016_v13 = vpop.permute.xlu1 %2015 }
 0x2fb   : > { %2390 = vmatprep.subr.bf16.mxu1 %v1899_v37  ;;  %v2039_v62 = vsel %vm2031_vm7, %v2016_v13, %v2018_v41  ;;  %v2100_v47 = vsel %vm2099_vm8, %v2068_v31, %v2070_v34  ;;  %v9062_v13 = vld [vmem:[%s10694_s3 + $0x8] ss:$12 sps:$4 sm:$0xff]  }
 0x2fc   : > { %2255 = vmatpush1.bf16.msra.mxu0 %v2039_v62 }
 0x2fd   : > { %2029 = vrot.lane.b32.xlu1 %v8567_v61, %s7755_s12 }
 0x2fe   : > { %2391 = vmatpush1.bf16.msra.mxu1 %v1898_v30  ;;  %v8956_v54 = vpop.permute.xlu0 %2075  ;;  %v8958_v56 = vpop.permute.xlu1 %1887 }
 0x2ff   : > { %2257 = vmatmul.mubr.bf16.vlgmr.msra.gmra.mrb[64].mxu0 %v8944_v50  ;;  %v1906_v1 = vsel %vm1895_vm5, %v8734_v59, %v8958_v56  ;;  %v8985_v59 = vld [vmem:[%s10694_s3 + $0x34] ss:$12 sps:$4 sm:$0xff]  }
 0x300   : > { %2392 = vmatprep.subr.bf16.mxu1 %v1906_v1  ;;  %2266 = vmatprep.mubr.bf16.mxu0 %v8949_v55 }
 0x301   : > { %2079 = vrot.lane.b32.xlu1 %v8519_v22, %s7756_s24 }
 0x302   : > { %2393 = vmatpush1.bf16.msra.mxu1 %v1905_v19  ;;  %v8970_v17 = vpop.permute.xlu0 %2087  ;;  %v2072_v63 = vpop.permute.xlu1 %2071  ;;  %v9082_v19 = vld [vmem:[%s10694_s3 + $0x20] ss:$12 sps:$4 sm:$0xff]  }
 0x303   : > { %2394 = vmatprep.subr.bf16.mxu1 %v1967_v25  ;;  %v2101_v8 = vsel %vm2099_vm8, %v2070_v34, %v2072_v63 }
 0x304   : > { %2297 = vmatprep.subr.bf16.mxu0 %v2101_v8 }
 0x305   : > { %2093 = vrot.lane.b32.xlu1 %v8485_v42, %s7756_s24  ;;  %2298 = vmatpush1.bf16.msra.mxu0 %v2100_v47  ;;  %v9102_v47 = vld [vmem:[%s10694_s3 + $0x38] ss:$12 sps:$4 sm:$0xff]  }
 0x306   : > { %2395 = vmatpush1.bf16.msra.mxu1 %v1966_v4  ;;  %v8992_v45 = vpop.permute.xlu0 %2089 }
 0x307   : > { %v8994_v39 = vpop.permute.xlu1 %1955  ;;  %2267 = vmatmul.mubr.bf16.gmra.mrb[68].mxu0 %v8979_v21  ;;  %v2109_v4 = vsel %vm2099_vm8, %v8970_v17, %v8992_v45 }
 0x308   : > { %v1974_v58 = vsel %vm1963_vm6, %v8758_v52, %v8994_v39  ;;  %2276 = vmatprep.mubr.bf16.mxu0 %v8985_v59  ;;  %v2034_v52 = vsel %vm2031_vm7, %v8837_v28, %v8873_v36  ;;  %v2857_v28 = vld [vmem:[%s10695_s4 + $0x8] sm:$0xff] }
 0x309   : > { %2396 = vmatprep.subr.bf16.mxu1 %v1974_v58  ;;  %2097 = vrot.lane.b32.xlu1 %v8567_v61, %s7756_s24  ;;  %s377_s24 = sand.u32 1, %s7738_s18  }
 0x30a   : > { %2397 = vmatpush1.bf16.msra.mxu1 %v1973_v0  ;;  %v1608_v23 = vpop.permute.xlu0 %1607  ;;  %s6366_s30 = sshll.u32 %s377_s24, 2  ;;  %s6290_s12 = scalar_lea.sflag [#allocation3], %s377_s24 }
 0x30b   : > { %2398 = vmatprep.subr.bf16.mxu1 %v2035_v15  ;;  %v2074_v9 = vpop.permute.xlu1 %2073  ;;  %s379_s15 = scalar_lea.vmem [#allocation2], %s6366_s30  ;;  %s7759_s30 = smov [#allocation2]  }
 0x30c   : > { %v2103_v26 = vsel %vm2099_vm8, %v2074_v9, %v8956_v54  ;;  %s6303_s16 = sshll.u32 %s379_s15, 4  ;;  %s7688_s13 = sshll.u32 %s7759_s30, 4  ;;  %s10651_s16 = int_to_ptr.vmem [resolvable:$true] %s6303_s16  ;;  %s7689_s13 = int_to_ptr.vmem [resolvable:$false] %s7688_s13 }
 0x30d   : > { %2865 = vperm.xlu1 %7370, %v2857_v28   ;;  %s7684_s21 = scalar_lea.vmem %s10651_s16, 64  ;;  %s7690_s22 = scalar_lea.vmem %s7689_s13, 128 }
 0x30e   : > { %2399 = vmatpush1.bf16.msra.mxu1 %v2034_v52  ;;  %v9022_v44 = vpop.permute.xlu0 %1611  ;;  %p7685_p11 = scmp.ne.s32.totalorder %s10651_s16, %s7684_s21  ;;  %p7691_p0 = scmp.lt.s32.totalorder %s10651_s16, %s7689_s13 }
 0x30f   : > { %v9024_v2 = vpop.permute.xlu1 %2023  ;;  %2277 = vmatmul.mubr.bf16.gmra.mrb[72].mxu0 %v9012_v46  ;;  %p7692_p1 = scmp.lt.s32.totalorder %s7690_s22, %s7684_s21 }
 0x310   : > { %v2042_v41 = vsel %vm2031_vm7, %v8905_v29, %v9024_v2  ;;  %2286 = vmatprep.mubr.bf16.mxu0 %v9017_v6  ;;  %v2102_v29 = vsel %vm2099_vm8, %v2072_v63, %v2074_v9  ;;  %p7686_p12 = pnand %p7685_p11, %p7858_p5 }
 0x311   : > { %2400 = vmatprep.subr.bf16.mxu1 %v2042_v41  ;;  %p7693_p2 = por %p7692_p1, %p7691_p0 }
 0x312   : > { %2401 = vmatpush1.bf16.msra.mxu1 %v2041_v3  ;;  %v9037_v36 = vpop.permute.xlu0 %1673  ;;  %p7687_p13 = pneg %p7686_p12 }
 0x313   : > { %2443 = vmatprep.subr.bf16.mxu1 %v2103_v26  ;;  %v2086_v34 = vpop.permute.xlu1 %2085 }
 0x314   : > { %v2108_v33 = vsel %vm2099_vm8, %v2086_v34, %v8970_v17  ;;  %v9125_v17 = vld [vmem:[%s10694_s3 + $0x50] ss:$12 sps:$4 sm:$0xff]   ;;  %p7694_p3 = pnand %p7693_p2, %p7687_p13 }
 0x315   : > { %2299 = vmatprep.subr.bf16.mxu0 %v2108_v33  ;;  %2403 = vmatmul.mubr.bf16.vlgmr.msra.gmra.mrb[64].mxu1 %v8944_v50 }
 0x316   : > { %2444 = vmatpush1.bf16.msra.mxu1 %v2102_v29  ;;  %v9050_v60 = vpop.permute.xlu0 %1677  ;;  %2412 = vmatprep.mubr.bf16.mxu1 %v8949_v55 }
 0x317   : > { %v2084_v49 = vpop.permute.xlu1 %2083  ;;  %2287 = vmatmul.mubr.bf16.gmra.mrb[76].mxu0 %v9044_v43 }
 0x318   : > { %v2107_v12 = vsel %vm2099_vm8, %v2084_v49, %v2086_v34  ;;  %2329 = vmatprep.mubr.bf16.mxu0 %v7751_v27 }
 0x319   : > { %2300 = vmatpush1.bf16.msra.mxu0 %v2107_v12 }
 0x31a   : > { %2516 = vmatprep.subr.bf16.mxu0 %v8449_v18  ;;  %v9057_v31 = vpop.permute.xlu0 %1741 }
 0x31b   : > { %v1610_v37 = vpop.permute.xlu1 %1609 }
 0x31c   : > { %v1634_v25 = vsel %vm554_vm1, %v1608_v23, %v1610_v37 }
 0x31d   : > { %2413 = vmatmul.mubr.bf16.gmra.mrb[68].mxu1 %v8979_v21 }
 0x31e   : > { %v9065_v62 = vpop.permute.xlu0 %1745  ;;  %2422 = vmatprep.mubr.bf16.mxu1 %v8985_v59 }
 0x31f   : > { %v9068_v30 = vpop.permute.xlu1 %1675  ;;  %6461 = vmatmul.mubr.msk.bf16.vlgmr.msra.gmra.mrb[64].mxu0 %vm2211_vm9, %v9062_v13 }
 0x320   : > { %2517 = vmatpush1.bf16.msra.mxu0 %v8446_v20  ;;  %2339 = vmatprep.mubr.bf16.mxu0 %v7751_v27  ;;  %v1702_v49 = vsel %vm1695_vm4, %v9068_v30, %v9050_v60 }
 0x321   : > { %2518 = vmatprep.subr.bf16.mxu0 %v8485_v42  ;;  %v1633_v42 = vsel %vm554_vm1, %v8742_v14, %v1608_v23 }
 0x322   : > { %v9075_v18 = vpop.permute.xlu0 %1807 }
 0x323   : > { %v9077_v1 = vpop.permute.xlu1 %1743 }
 0x324   : > { %2519 = vmatpush1.bf16.msra.mxu0 %v8482_v40 }
 0x325   : > { %2423 = vmatmul.mubr.bf16.gmra.mrb[72].mxu1 %v9012_v46  ;;  %2520 = vmatprep.subr.bf16.mxu0 %v1634_v25 }
 0x326   : > { %v9087_v20 = vpop.permute.xlu0 %1811  ;;  %2432 = vmatprep.mubr.bf16.mxu1 %v9017_v6 }
 0x327   : > { %v9092_v63 = vpop.permute.xlu1 %1809  ;;  %6462 = vmatmul.mubr.msk.bf16.gmra.mrb[68].mxu0 %vm2211_vm9, %v9082_v19 }
 0x328   : > { %2521 = vmatpush1.bf16.msra.mxu0 %v1633_v42  ;;  %2349 = vmatprep.mubr.bf16.mxu0 %v7751_v27  ;;  %v1769_v42 = vsel %vm656_vm2, %v9077_v1, %v9065_v62 }
 0x32a   : > { %v1626_v40 = vpop.permute.xlu0 %1625 }
 0x32b   : > { %v9097_v8 = vpop.permute.xlu1 %2091 }
 0x32c   : > { %v2110_v14 = vsel %vm2099_vm8, %v8992_v45, %v9097_v8 }
 0x32d   : > { %2433 = vmatmul.mubr.bf16.gmra.mrb[76].mxu1 %v9044_v43  ;;  %2445 = vmatprep.subr.bf16.mxu1 %v2110_v14 }
 0x32e   : > { %2446 = vmatpush1.bf16.msra.mxu1 %v2109_v4  ;;  %v9111_v58 = vpop.permute.xlu0 %1873  ;;  %2475 = vmatprep.mubr.bf16.mxu1 %v7751_v27 }
 0x32f   : > { %2662 = vmatprep.subr.bf16.mxu1 %v8521_v24  ;;  %v9115_v0 = vpop.permute.xlu1 %1875  ;;  %6463 = vmatmul.mubr.msk.bf16.gmra.mrb[72].mxu0 %vm2211_vm9, %v9102_v47 }
 0x330   : > { %2359 = vmatprep.mubr.bf16.mxu0 %v7751_v27 }
 0x332   : > { %v1692_v23 = vpop.permute.xlu0 %1691 }
 0x333   : > { %v9120_v15 = vpop.permute.xlu1 %1943 }
 0x335   : > { %6465 = vmatmul.mubr.msk.bf16.vlgmr.msra.gmra.mrb[64].mxu1 %vm2211_vm9, %v9062_v13 }
 0x336   : > { %2663 = vmatpush1.bf16.msra.mxu1 %v8519_v22  ;;  %v9130_v24 = vpop.permute.xlu0 %1877  ;;  %2485 = vmatprep.mubr.bf16.mxu1 %v7751_v27 }
 0x337   : > { %2664 = vmatprep.subr.bf16.mxu1 %v8567_v61  ;;  %v9134_v45 = vpop.permute.xlu1 %2011  ;;  %6464 = vmatmul.mubr.msk.bf16.gmra.mrb[76].mxu0 %vm2211_vm9, %v9125_v17  ;;  %v1635_v61 = vsel %vm554_vm1, %v1610_v37, %v9022_v44 }
 0x338   : > { %2548 = vmatprep.mubr.bf16.mxu0 %v8604_v5 }
 0x33a   : > { %2665 = vmatpush1.bf16.msra.mxu1 %v8565_v53  ;;  %v1701_v53 = vsel %vm1695_vm4, %v9037_v36, %v9068_v30 }
 0x33b   : > { %6473 = vmatprep.subr.msk.bf16.mxu1 %vm554_vm1, %v9022_v44  ;;  %v1760_v9 = vpop.permute.xlu0 %1759  ;;  %v1624_v22 = vpop.permute.xlu1 %1623  ;;  %v1700_v44 = vsel %vm1695_vm4, %v8769_v16, %v9037_v36  ;;  %v1768_v16 = vsel %vm656_vm2, %v9057_v31, %v9077_v1 }
 0x33c   : > { %v1640_v52 = vsel %vm554_vm1, %v8815_v51, %v1624_v22  ;;  %v1641_v41 = vsel %vm554_vm1, %v1624_v22, %v1626_v40 }
 0x33d   : > { %6466 = vmatmul.mubr.msk.bf16.gmra.mrb[68].mxu1 %vm2211_vm9, %v9082_v19  ;;  %2522 = vmatprep.subr.bf16.mxu0 %v1641_v41  ;;  %v1902_v41 = vsel %vm1895_vm5, %v9115_v0, %v9130_v24 }
 0x33e   : > { %2667 = vmatpush1.bf16.msra.mxu1 %v1635_v61  ;;  %2523 = vmatpush1.bf16.msra.mxu0 %v1640_v52 }
 0x33f   : > { %v9152_v3 = vpop.permute.xlu0 %1941  ;;  %v1628_v28 = vpop.permute.xlu1 %1627  ;;  %2524 = vmatprep.subr.bf16.mxu0 %v1701_v53  ;;  %2495 = vmatprep.mubr.bf16.mxu1 %v7751_v27 }
 0x340   : > { %v1642_v51 = vsel %vm554_vm1, %v1626_v40, %v1628_v28  ;;  %6474 = vmatprep.subr.msk.bf16.mxu1 %vm554_vm1, %v1628_v28 }
 0x342   : > { %2669 = vmatpush1.bf16.msra.mxu1 %v1642_v51  ;;  %2525 = vmatpush1.bf16.msra.mxu0 %v1700_v44 }
 0x343   : > { %6475 = vmatprep.subr.msk.bf16.mxu1 %vm1695_vm4, %v9050_v60  ;;  %v1826_v26 = vpop.permute.xlu0 %1825  ;;  %v1690_v34 = vpop.permute.xlu1 %1689  ;;  %v1767_v60 = vsel %vm656_vm2, %v8790_v35, %v9057_v31  ;;  %v1834_v35 = vsel %vm757_vm3, %v9075_v18, %v9092_v63 }
 0x344   : > { %v1707_v33 = vsel %vm1695_vm4, %v8851_v32, %v1690_v34  ;;  %v1708_v29 = vsel %vm1695_vm4, %v1690_v34, %v1692_v23 }
 0x345   : > { %6467 = vmatmul.mubr.msk.bf16.gmra.mrb[72].mxu1 %vm2211_vm9, %v9102_v47  ;;  %2526 = vmatprep.subr.bf16.mxu0 %v1708_v29 }
 0x346   : > { %2671 = vmatpush1.bf16.msra.mxu1 %v1702_v49  ;;  %2527 = vmatpush1.bf16.msra.mxu0 %v1707_v33 }
 0x347   : > { %v9173_v36 = vpop.permute.xlu0 %1945  ;;  %v1694_v12 = vpop.permute.xlu1 %1693  ;;  %2528 = vmatprep.subr.bf16.mxu0 %v1768_v16  ;;  %2505 = vmatprep.mubr.bf16.mxu1 %v7751_v27 }
 0x348   : > { %v1709_v32 = vsel %vm1695_vm4, %v1692_v23, %v1694_v12  ;;  %6476 = vmatprep.subr.msk.bf16.mxu1 %vm1695_vm4, %v1694_v12  ;;  %v1835_v23 = vsel %vm757_vm3, %v9092_v63, %v9087_v20  ;;  %v1970_v51 = vsel %vm1963_vm6, %v9120_v15, %v9173_v36 }
 0x34a   : > { %2673 = vmatpush1.bf16.msra.mxu1 %v1709_v32  ;;  %2529 = vmatpush1.bf16.msra.mxu0 %v1767_v60 }
 0x34b   : > { %6477 = vmatprep.subr.msk.bf16.mxu1 %vm656_vm2, %v9065_v62  ;;  %v1758_v37 = vpop.permute.xlu1 %1757  ;;  %v1892_v40 = vpop.permute.xlu0 %1891  ;;  %v1833_v62 = vsel %vm757_vm3, %v8802_v10, %v9075_v18  ;;  %v1901_v10 = vsel %vm1895_vm5, %v9111_v58, %v9115_v0 }
 0x34c   : > { %v1774_v30 = vsel %vm656_vm2, %v8890_v7, %v1758_v37  ;;  %v1775_v25 = vsel %vm656_vm2, %v1758_v37, %v1760_v9 }
 0x34d   : > { %6468 = vmatmul.mubr.msk.bf16.gmra.mrb[76].mxu1 %vm2211_vm9, %v9125_v17  ;;  %2530 = vmatprep.subr.bf16.mxu0 %v1775_v25 }
 0x34e   : > { %2675 = vmatpush1.bf16.msra.mxu1 %v1769_v42  ;;  %2531 = vmatpush1.bf16.msra.mxu0 %v1774_v30  ;;  %v7419_v42 = vld [vmem:[%s10696_s5 + $0x50] sm:$0xff]  }
 0x34f   : > { %v1762_v31 = vpop.permute.xlu1 %1761  ;;  %2532 = vmatprep.subr.bf16.mxu0 %v1834_v35  ;;  %2694 = vmatprep.mubr.bf16.mxu1 %v8604_v5  ;;  %v2010_v1 = vpop.permute.xlu0 %2009  ;;  %v7421_v35 = vld [vmem:[%s10696_s5 + $0x10] sm:$0xff]  }
 0x350   : > { %v1776_v7 = vsel %vm656_vm2, %v1760_v9, %v1762_v31  ;;  %6478 = vmatprep.subr.msk.bf16.mxu1 %vm656_vm2, %v1762_v31  ;;  %v7422_v31 = vld [vmem:[%s10696_s5 + $0x90] sm:$0xff]  }
 0x352   : > { %2677 = vmatpush1.bf16.msra.mxu1 %v1776_v7  ;;  %2533 = vmatpush1.bf16.msra.mxu0 %v1833_v62  ;;  %v7423_v7 = vld [vmem:[%s10696_s5 + $0x58] sm:$0xff]  }
 0x353   : > { %6479 = vmatprep.subr.msk.bf16.mxu1 %vm757_vm3, %v9087_v20  ;;  %v1824_v14 = vpop.permute.xlu1 %1823  ;;  %v1960_v22 = vpop.permute.xlu0 %1959  ;;  %v7424_v62 = vld [vmem:[%s10696_s5 + $0xd8] sm:$0xff]  }
 0x354   : > { %v1840_v4 = vsel %vm757_vm3, %v8924_v38, %v1824_v14  ;;  %v1841_v5 = vsel %vm757_vm3, %v1824_v14, %v1826_v26  ;;  %v1900_v38 = vsel %vm1895_vm5, %v8813_v48, %v9111_v58  ;;  %v1969_v48 = vsel %vm1963_vm6, %v9152_v3, %v9120_v15  ;;  %v7425_v14 = vld [vmem:[%s10696_s5 + $0x18] sm:$0xff]  }
 0x355   : > { %2534 = vmatprep.subr.bf16.mxu0 %v1841_v5 }
 0x356   : > { %2679 = vmatpush1.bf16.msra.mxu1 %v1835_v23  ;;  %2535 = vmatpush1.bf16.msra.mxu0 %v1840_v4  ;;  %v7426_v4 = vld [vmem:[%s10696_s5 + $0x98] sm:$0xff]  }
 0x357   : > { %v1828_v18 = vpop.permute.xlu1 %1827  ;;  %2536 = vmatprep.subr.bf16.mxu0 %v1901_v10  ;;  %v2014_v58 = vpop.permute.xlu0 %2013 }
 0x358   : > { %v1842_v9 = vsel %vm757_vm3, %v1826_v26, %v1828_v18  ;;  %6480 = vmatprep.subr.msk.bf16.mxu1 %vm757_vm3, %v1828_v18  ;;  %v2038_v49 = vsel %vm2031_vm7, %v9134_v45, %v2014_v58 }
 0x35a   : > { %2681 = vmatpush1.bf16.msra.mxu1 %v1842_v9  ;;  %2537 = vmatpush1.bf16.msra.mxu0 %v1900_v38 }
 0x35b   : > { %6481 = vmatprep.subr.msk.bf16.mxu1 %vm1895_vm5, %v9130_v24  ;;  %v1890_v20 = vpop.permute.xlu1 %1889  ;;  %v2028_v44 = vpop.permute.xlu0 %2027 }
 0x35c   : > { %v1907_v63 = vsel %vm1895_vm5, %v8958_v56, %v1890_v20  ;;  %v1908_v52 = vsel %vm1895_vm5, %v1890_v20, %v1892_v40  ;;  %v1968_v56 = vsel %vm1963_vm6, %v8832_v11, %v9152_v3  ;;  %v2037_v11 = vsel %vm2031_vm7, %v2010_v1, %v9134_v45  ;;  %v7428_v20 = vld [vmem:[%s10696_s5 + $0xe0] sm:$0xff]  }
 0x35d   : > { %2538 = vmatprep.subr.bf16.mxu0 %v1908_v52  ;;  %v7429_v52 = vld [vmem:[%s10696_s5 + $0x20] sm:$0xff]  }
 0x35e   : > { %2683 = vmatpush1.bf16.msra.mxu1 %v1902_v41  ;;  %2539 = vmatpush1.bf16.msra.mxu0 %v1907_v63  ;;  %v7430_v41 = vld [vmem:[%s10696_s5 + $0xa0] sm:$0xff]  }
 0x35f   : > { %v1894_v61 = vpop.permute.xlu1 %1893  ;;  %2540 = vmatprep.subr.bf16.mxu0 %v1969_v48  ;;  %v2078_v34 = vpop.permute.xlu0 %2077  ;;  %v7431_v48 = vld [vmem:[%s10696_s5 + $0x68] sm:$0xff]  }
 0x360   : > { %v1909_v53 = vsel %vm1895_vm5, %v1892_v40, %v1894_v61  ;;  %6482 = vmatprep.subr.msk.bf16.mxu1 %vm1895_vm5, %v1894_v61  ;;  %v2104_v32 = vsel %vm2099_vm8, %v8956_v54, %v2078_v34  ;;  %v7420_v40 = vld [vmem:[%s10696_s5 + $0xd0] sm:$0xff]  }
 0x362   : > { %2685 = vmatpush1.bf16.msra.mxu1 %v1909_v53  ;;  %2541 = vmatpush1.bf16.msra.mxu0 %v1968_v56  ;;  %v7433_v53 = vld [vmem:[%s10696_s5 + $0x28] sm:$0xff]  }
 0x363   : > { %6483 = vmatprep.subr.msk.bf16.mxu1 %vm1963_vm6, %v9173_v36  ;;  %v1958_v0 = vpop.permute.xlu1 %1957  ;;  %v2082_v36 = vpop.permute.xlu0 %2081  ;;  %v7434_v56 = vld [vmem:[%s10696_s5 + $0xa8] sm:$0xff]  }
 0x364   : > { %v1975_v24 = vsel %vm1963_vm6, %v8994_v39, %v1958_v0  ;;  %v1976_v28 = vsel %vm1963_vm6, %v1958_v0, %v1960_v22  ;;  %v2036_v39 = vsel %vm2031_vm7, %v8868_v57, %v2010_v1 }
 0x365   : > { %2542 = vmatprep.subr.bf16.mxu0 %v1976_v28 }
 0x366   : > { %2687 = vmatpush1.bf16.msra.mxu1 %v1970_v51  ;;  %2543 = vmatpush1.bf16.msra.mxu0 %v1975_v24  ;;  %v7435_v51 = vld [vmem:[%s10696_s5 + $0x70] sm:$0xff]  }
 0x367   : > { %v1962_v3 = vpop.permute.xlu1 %1961  ;;  %2544 = vmatprep.subr.bf16.mxu0 %v2037_v11  ;;  %v2096_v60 = vpop.permute.xlu0 %2095  ;;  %v7437_v11 = vld [vmem:[%s10696_s5 + $0x30] sm:$0xff]  }
 0x368   : > { %v1977_v26 = vsel %vm1963_vm6, %v1960_v22, %v1962_v3  ;;  %6484 = vmatprep.subr.msk.bf16.mxu1 %vm1963_vm6, %v1962_v3  ;;  %v7427_v22 = vld [vmem:[%s10696_s5 + $0x60] sm:$0xff]   ;;  %v7438_v3 = vld [vmem:[%s10696_s5 + $0xb0] sm:$0xff]  }
 0x36a   : > { %2689 = vmatpush1.bf16.msra.mxu1 %v1977_v26  ;;  %2545 = vmatpush1.bf16.msra.mxu0 %v2036_v39 }
 0x36b   : > { %6485 = vmatprep.subr.msk.bf16.mxu1 %vm2031_vm7, %v2014_v58  ;;  %v2026_v15 = vpop.permute.xlu1 %2025  ;;  %v7432_v58 = vld [vmem:[%s10696_s5 + $0xe8] sm:$0xff]  }
 0x36c   : > { %v2043_v33 = vsel %vm2031_vm7, %v9024_v2, %v2026_v15  ;;  %v2044_v29 = vsel %vm2031_vm7, %v2026_v15, %v2028_v44  ;;  %v7440_v15 = vld [vmem:[%s10696_s5 + $0xf8] sm:$0xff]  }
 0x36d   : > { %2546 = vmatprep.subr.bf16.mxu0 %v2044_v29 }
 0x36e   : > { %2691 = vmatpush1.bf16.msra.mxu1 %v2038_v49  ;;  %2547 = vmatpush1.bf16.msra.mxu0 %v2043_v33  ;;  %v7441_v49 = vld [vmem:[%s10696_s5 + $0x38] sm:$0xff]  }
 0x36f   : > { %v2030_v16 = vpop.permute.xlu1 %2029 }
 0x370   : > { %v2045_v57 = vsel %vm2031_vm7, %v2028_v44, %v2030_v16  ;;  %6486 = vmatprep.subr.msk.bf16.mxu1 %vm2031_vm7, %v2030_v16  ;;  %v7436_v44 = vld [vmem:[%s10696_s5 + $0xf0] sm:$0xff]   ;;  %v7442_v16 = vld [vmem:[%s10696_s5 + $0xb8] sm:$0xff]  }
 0x371   : > { %2549 = vmatmul.mubr.bf16.vlgmr.msra.gmra.mrb[80].mxu0 %v8944_v50 }
 0x372   : > { %2693 = vmatpush1.bf16.msra.mxu1 %v2045_v57  ;;  %2558 = vmatprep.mubr.bf16.mxu0 %v8949_v55 }
 0x373   : > { %6487 = vmatprep.subr.msk.bf16.mxu1 %vm2099_vm8, %v2082_v36  ;;  %v2080_v2 = vpop.permute.xlu1 %2079 }
 0x374   : > { %v2106_v12 = vsel %vm2099_vm8, %v2080_v2, %v2082_v36  ;;  %v2105_v45 = vsel %vm2099_vm8, %v2078_v34, %v2080_v2  ;;  %v7439_v34 = vld [vmem:[%s10696_s5 + $0x78] sm:$0xff]  }
 0x375   : > { %2695 = vmatmul.mubr.bf16.vlgmr.msra.gmra.mrb[80].mxu1 %v8944_v50  ;;  %2589 = vmatprep.subr.bf16.mxu0 %v2105_v45 }
 0x376   : > { %2736 = vmatpush1.bf16.msra.mxu1 %v2106_v12  ;;  %2590 = vmatpush1.bf16.msra.mxu0 %v2104_v32 }
 0x377   : > { %v2094_v37 = vpop.permute.xlu1 %2093  ;;  %2704 = vmatprep.mubr.bf16.mxu1 %v8949_v55  ;;  %v7411_v55 = vld [vmem:[%s10696_s5 + $0x40] sm:$0xff]  }
 0x378   : > { %v2111_v30 = vsel %vm2099_vm8, %v9097_v8, %v2094_v37  ;;  %v2112_v25 = vsel %vm2099_vm8, %v2094_v37, %v2096_v60 }
 0x379   : > { %2559 = vmatmul.mubr.bf16.gmra.mrb[84].mxu0 %v8979_v21  ;;  %2591 = vmatprep.subr.bf16.mxu0 %v2112_v25  ;;  %v7444_v25 = vld [vmem:[%s10696_s5 + $0x1c0] sm:$0xff]  }
 0x37a   : > { %2592 = vmatpush1.bf16.msra.mxu0 %v2111_v30  ;;  %2568 = vmatprep.mubr.bf16.mxu0 %v8985_v59  ;;  %v7443_v30 = vld [vmem:[%s10696_s5 + $0x140] sm:$0xff]  }
 0x37b   : > { %v2098_v54 = vpop.permute.xlu1 %2097  ;;  %6844 = vmatprep.subr.bf16.mxu0 %v7411_v55 }
 0x37c   : > { %v2113_v50 = vsel %vm2099_vm8, %v2096_v60, %v2098_v54  ;;  %6488 = vmatprep.subr.msk.bf16.mxu1 %vm2099_vm8, %v2098_v54 }
 0x37d   : > { %2705 = vmatmul.mubr.bf16.gmra.mrb[84].mxu1 %v8979_v21  ;;  %v7412_v21 = vld [vmem:[%s10696_s5 + $0xc0] sm:$0xff]  }
 0x37e   : > { %2738 = vmatpush1.bf16.msra.mxu1 %v2113_v50  ;;  %2714 = vmatprep.mubr.bf16.mxu1 %v8985_v59  ;;  %v7413_v59 = vld [vmem:[%s10696_s5] sm:$0xff]  }
 0x37f   : > { %6866 = vmatprep.subr.bf16.mxu1 %v7412_v21 }
 0x381   : > { %2569 = vmatmul.mubr.bf16.gmra.mrb[88].mxu0 %v9012_v46 }
 0x382   : > { %2578 = vmatprep.mubr.bf16.mxu0 %v9017_v6 }
 0x385   : > { %2715 = vmatmul.mubr.bf16.gmra.mrb[88].mxu1 %v9012_v46  ;;  %v7415_v46 = vld [vmem:[%s10696_s5 + $0x48] sm:$0xff]  }
 0x386   : > { %2724 = vmatprep.mubr.bf16.mxu1 %v9017_v6  ;;  %v7416_v6 = vld [vmem:[%s10696_s5 + $0xc8] sm:$0xff]  }
 0x389   : > { %2579 = vmatmul.mubr.bf16.gmra.mrb[92].mxu0 %v9044_v43 }
 0x38a   : > { %2621 = vmatprep.mubr.bf16.mxu0 %v7751_v27 }
 0x38d   : > { %2725 = vmatmul.mubr.bf16.gmra.mrb[92].mxu1 %v9044_v43 }
 0x38e   : > { %2767 = vmatprep.mubr.bf16.mxu1 %v7751_v27 }
 0x391   : > { %6469 = vmatmul.mubr.msk.bf16.vlgmr.msra.gmra.mrb[80].mxu0 %vm2211_vm9, %v9062_v13 }
 0x392   : > { %2631 = vmatprep.mubr.bf16.mxu0 %v7751_v27  ;;  %6845 = vmatpush3.bf16.msra.mxu0 %v7413_v59 }
 0x393   : > { %6846 = vmatprep.subr.bf16.mxu0 %v7415_v46 }
 0x395   : > { %6489 = vmatmul.mubr.msk.bf16.vlgmr.msra.gmra.mrb[80].mxu1 %vm2211_vm9, %v9062_v13  ;;  %v7417_v13 = vld [vmem:[%s10696_s5 + $0x8] sm:$0xff]  }
 0x396   : > { %2777 = vmatprep.mubr.bf16.mxu1 %v7751_v27  ;;  %6847 = vmatpush3.bf16.msra.mxu0 %v7417_v13 }
 0x397   : > { %6848 = vmatprep.subr.bf16.mxu0 %v7419_v42 }
 0x399   : > { %6470 = vmatmul.mubr.msk.bf16.gmra.mrb[84].mxu0 %vm2211_vm9, %v9082_v19 }
 0x39a   : > { %2641 = vmatprep.mubr.bf16.mxu0 %v7751_v27  ;;  %6849 = vmatpush3.bf16.msra.mxu0 %v7421_v35 }
 0x39b   : > { %6850 = vmatprep.subr.bf16.mxu0 %v7423_v7 }
 0x39d   : > { %6490 = vmatmul.mubr.msk.bf16.gmra.mrb[84].mxu1 %vm2211_vm9, %v9082_v19  ;;  %v7418_v19 = vld [vmem:[%s10696_s5 + $0x88] sm:$0xff]  }
 0x39e   : > { %2787 = vmatprep.mubr.bf16.mxu1 %v7751_v27  ;;  %6851 = vmatpush3.bf16.msra.mxu0 %v7425_v14 }
 0x39f   : > { %6852 = vmatprep.subr.bf16.mxu0 %v7427_v22 }
 0x3a1   : > { %6471 = vmatmul.mubr.msk.bf16.gmra.mrb[88].mxu0 %vm2211_vm9, %v9102_v47 }
 0x3a2   : > { %2651 = vmatprep.mubr.bf16.mxu0 %v7751_v27  ;;  %6853 = vmatpush3.bf16.msra.mxu0 %v7429_v52 }
 0x3a3   : > { %6854 = vmatprep.subr.bf16.mxu0 %v7431_v48 }
 0x3a5   : > { %6491 = vmatmul.mubr.msk.bf16.gmra.mrb[88].mxu1 %vm2211_vm9, %v9102_v47 }
 0x3a6   : > { %2797 = vmatprep.mubr.bf16.mxu1 %v7751_v27  ;;  %v7414_v27 = vld [vmem:[%s10696_s5 + $0x80] sm:$0xff]   ;;  %6855 = vmatpush3.bf16.msra.mxu0 %v7433_v53 }
 0x3a7   : > { %6867 = vmatpush3.bf16.msra.mxu1 %v7414_v27  ;;  %6856 = vmatprep.subr.bf16.mxu0 %v7435_v51 }
 0x3a8   : > { %6868 = vmatprep.subr.bf16.mxu1 %v7416_v6 }
 0x3a9   : > { %6472 = vmatmul.mubr.msk.bf16.gmra.mrb[92].mxu0 %vm2211_vm9, %v9125_v17 }
 0x3aa   : > { %6857 = vmatpush3.bf16.msra.mxu0 %v7437_v11 }
 0x3ab   : > { %6869 = vmatpush3.bf16.msra.mxu1 %v7418_v19  ;;  %6858 = vmatprep.subr.bf16.mxu0 %v7439_v34 }
 0x3ac   : > { %6870 = vmatprep.subr.bf16.mxu1 %v7420_v40  ;;  %v9432_v40 = vpop.permute.xlu1 %2865 }
 0x3ad   : > { %6492 = vmatmul.mubr.msk.bf16.gmra.mrb[92].mxu1 %vm2211_vm9, %v9125_v17 }
 0x3ae   : > { %6859 = vmatpush3.bf16.msra.mxu0 %v7441_v49 }
 0x3af   : > { %6871 = vmatpush3.bf16.msra.mxu1 %v7422_v31  ;;  %6888 = vmatprep.subr.bf16.mxu0 %v7443_v30 }
 0x3b0   : > { %6872 = vmatprep.subr.bf16.mxu1 %v7424_v62 }
 0x3b3   : > { %6873 = vmatpush3.bf16.msra.mxu1 %v7426_v4 }
 0x3b4   : > { %6874 = vmatprep.subr.bf16.mxu1 %v7428_v20 }
 0x3b7   : > { %6875 = vmatpush3.bf16.msra.mxu1 %v7430_v41 }
 0x3b8   : > { %6876 = vmatprep.subr.bf16.mxu1 %v7432_v58 }
 0x3bb   : > { %6877 = vmatpush3.bf16.msra.mxu1 %v7434_v56 }
 0x3bc   : > { %6878 = vmatprep.subr.bf16.mxu1 %v7436_v44 }
 0x3bf   : > { %6879 = vmatpush3.bf16.msra.mxu1 %v7438_v3 }
 0x3c0   : > { %6880 = vmatprep.subr.bf16.mxu1 %v7440_v15 }
 0x3c3   : > { %6881 = vmatpush3.bf16.msra.mxu1 %v7442_v16 }
 0x3c4   : > { %6910 = vmatprep.subr.bf16.mxu1 %v7444_v25 }
 0x3f2   : > { %v9320_v43 = vpop.f32.mrb[64].mxu0 }
 0x3f3   : > { %v9328_v8 = vpop.f32.mrb[65].mxu0 }
 0x3f4   : > { %v9330_v47 = vpop.f32.mrb[66].mxu0 }
 0x3f5   : > { %v9332_v17 = vpop.f32.mrb[67].mxu0 }
 0x3fa   : > { %v2341_v1 = vpop.f32.mrb[68].mxu0 }
 0x3fb   : > { %v2808_v5 = vmax.f32 %v9320_v43, %v2341_v1  ;;  %v2343_v23 = vpop.f32.mrb[69].mxu0 }
 0x3fc   : > { %v2809_v10 = vmax.f32 %v9328_v8, %v2343_v23  ;;  %v2345_v18 = vpop.f32.mrb[70].mxu0 }
 0x3fd   : > { %v2816_v9 = vmax.f32 %v9330_v47, %v2345_v18  ;;  %v2347_v38 = vpop.f32.mrb[71].mxu0  ;;  %v9428_v47 = vpop.permute.xlu0 %2860 }
 0x3fe   : > { %v2817_v63 = vmax.f32 %v9332_v17, %v2347_v38 }
 0x402   : > { %v2351_v61 = vpop.f32.mrb[72].mxu0 }
 0x403   : > { %v2353_v0 = vpop.f32.mrb[73].mxu0 }
 0x404   : > { %v2355_v24 = vpop.f32.mrb[74].mxu0 }
 0x405   : > { %v2357_v28 = vpop.f32.mrb[75].mxu0 }
 0x408   : > { %v9398_v26 = vpop.f32.mrb[64].mxu1 }
 0x409   : > { %v9400_v39 = vpop.f32.mrb[65].mxu1 }
 0x40a   : > { %v9408_v33 = vpop.f32.mrb[66].mxu1  ;;  %v2361_v29 = vpop.f32.mrb[76].mxu0 }
 0x40b   : > { %v2824_v57 = vmax.f32 %v2351_v61, %v2361_v29  ;;  %v9416_v36 = vpop.f32.mrb[67].mxu1  ;;  %v2363_v2 = vpop.f32.mrb[77].mxu0 }
 0x40c   : > { %v2825_v12 = vmax.f32 %v2353_v0, %v2363_v2  ;;  %v2365_v45 = vpop.f32.mrb[78].mxu0 }
 0x40d   : > { %v2840_v32 = vmax.f32 %v2808_v5, %v2824_v57  ;;  %v2832_v60 = vmax.f32 %v2355_v24, %v2365_v45  ;;  %v2367_v37 = vpop.f32.mrb[79].mxu0 }
 0x40e   : > { %v2841_v54 = vmax.f32 %v2809_v10, %v2825_v12  ;;  %v2833_v50 = vmax.f32 %v2357_v28, %v2367_v37 }
 0x40f   : > { %v2848_v55 = vmax.f32 %v2816_v9, %v2832_v60  ;;  %v2868_v17 = vadd.f32 %v9428_v47, %v2840_v32 }
 0x410   : > { %v2849_v21 = vmax.f32 %v2817_v63, %v2833_v50  ;;  %v2487_v59 = vpop.f32.mrb[68].mxu1  ;;  %v2869_v42 = vadd.f32 %v9428_v47, %v2841_v54 }
 0x411   : > { %v2810_v27 = vmax.f32 %v9398_v26, %v2487_v59  ;;  %v2489_v46 = vpop.f32.mrb[69].mxu1  ;;  %v9434_v7 = vmax.f32 %v2868_v17, 0.0  ;;  %v2876_v62 = vadd.f32 %v9432_v40, %v2848_v55 }
 0x412   : > { %v2811_v6 = vmax.f32 %v9400_v39, %v2489_v46  ;;  %v2491_v43 = vpop.f32.mrb[70].mxu1  ;;  %v2877_v1 = vadd.f32 %v9432_v40, %v2849_v21  ;;  %v9438_v4 = vmax.f32 %v2869_v42, 0.0 }
 0x413   : > { %v2818_v13 = vmax.f32 %v9408_v33, %v2491_v43  ;;  %v2493_v19 = vpop.f32.mrb[71].mxu1  ;;  %v9440_v23 = vmax.f32 %v2876_v62, 0.0  ;;  %v2902_v18 = vrot.slane %v9434_v7, 1  ;;  %v2906_v20 = vrot.slane %v9434_v7, 2 }
 0x414   : > { %v2819_v8 = vmax.f32 %v9416_v36, %v2493_v19  ;;  %v9442_v10 = vmax.f32 %v2877_v1, 0.0  ;;  %v2903_v9 = vrot.slane %v9438_v4, 1  ;;  %v2907_v38 = vrot.slane %v9438_v4, 2 }
 0x415   : > { %v2911_v22 = vrot.slane %v9438_v4, 3  ;;  %v2910_v52 = vrot.slane %v9434_v7, 3  ;;  %v2915_v41 = vrot.slane %v9438_v4, 4  ;;  %v2919_v48 = vrot.slane %v9438_v4, 5 }
 0x416   : > { %v2914_v58 = vrot.slane %v9434_v7, 4  ;;  %v2918_v56 = vrot.slane %v9434_v7, 5  ;;  %v2923_v0 = vrot.slane %v9438_v4, 6  ;;  %v2927_v24 = vrot.slane %v9438_v4, 7 }
 0x417   : > { %v2922_v44 = vrot.slane %v9434_v7, 6  ;;  %v2926_v11 = vrot.slane %v9434_v7, 7  ;;  %v2933_v3 = vrot.slane %v9442_v10, 1  ;;  %v2932_v15 = vrot.slane %v9440_v23, 1 }
 0x418   : > { %v2497_v35 = vpop.f32.mrb[72].mxu1  ;;  %v2937_v33 = vrot.slane %v9442_v10, 2  ;;  %v2941_v16 = vrot.slane %v9442_v10, 3  ;;  %v2936_v57 = vrot.slane %v9440_v23, 2  ;;  %v2940_v12 = vrot.slane %v9440_v23, 3 }
 0x419   : > { %v2499_v31 = vpop.f32.mrb[73].mxu1  ;;  %v2945_v45 = vrot.slane %v9442_v10, 4  ;;  %v2949_v37 = vrot.slane %v9442_v10, 5  ;;  %v2944_v30 = vrot.slane %v9440_v23, 4  ;;  %v2948_v50 = vrot.slane %v9440_v23, 5 }
 0x41a   : > { %v2501_v14 = vpop.f32.mrb[74].mxu1  ;;  %v2953_v55 = vrot.slane %v9442_v10, 6  ;;  %v2952_v46 = vrot.slane %v9440_v23, 6 }
 0x41b   : > { %v2503_v5 = vpop.f32.mrb[75].mxu1 }
 0x420   : > { %v2507_v63 = vpop.f32.mrb[76].mxu1 }
 0x421   : > { %v2826_v61 = vmax.f32 %v2497_v35, %v2507_v63  ;;  %v2509_v53 = vpop.f32.mrb[77].mxu1 }
 0x422   : > { %v2827_v28 = vmax.f32 %v2499_v31, %v2509_v53  ;;  %v2511_v51 = vpop.f32.mrb[78].mxu1 }
 0x423   : > { %v2842_v26 = vmax.f32 %v2810_v27, %v2826_v61  ;;  %v2834_v39 = vmax.f32 %v2501_v14, %v2511_v51  ;;  %v2513_v34 = vpop.f32.mrb[79].mxu1  ;;  %v2957_v27 = vrot.slane %v9442_v10, 7 }
 0x424   : > { %v2843_v29 = vmax.f32 %v2811_v6, %v2827_v28  ;;  %v2835_v49 = vmax.f32 %v2503_v5, %v2513_v34 }
 0x425   : > { %v2870_v36 = vadd.f32 %v9428_v47, %v2842_v26  ;;  %v2850_v2 = vmax.f32 %v2818_v13, %v2834_v39 }
 0x426   : > { %v2871_v32 = vadd.f32 %v9428_v47, %v2843_v29  ;;  %v2851_v60 = vmax.f32 %v2819_v8, %v2835_v49 }
 0x427   : > { %v2886_v25 = vmax.f32 %v2870_v36, 0.0  ;;  %v2878_v54 = vadd.f32 %v9432_v40, %v2850_v2 }
 0x428   : > { %v2887_v21 = vmax.f32 %v2871_v32, 0.0  ;;  %v2879_v59 = vadd.f32 %v9432_v40, %v2851_v60 }
 0x429   : > { %v9475_v6 = vmax.f32 %v2878_v54, 0.0  ;;  %v2974_v43 = vrot.slane %v2886_v25, 7  ;;  %v9478_v13 = vsel %vm3236_vm10, %v2902_v18, %v2886_v25  ;;  %v6495_v19 = vrot.slane %v2886_v25, 9 }
 0x42a   : > { %v2895_v8 = vmax.f32 %v2879_v59, 0.0  ;;  %v2975_v17 = vrot.slane %v2887_v21, 7  ;;  %v9481_v42 = vsel %vm3236_vm10, %v2903_v9, %v2887_v21  ;;  %v6496_v35 = vrot.slane %v2887_v21, 9 }
 0x42b   : > { %v9485_v31 = vsel %vm3236_vm10, %v9434_v7, %v2974_v43  ;;  %v6498_v62 = vrot.slane %v2887_v21, 10  ;;  %v9488_v1 = vsel %vm3236_vm10, %v2906_v20, %v6495_v19  ;;  %v6497_v14 = vrot.slane %v2886_v25, 10 }
 0x42c   : > { %v9492_v5 = vsel %vm3236_vm10, %v9438_v4, %v2975_v17  ;;  %v9495_v18 = vsel %vm3236_vm10, %v2907_v38, %v6496_v35  ;;  %v6500_v63 = vrot.slane %v2887_v21, 11  ;;  %v6502_v9 = vrot.slane %v2887_v21, 12 }
 0x42d   : > { %v9498_v61 = vsel %vm3236_vm10, %v2911_v22, %v6498_v62  ;;  %v9501_v7 = vsel %vm3236_vm10, %v2910_v52, %v6497_v14  ;;  %v6499_v53 = vrot.slane %v2886_v25, 11  ;;  %v6501_v28 = vrot.slane %v2886_v25, 12 }
 0x42e   : > { %v9504_v20 = vsel %vm3236_vm10, %v2915_v41, %v6500_v63  ;;  %v9507_v51 = vsel %vm3236_vm10, %v2919_v48, %v6502_v9  ;;  %v6504_v4 = vrot.slane %v2887_v21, 13  ;;  %v3069_v26 = vrot.slane %v2975_v17, 7 }
 0x42f   : > { %v9510_v38 = vsel %vm3236_vm10, %v2914_v58, %v6499_v53  ;;  %v9513_v39 = vsel %vm3236_vm10, %v2918_v56, %v6501_v28  ;;  %v6503_v22 = vrot.slane %v2886_v25, 13  ;;  %v3068_v34 = vrot.slane %v2974_v43, 7 }
 0x430   : > { %v9516_v52 = vsel %vm3236_vm10, %v2923_v0, %v6504_v4  ;;  %v9519_v29 = vsel %vm3236_vm10, %v2927_v24, %v3069_v26  ;;  %v2991_v41 = vrot.slane %v2895_v8, 7  ;;  %v9522_v48 = vsel %vm3236_vm10, %v2933_v3, %v2895_v8 }
 0x431   : > { %v9525_v49 = vsel %vm3236_vm10, %v2922_v44, %v6503_v22  ;;  %v9528_v58 = vsel %vm3236_vm10, %v2926_v11, %v3068_v34  ;;  %v2990_v56 = vrot.slane %v9475_v6, 7  ;;  %v9533_v36 = vsel %vm3236_vm10, %v2932_v15, %v9475_v6 }
 0x432   : > { %v9537_v0 = vsel %vm3236_vm10, %v9442_v10, %v2991_v41  ;;  %v6508_v24 = vrot.slane %v2895_v8, 9  ;;  %v6510_v2 = vrot.slane %v2895_v8, 10  ;;  %v6507_v3 = vrot.slane %v9475_v6, 9 }
 0x433   : > { %v9542_v44 = vsel %vm3236_vm10, %v9440_v23, %v2990_v56  ;;  %v6509_v11 = vrot.slane %v9475_v6, 10  ;;  %v6512_v32 = vrot.slane %v2895_v8, 11  ;;  %v6514_v60 = vrot.slane %v2895_v8, 12 }
 0x434   : > { %v9548_v15 = vsel %vm3236_vm10, %v2937_v33, %v6508_v24  ;;  %v9553_v25 = vsel %vm3236_vm10, %v2941_v16, %v6510_v2  ;;  %v9558_v54 = vsel %vm3236_vm10, %v2936_v57, %v6507_v3  ;;  %v6511_v21 = vrot.slane %v9475_v6, 11 }
 0x435   : > { %v9564_v59 = vsel %vm3236_vm10, %v2940_v12, %v6509_v11  ;;  %v9569_v33 = vsel %vm3236_vm10, %v2945_v45, %v6512_v32  ;;  %v9572_v16 = vsel %vm3236_vm10, %v2949_v37, %v6514_v60  ;;  %v6513_v43 = vrot.slane %v9475_v6, 12 }
 0x436   : > { %v9576_v57 = vsel %vm3236_vm10, %v2944_v30, %v6511_v21  ;;  %v6516_v19 = vrot.slane %v2895_v8, 13  ;;  %v3083_v17 = vrot.slane %v2991_v41, 7  ;;  %v6515_v35 = vrot.slane %v9475_v6, 13 }
 0x437   : > { %v9582_v12 = vsel %vm3236_vm10, %v2948_v50, %v6513_v43  ;;  %v2956_v45 = vrot.slane %v9440_v23, 7  ;;  %v3082_v62 = vrot.slane %v2990_v56, 7 }
 0x438   : > { %10705 = vst [vmem:[#allocation5_spill] sm:$0xff] %v9582_v12  ;;  %v9588_v37 = vsel %vm3236_vm10, %v2953_v55, %v6516_v19  ;;  %v9593_v30 = vsel %vm3236_vm10, %v2957_v27, %v3083_v17  ;;  %v9598_v6 = vsel %vm3236_vm10, %v2952_v46, %v6515_v35 }
 0x439   : > { %10706 = vst [vmem:[#allocation6_spill] sm:$0xff] %v9588_v37  ;;  %10707 = vst [vmem:[#allocation7_spill] sm:$0xff] %v9593_v30  ;;  %v9601_v50 = vsel %vm3236_vm10, %v2956_v45, %v3082_v62 }
 0x43a   : > { %10708 = vst [vmem:[#allocation8_spill] sm:$0xff] %v9598_v6  ;;  %10709 = vst [vmem:[#allocation9_spill] sm:$0xff] %v9601_v50 }
 0x464   : > { %v2623_v8 = vpop.f32.mrb[80].mxu0 }
 0x465   : > { %v2625_v14 = vpop.f32.mrb[81].mxu0 }
 0x466   : > { %v2627_v63 = vpop.f32.mrb[82].mxu0 }
 0x467   : > { %v2629_v9 = vpop.f32.mrb[83].mxu0 }
 0x468   : > { %v2769_v53 = vpop.f32.mrb[80].mxu1 }
 0x469   : > { %v2771_v55 = vpop.f32.mrb[81].mxu1 }
 0x46a   : > { %v2773_v28 = vpop.f32.mrb[82].mxu1 }
 0x46b   : > { %v2775_v4 = vpop.f32.mrb[83].mxu1 }
 0x46c   : > { %v2633_v10 = vpop.f32.mrb[84].mxu0 }
 0x46d   : > { %v2812_v26 = vmax.f32 %v2623_v8, %v2633_v10  ;;  %v2635_v27 = vpop.f32.mrb[85].mxu0 }
 0x46e   : > { %v2813_v22 = vmax.f32 %v2625_v14, %v2635_v27  ;;  %v2637_v34 = vpop.f32.mrb[86].mxu0 }
 0x46f   : > { %v2820_v23 = vmax.f32 %v2627_v63, %v2637_v34  ;;  %v2639_v41 = vpop.f32.mrb[87].mxu0 }
 0x470   : > { %v2821_v46 = vmax.f32 %v2629_v9, %v2639_v41  ;;  %v2779_v56 = vpop.f32.mrb[84].mxu1 }
 0x471   : > { %v2814_v24 = vmax.f32 %v2769_v53, %v2779_v56  ;;  %v2781_v2 = vpop.f32.mrb[85].mxu1 }
 0x472   : > { %v2815_v3 = vmax.f32 %v2771_v55, %v2781_v2  ;;  %v2783_v11 = vpop.f32.mrb[86].mxu1 }
 0x473   : > { %v2822_v32 = vmax.f32 %v2773_v28, %v2783_v11  ;;  %v2785_v60 = vpop.f32.mrb[87].mxu1 }
 0x474   : > { %v2823_v21 = vmax.f32 %v2775_v4, %v2785_v60  ;;  %v2643_v43 = vpop.f32.mrb[88].mxu0 }
 0x475   : > { %v2645_v19 = vpop.f32.mrb[89].mxu0 }
 0x476   : > { %v2647_v17 = vpop.f32.mrb[90].mxu0 }
 0x477   : > { %v2649_v35 = vpop.f32.mrb[91].mxu0 }
 0x478   : > { %v2789_v45 = vpop.f32.mrb[88].mxu1 }
 0x479   : > { %v2791_v62 = vpop.f32.mrb[89].mxu1 }
 0x47a   : > { %v2793_v8 = vpop.f32.mrb[90].mxu1 }
 0x47b   : > { %v2795_v14 = vpop.f32.mrb[91].mxu1 }
 0x47c   : > { %v2653_v10 = vpop.f32.mrb[92].mxu0 }
 0x47d   : > { %v2828_v63 = vmax.f32 %v2643_v43, %v2653_v10  ;;  %v2655_v27 = vpop.f32.mrb[93].mxu0 }
 0x47e   : > { %v2829_v9 = vmax.f32 %v2645_v19, %v2655_v27  ;;  %v2657_v34 = vpop.f32.mrb[94].mxu0 }
 0x47f   : > { %v2844_v53 = vmax.f32 %v2812_v26, %v2828_v63  ;;  %v2836_v41 = vmax.f32 %v2647_v17, %v2657_v34  ;;  %v2659_v55 = vpop.f32.mrb[95].mxu0 }
 0x480   : > { %v2845_v56 = vmax.f32 %v2813_v22, %v2829_v9  ;;  %v2837_v28 = vmax.f32 %v2649_v35, %v2659_v55  ;;  %v2799_v2 = vpop.f32.mrb[92].mxu1 }
 0x481   : > { %v2872_v4 = vadd.f32 %v9428_v47, %v2844_v53  ;;  %v2852_v11 = vmax.f32 %v2820_v23, %v2836_v41  ;;  %v2830_v60 = vmax.f32 %v2789_v45, %v2799_v2  ;;  %v2801_v50 = vpop.f32.mrb[93].mxu1 }
 0x482   : > { %v2873_v6 = vadd.f32 %v9428_v47, %v2845_v56  ;;  %v2853_v30 = vmax.f32 %v2821_v46, %v2837_v28  ;;  %v2831_v37 = vmax.f32 %v2791_v62, %v2801_v50  ;;  %v2803_v12 = vpop.f32.mrb[94].mxu1 }
 0x483   : > { %v9605_v43 = vmax.f32 %v2872_v4, 0.0  ;;  %v2846_v19 = vmax.f32 %v2814_v24, %v2830_v60  ;;  %v2838_v10 = vmax.f32 %v2793_v8, %v2803_v12  ;;  %v2805_v26 = vpop.f32.mrb[95].mxu1  ;;  %v7445_v4 = vld [vmem:[%s10696_s5 + $0x100] sm:$0xff]  }
 0x484   : > { %v9607_v17 = vmax.f32 %v2873_v6, 0.0  ;;  %v2847_v22 = vmax.f32 %v2815_v3, %v2831_v37  ;;  %v2839_v35 = vmax.f32 %v2795_v14, %v2805_v26  ;;  %v2880_v3 = vadd.f32 %v9432_v40, %v2852_v11  ;;  %v7446_v11 = vld [vmem:[%s10696_s5 + $0x180] sm:$0xff]  }
 0x485   : > { %v2874_v63 = vadd.f32 %v9428_v47, %v2846_v19  ;;  %v2854_v27 = vmax.f32 %v2822_v32, %v2838_v10  ;;  %v3004_v23 = vrot.slane %v9605_v43, 6  ;;  %v6517_v24 = vrot.slane %v9605_v43, 7  ;;  %v7447_v10 = vld [vmem:[%s10696_s5 + $0x148] sm:$0xff]  }
 0x486   : > { %v2875_v45 = vadd.f32 %v9428_v47, %v2847_v22  ;;  %v2855_v9 = vmax.f32 %v2823_v21, %v2839_v35  ;;  %v3005_v50 = vrot.slane %v9607_v17, 6  ;;  %v6518_v12 = vrot.slane %v9607_v17, 7 }
 0x487   : > { %v9613_v46 = vmax.f32 %v2874_v63, 0.0  ;;  %v3270_v37 = vsel %vm3269_vm11, %v9485_v31, %v3004_v23  ;;  %v2881_v31 = vadd.f32 %v9432_v40, %v2853_v30  ;;  %v3275_v41 = vsel %vm3269_vm11, %v9495_v18, %v9607_v17 }
 0x488   : > { %v9620_v6 = vmax.f32 %v2875_v45, 0.0  ;;  %v3271_v47 = vsel %vm3269_vm11, %v9492_v5, %v3005_v50  ;;  %v3273_v32 = vsel %vm3269_vm11, %v9481_v42, %v6518_v12  ;;  %v3272_v5 = vsel %vm3269_vm11, %v9478_v13, %v6517_v24  ;;  %v7448_v45 = vld [vmem:[%s10696_s5 + $0x1c8] sm:$0xff]  }
 0x489   : > { %v3034_v21 = vrot.slane %v9613_v46, 5  ;;  %v6541_v62 = vrot.slane %v9613_v46, 6  ;;  %v6522_v18 = vrot.slane %v9607_v17, 9  ;;  %v6543_v26 = vrot.slane %v9613_v46, 7 }
 0x48a   : > { %v3035_v8 = vrot.slane %v9620_v6, 5  ;;  %v6542_v14 = vrot.slane %v9620_v6, 6  ;;  %v6544_v42 = vrot.slane %v9620_v6, 7  ;;  %v3274_v22 = vsel %vm3269_vm11, %v9488_v1, %v9605_v43 }
 0x48b   : > { %v3303_v34 = vsel %vm3302_vm12, %v3270_v37, %v3034_v21  ;;  %v3305_v53 = vsel %vm3302_vm12, %v3272_v5, %v6541_v62  ;;  %v6521_v35 = vrot.slane %v9605_v43, 9  ;;  %v3277_v63 = vsel %vm3269_vm11, %v9498_v61, %v6522_v18  ;;  %v7449_v5 = vld [vmem:[%s10696_s5 + $0x108] sm:$0xff]   ;;  %v7456_v18 = vld [vmem:[%s10696_s5 + $0x1d8] sm:$0xff]  }
 0x48c   : > { %v3304_v30 = vsel %vm3302_vm12, %v3271_v47, %v3035_v8  ;;  %v3306_v55 = vsel %vm3302_vm12, %v3273_v32, %v6542_v14  ;;  %v3335_v56 = vpack.c.bf16 %v3303_v34, %v3303_v34  ;;  %v3337_v28 = vpack.c.bf16 %v3305_v53, %v3305_v53  ;;  %v7450_v34 = vld [vmem:[%s10696_s5 + $0x188] sm:$0xff]  }
 0x48d   : > { %v3336_v2 = vpack.c.bf16 %v3304_v30, %v3304_v30  ;;  %v3338_v13 = vpack.c.bf16 %v3306_v55, %v3306_v55  ;;  %v3308_v60 = vsel %vm3302_vm12, %v3275_v41, %v6544_v42  ;;  %v6524_v12 = vrot.slane %v9607_v17, 10  ;;  %v7452_v42 = vld [vmem:[%s10696_s5 + $0x1d0] sm:$0xff]  }
 0x48e   : > { %v3340_v19 = vpack.c.bf16 %v3308_v60, %v3308_v60  ;;  %v6548_v37 = vrot.slane %v9620_v6, 9  ;;  %v6526_v47 = vrot.slane %v9607_v17, 11  ;;  %v3310_v1 = vsel %vm3302_vm12, %v3277_v63, %v9620_v6  ;;  %v7455_v60 = vld [vmem:[%s10696_s5 + $0x158] sm:$0xff]  }
 0x48f   : > { %5454 = vmatprep.mubr.bf16.mxu0 %v3336_v2  ;;  %5494 = vmatprep.mubr.bf16.mxu1 %v3338_v13  ;;  %v9674_v24 = vsel %vm3302_vm12, %v3274_v22, %v6543_v26  ;;  %v3276_v61 = vsel %vm3269_vm11, %v9501_v7, %v6521_v35  ;;  %v3185_v32 = vrot.slane %v3035_v8, 5  ;;  %v2883_v62 = vadd.f32 %v9432_v40, %v2855_v9  ;;  %v7451_v9 = vld [vmem:[%s10696_s5 + $0x150] sm:$0xff]  }
 0x490   : > { %5455 = vmatmul.mubr.bf16.vlgmr.msra.gmra.mrb[96].mxu0 %v3335_v56  ;;  %5495 = vmatmul.mubr.bf16.vlgmr.msra.gmra.mrb[96].mxu1 %v3337_v28  ;;  %v3342_v14 = vpack.c.bf16 %v3310_v1, %v3310_v1  ;;  %v9687_v53 = vsel %vm3302_vm12, %v3276_v61, %v9613_v46  ;;  %v6523_v7 = vrot.slane %v9605_v43, 10  ;;  %v2882_v8 = vadd.f32 %v9432_v40, %v2854_v27 }
 0x491   : > { %6889 = vmatpush3.bf16.msra.mxu0 %v7445_v4  ;;  %6911 = vmatpush3.bf16.msra.mxu1 %v7446_v11  ;;  %v3279_v41 = vsel %vm3269_vm11, %v9504_v20, %v6524_v12  ;;  %v3281_v30 = vsel %vm3269_vm11, %v9507_v51, %v6526_v47  ;;  %v6547_v55 = vrot.slane %v9613_v46, 9  ;;  %v6525_v28 = vrot.slane %v9605_v43, 11 }
 0x492   : > { %5534 = vmatprep.mubr.bf16.mxu0 %v3340_v19  ;;  %6890 = vmatprep.subr.bf16.mxu0 %v7447_v10  ;;  %v9703_v40 = vsel %vm3302_vm12, %v3279_v41, %v6548_v37  ;;  %v9706_v27 = vsel %vm3302_vm12, %v3281_v30, %v3185_v32  ;;  %v3278_v56 = vsel %vm3269_vm11, %v9510_v38, %v6523_v7  ;;  %v9711_v2 = vmax.f32 %v2880_v3, 0.0  ;;  %v7453_v38 = vld [vmem:[%s10696_s5 + $0x110] sm:$0xff]   ;;  %v7460_v37 = vld [vmem:[%s10696_s5 + $0x1e0] sm:$0xff]   ;;  %v7463_v41 = vld [vmem:[%s10696_s5 + $0x168] sm:$0xff]  }
 0x493   : > { %5574 = vmatprep.mubr.bf16.mxu1 %v3342_v14  ;;  %6912 = vmatprep.subr.bf16.mxu1 %v7448_v45  ;;  %v9713_v20 = vmax.f32 %v2881_v31, 0.0  ;;  %v9716_v51 = vsel %vm3302_vm12, %v3278_v56, %v6547_v55  ;;  %v3184_v13 = vrot.slane %v3034_v21, 5  ;;  %v9720_v4 = vmax.f32 %v2883_v62, 0.0  ;;  %v7454_v3 = vld [vmem:[%s10696_s5 + $0x190] sm:$0xff]   ;;  %v7461_v7 = vld [vmem:[%s10696_s5 + $0x120] sm:$0xff]   ;;  %v7464_v30 = vld [vmem:[%s10696_s5 + $0x1e8] sm:$0xff]  }
 0x494   : > { %v3280_v31 = vsel %vm3269_vm11, %v9513_v39, %v6525_v28  ;;  %v3127_v11 = vrot.slane %v3005_v50, 6  ;;  %v6550_v21 = vrot.slane %v9620_v6, 11  ;;  %v6528_v39 = vrot.slane %v9607_v17, 13 }
 0x495   : > { %6891 = vmatpush3.bf16.msra.mxu0 %v7449_v5  ;;  %6913 = vmatpush3.bf16.msra.mxu1 %v7450_v34  ;;  %v9740_v19 = vsel %vm3302_vm12, %v3280_v31, %v3184_v13  ;;  %v6552_v10 = vrot.slane %v9620_v6, 12  ;;  %v3126_v50 = vrot.slane %v3004_v23, 6  ;;  %v9746_v26 = vmax.f32 %v2882_v8, 0.0 }
 0x496   : > { %6892 = vmatprep.subr.bf16.mxu0 %v7451_v9  ;;  %6914 = vmatprep.subr.bf16.mxu1 %v7452_v42  ;;  %v3283_v22 = vsel %vm3269_vm11, %v9516_v52, %v3127_v11  ;;  %v6549_v35 = vrot.slane %v9613_v46, 11  ;;  %v6527_v63 = vrot.slane %v9605_v43, 13  ;;  %v3285_v17 = vsel %vm3269_vm11, %v9519_v29, %v6528_v39  ;;  %v7457_v52 = vld [vmem:[%s10696_s5 + $0x118] sm:$0xff]   ;;  %v7468_v39 = vld [vmem:[%s10696_s5 + $0x1f0] sm:$0xff]  }
 0x497   : > { %v9753_v45 = vsel %vm3302_vm12, %v3283_v22, %v6550_v21  ;;  %v3282_v6 = vsel %vm3269_vm11, %v9525_v49, %v3126_v50  ;;  %v6551_v23 = vrot.slane %v9613_v46, 12  ;;  %v7458_v43 = vld [vmem:[%s10696_s5 + $0x198] sm:$0xff]   ;;  %v9767_v12 = vsel %vm3302_vm12, %v3285_v17, %v6552_v10  ;;  %v7459_v46 = vld [vmem:[%s10696_s5 + $0x160] sm:$0xff]  }
 0x498   : > { %v9770_v29 = vsel %vm3302_vm12, %v3282_v6, %v6549_v35  ;;  %v3021_v49 = vrot.slane %v9713_v20, 6  ;;  %v3284_v47 = vsel %vm3269_vm11, %v9528_v58, %v6527_v63  ;;  %v3051_v1 = vrot.slane %v9720_v4, 5 }
 0x499   : > { %6893 = vmatpush3.bf16.msra.mxu0 %v7453_v38  ;;  %6915 = vmatpush3.bf16.msra.mxu1 %v7454_v3  ;;  %v9783_v61 = vsel %vm3302_vm12, %v3284_v47, %v6551_v23  ;;  %v6530_v62 = vrot.slane %v9713_v20, 7  ;;  %v6554_v14 = vrot.slane %v9720_v4, 6  ;;  %v3020_v34 = vrot.slane %v9711_v2, 6  ;;  %v7472_v47 = vld [vmem:[%s10696_s5 + $0x1f8] sm:$0xff]  }
 0x49a   : > { %6894 = vmatprep.subr.bf16.mxu0 %v7455_v60  ;;  %6916 = vmatprep.subr.bf16.mxu1 %v7456_v18  ;;  %v3287_v32 = vsel %vm3269_vm11, %v9537_v0, %v3021_v49  ;;  %v3050_v58 = vrot.slane %v9746_v26, 5  ;;  %v7462_v0 = vld [vmem:[%s10696_s5 + $0x1a0] sm:$0xff]   ;;  %v6529_v9 = vrot.slane %v9711_v2, 7  ;;  %v6553_v42 = vrot.slane %v9746_v26, 6  ;;  %v7467_v18 = vld [vmem:[%s10696_s5 + $0x170] sm:$0xff]  }
 0x49b   : > { %v9792_v5 = vsel %vm3302_vm12, %v3287_v32, %v3051_v1  ;;  %v3289_v8 = vsel %vm3269_vm11, %v9522_v48, %v6530_v62  ;;  %v3286_v48 = vsel %vm3269_vm11, %v9542_v44, %v3020_v34  ;;  %v6556_v56 = vrot.slane %v9720_v4, 7 }
 0x49c   : > { %v9813_v55 = vsel %vm3302_vm12, %v3289_v8, %v6554_v14  ;;  %v3291_v28 = vsel %vm3269_vm11, %v9548_v15, %v9713_v20  ;;  %v9824_v13 = vsel %vm3302_vm12, %v3286_v48, %v3050_v58  ;;  %v3288_v38 = vsel %vm3269_vm11, %v9533_v36, %v6529_v9  ;;  %v7465_v15 = vld [vmem:[%s10696_s5 + $0x128] sm:$0xff]  }
 0x49d   : > { %6895 = vmatpush3.bf16.msra.mxu0 %v7457_v52  ;;  %6917 = vmatpush3.bf16.msra.mxu1 %v7458_v43  ;;  %v6534_v3 = vrot.slane %v9713_v20, 9  ;;  %v9830_v31 = vsel %vm3302_vm12, %v3288_v38, %v6553_v42  ;;  %v9833_v11 = vsel %vm3302_vm12, %v3291_v28, %v6556_v56  ;;  %v6555_v44 = vrot.slane %v9746_v26, 7  ;;  %v7466_v36 = vld [vmem:[%s10696_s5 + $0x1a8] sm:$0xff]   ;;  %v7469_v52 = vld [vmem:[%s10696_s5 + $0x130] sm:$0xff]   ;;  %v7476_v28 = vld [vmem:[%s10696_s5 + $0x2c0] sm:$0xff]  }
 0x49e   : > { %6896 = vmatprep.subr.bf16.mxu0 %v7459_v46  ;;  %6918 = vmatprep.subr.bf16.mxu1 %v7460_v37  ;;  %v6533_v60 = vrot.slane %v9711_v2, 9  ;;  %v6536_v50 = vrot.slane %v9713_v20, 10  ;;  %v6560_v22 = vrot.slane %v9720_v4, 9  ;;  %v6538_v17 = vrot.slane %v9713_v20, 11  ;;  %v10710_v8 = vld [vmem:[#allocation5_spill] sm:$0xff] }
 0x49f   : > { %v3293_v21 = vsel %vm3269_vm11, %v9553_v25, %v6534_v3  ;;  %v3290_v25 = vsel %vm3269_vm11, %v9558_v54, %v9711_v2  ;;  %v3199_v54 = vrot.slane %v3051_v1, 5  ;;  %v6535_v37 = vrot.slane %v9711_v2, 10  ;;  %v10712_v3 = vld [vmem:[#allocation7_spill] sm:$0xff] }
 0x4a0   : > { %v9853_v10 = vsel %vm3302_vm12, %v3293_v21, %v9720_v4  ;;  %v9861_v35 = vsel %vm3302_vm12, %v3290_v25, %v6555_v44  ;;  %v3292_v63 = vsel %vm3269_vm11, %v9564_v59, %v6533_v60  ;;  %v3295_v23 = vsel %vm3269_vm11, %v9569_v33, %v6536_v50  ;;  %v7470_v59 = vld [vmem:[%s10696_s5 + $0x1b0] sm:$0xff]   ;;  %v7471_v33 = vld [vmem:[%s10696_s5 + $0x178] sm:$0xff]   ;;  %v10713_v60 = vld [vmem:[#allocation8_spill] sm:$0xff] }
 0x4a1   : > { %6897 = vmatpush3.bf16.msra.mxu0 %v7461_v7  ;;  %6919 = vmatpush3.bf16.msra.mxu1 %v7462_v0  ;;  %v9868_v6 = vsel %vm3302_vm12, %v3292_v63, %v9746_v26  ;;  %v9879_v43 = vsel %vm3302_vm12, %v3295_v23, %v6560_v22  ;;  %v3297_v46 = vsel %vm3269_vm11, %v9572_v16, %v6538_v17  ;;  %v6559_v32 = vrot.slane %v9746_v26, 9  ;;  %v7477_v25 = vld [vmem:[%s10696_s5 + $0x200] sm:$0xff]   ;;  %v10714_v50 = vld [vmem:[#allocation9_spill] sm:$0xff] }
 0x4a2   : > { %6898 = vmatprep.subr.bf16.mxu0 %v7463_v41  ;;  %6920 = vmatprep.subr.bf16.mxu1 %v7464_v30  ;;  %v9891_v1 = vsel %vm3302_vm12, %v3297_v46, %v3199_v54  ;;  %v6537_v62 = vrot.slane %v9711_v2, 11  ;;  %v3294_v16 = vsel %vm3269_vm11, %v9576_v57, %v6535_v37  ;;  %v3198_v14 = vrot.slane %v3050_v58, 5  ;;  %v7473_v57 = vld [vmem:[%s10696_s5 + $0x138] sm:$0xff]   ;;  %v10711_v30 = vld [vmem:[#allocation6_spill] sm:$0xff]  ;;  %v7479_v54 = vld [vmem:[%s10696_s5 + $0x248] sm:$0xff]  }
 0x4a3   : > { %v3141_v7 = vrot.slane %v3021_v49, 6  ;;  %v9900_v0 = vsel %vm3302_vm12, %v3294_v16, %v6559_v32  ;;  %v6562_v42 = vrot.slane %v9720_v4, 11  ;;  %v6540_v41 = vrot.slane %v9713_v20, 13  ;;  %v7474_v49 = vld [vmem:[%s10696_s5 + $0x1b8] sm:$0xff]   ;;  %v7475_v20 = vld [vmem:[%s10696_s5 + $0x240] sm:$0xff]   ;;  %v7485_v46 = vld [vmem:[%s10696_s5 + $0x210] sm:$0xff]  }
 0x4a4   : > { %v3296_v9 = vsel %vm3269_vm11, %v10710_v8, %v6537_v62  ;;  %v6564_v56 = vrot.slane %v9720_v4, 12  ;;  %v6539_v21 = vrot.slane %v9711_v2, 13  ;;  %v3339_v2 = vpack.c.bf16 %v9674_v24, %v9674_v24  ;;  %v7480_v24 = vld [vmem:[%s10696_s5 + $0x2c8] sm:$0xff]   ;;  %v7486_v37 = vld [vmem:[%s10696_s5 + $0x290] sm:$0xff]   ;;  %v7489_v32 = vld [vmem:[%s10696_s5 + $0x218] sm:$0xff]  }
 0x4a5   : > { %6899 = vmatpush3.bf16.msra.mxu0 %v7465_v15  ;;  %6921 = vmatpush3.bf16.msra.mxu1 %v7466_v36  ;;  %v9913_v58 = vsel %vm3302_vm12, %v3296_v9, %v3198_v14  ;;  %v3299_v48 = vsel %vm3269_vm11, %v10711_v30, %v3141_v7  ;;  %v3301_v44 = vsel %vm3269_vm11, %v10712_v3, %v6540_v41  ;;  %v3140_v15 = vrot.slane %v3020_v34, 6  ;;  %v7490_v62 = vld [vmem:[%s10696_s5 + $0x298] sm:$0xff]   ;;  %v7491_v16 = vld [vmem:[%s10696_s5 + $0x260] sm:$0xff]   ;;  %v7495_v9 = vld [vmem:[%s10696_s5 + $0x268] sm:$0xff]  }
 0x4a6   : > { %6900 = vmatprep.subr.bf16.mxu0 %v7467_v18  ;;  %6922 = vmatprep.subr.bf16.mxu1 %v7468_v39  ;;  %v9925_v38 = vsel %vm3302_vm12, %v3299_v48, %v6562_v42  ;;  %v9932_v4 = vsel %vm3302_vm12, %v3301_v44, %v6564_v56  ;;  %v6561_v36 = vrot.slane %v9746_v26, 11  ;;  %v6563_v39 = vrot.slane %v9746_v26, 12  ;;  %v7478_v26 = vld [vmem:[%s10696_s5 + $0x280] sm:$0xff]   ;;  %v7496_v42 = vld [vmem:[%s10696_s5 + $0x2e8] sm:$0xff]   ;;  %v7500_v30 = vld [vmem:[%s10696_s5 + $0x2f0] sm:$0xff]  }
 0x4a7   : > { %v3298_v18 = vsel %vm3269_vm11, %v10713_v60, %v3140_v15  ;;  %v3300_v22 = vsel %vm3269_vm11, %v10714_v50, %v6539_v21  ;;  %v3341_v63 = vpack.c.bf16 %v9687_v53, %v9687_v53  ;;  %v3344_v23 = vpack.c.bf16 %v9703_v40, %v9703_v40  ;;  %v7482_v40 = vld [vmem:[%s10696_s5 + $0x288] sm:$0xff]   ;;  %v7492_v14 = vld [vmem:[%s10696_s5 + $0x2e0] sm:$0xff]   ;;  %v7501_v48 = vld [vmem:[%s10696_s5 + $0x230] sm:$0xff]  }
 0x4a8   : > { %v9943_v34 = vsel %vm3302_vm12, %v3298_v18, %v6561_v36  ;;  %v9955_v17 = vsel %vm3302_vm12, %v3300_v22, %v6563_v39  ;;  %v3346_v53 = vpack.c.bf16 %v9706_v27, %v9706_v27  ;;  %v7484_v27 = vld [vmem:[%s10696_s5 + $0x2d0] sm:$0xff]   ;;  %v7493_v7 = vld [vmem:[%s10696_s5 + $0x220] sm:$0xff]   ;;  %v7497_v41 = vld [vmem:[%s10696_s5 + $0x228] sm:$0xff]   ;;  %v3343_v60 = vpack.c.bf16 %v9716_v51, %v9716_v51 }
 0x4a9   : > { %6901 = vmatpush3.bf16.msra.mxu0 %v7469_v52  ;;  %6923 = vmatpush3.bf16.msra.mxu1 %v7470_v59  ;;  %v7481_v52 = vld [vmem:[%s10696_s5 + $0x208] sm:$0xff]   ;;  %v7483_v59 = vld [vmem:[%s10696_s5 + $0x250] sm:$0xff]   ;;  %v7494_v8 = vld [vmem:[%s10696_s5 + $0x2a0] sm:$0xff]   ;;  %v3345_v39 = vpack.c.bf16 %v9740_v19, %v9740_v19  ;;  %v3348_v50 = vpack.c.bf16 %v9753_v45, %v9753_v45  ;;  %v3350_v22 = vpack.c.bf16 %v9767_v12, %v9767_v12 }
 0x4aa   : > { %6902 = vmatprep.subr.bf16.mxu0 %v7471_v33  ;;  %6924 = vmatprep.subr.bf16.mxu1 %v7472_v47  ;;  %v7487_v33 = vld [vmem:[%s10696_s5 + $0x258] sm:$0xff]   ;;  %v7502_v56 = vld [vmem:[%s10696_s5 + $0x2b0] sm:$0xff]   ;;  %v7507_v15 = vld [vmem:[%s10696_s5 + $0x340] sm:$0xff]  }
 0x4ab   : > { %v7488_v47 = vld [vmem:[%s10696_s5 + $0x2d8] sm:$0xff]   ;;  %v7508_v36 = vld [vmem:[%s10696_s5 + $0x3c0] sm:$0xff]   ;;  %v7512_v51 = vld [vmem:[%s10696_s5 + $0x3c8] sm:$0xff]  }
 0x4ac   : > { %v7505_v3 = vld [vmem:[%s10696_s5 + $0x238] sm:$0xff]   ;;  %v7509_v21 = vld [vmem:[%s10696_s5 + $0x300] sm:$0xff]   ;;  %v7513_v19 = vld [vmem:[%s10696_s5 + $0x308] sm:$0xff]  }
 0x4ad   : > { %6903 = vmatpush3.bf16.msra.mxu0 %v7473_v57  ;;  %6925 = vmatpush3.bf16.msra.mxu1 %v7474_v49  ;;  %v7498_v57 = vld [vmem:[%s10696_s5 + $0x2a8] sm:$0xff]   ;;  %v7499_v49 = vld [vmem:[%s10696_s5 + $0x270] sm:$0xff]   ;;  %v7506_v44 = vld [vmem:[%s10696_s5 + $0x2b8] sm:$0xff]  }
 0x4ae   : > { %6932 = vmatprep.subr.bf16.mxu0 %v7475_v20  ;;  %6954 = vmatprep.subr.bf16.mxu1 %v7476_v28  ;;  %v7503_v20 = vld [vmem:[%s10696_s5 + $0x278] sm:$0xff]   ;;  %v7510_v18 = vld [vmem:[%s10696_s5 + $0x380] sm:$0xff]   ;;  %v7515_v45 = vld [vmem:[%s10696_s5 + $0x350] sm:$0xff]  }
 0x4af   : > { %v7504_v28 = vld [vmem:[%s10696_s5 + $0x2f8] sm:$0xff]   ;;  %v7516_v12 = vld [vmem:[%s10696_s5 + $0x3d0] sm:$0xff]  }
 0x4b0   : > { %5535 = vmatmul.mubr.bf16.vlgmr.msra.gmra.mrb[100].mxu0 %v3339_v2  ;;  %5575 = vmatmul.mubr.bf16.vlgmr.msra.gmra.mrb[100].mxu1 %v3341_v63  ;;  %v7514_v2 = vld [vmem:[%s10696_s5 + $0x388] sm:$0xff]   ;;  %v7517_v63 = vld [vmem:[%s10696_s5 + $0x310] sm:$0xff]  }
 0x4b1   : > { %6933 = vmatpush3.bf16.msra.mxu0 %v7477_v25  ;;  %5614 = vmatprep.mubr.bf16.mxu0 %v3344_v23  ;;  %v7511_v25 = vld [vmem:[%s10696_s5 + $0x348] sm:$0xff]   ;;  %v7519_v23 = vld [vmem:[%s10696_s5 + $0x358] sm:$0xff]  }
 0x4b2   : > { %6955 = vmatpush3.bf16.msra.mxu1 %v7478_v26  ;;  %5654 = vmatprep.mubr.bf16.mxu1 %v3346_v53  ;;  %v7518_v26 = vld [vmem:[%s10696_s5 + $0x390] sm:$0xff]   ;;  %v7522_v53 = vld [vmem:[%s10696_s5 + $0x398] sm:$0xff]  }
 0x4b3   : > { %6934 = vmatprep.subr.bf16.mxu0 %v7479_v54  ;;  %6956 = vmatprep.subr.bf16.mxu1 %v7480_v24  ;;  %v7520_v54 = vld [vmem:[%s10696_s5 + $0x3d8] sm:$0xff]  }
 0x4b4   : > { %v7521_v24 = vld [vmem:[%s10696_s5 + $0x318] sm:$0xff]  }
 0x4b5   : > { %6935 = vmatpush3.bf16.msra.mxu0 %v7481_v52  ;;  %v7523_v52 = vld [vmem:[%s10696_s5 + $0x360] sm:$0xff]  }
 0x4b6   : > { %6957 = vmatpush3.bf16.msra.mxu1 %v7482_v40  ;;  %6936 = vmatprep.subr.bf16.mxu0 %v7483_v59  ;;  %v7524_v40 = vld [vmem:[%s10696_s5 + $0x3e0] sm:$0xff]  }
 0x4b7   : > { %6958 = vmatprep.subr.bf16.mxu1 %v7484_v27  ;;  %v7525_v59 = vld [vmem:[%s10696_s5 + $0x320] sm:$0xff]  }
 0x4b8   : > { %v7526_v27 = vld [vmem:[%s10696_s5 + $0x3a0] sm:$0xff]  }
 0x4b9   : > { %6937 = vmatpush3.bf16.msra.mxu0 %v7485_v46  ;;  %v7527_v46 = vld [vmem:[%s10696_s5 + $0x368] sm:$0xff]  }
 0x4ba   : > { %6959 = vmatpush3.bf16.msra.mxu1 %v7486_v37  ;;  %6938 = vmatprep.subr.bf16.mxu0 %v7487_v33  ;;  %v7528_v37 = vld [vmem:[%s10696_s5 + $0x3e8] sm:$0xff]  }
 0x4bb   : > { %6960 = vmatprep.subr.bf16.mxu1 %v7488_v47  ;;  %v7529_v33 = vld [vmem:[%s10696_s5 + $0x328] sm:$0xff]  }
 0x4bc   : > { %v7530_v47 = vld [vmem:[%s10696_s5 + $0x3a8] sm:$0xff]  }
 0x4bd   : > { %6939 = vmatpush3.bf16.msra.mxu0 %v7489_v32  ;;  %v7531_v32 = vld [vmem:[%s10696_s5 + $0x370] sm:$0xff]  }
 0x4be   : > { %6961 = vmatpush3.bf16.msra.mxu1 %v7490_v62  ;;  %6940 = vmatprep.subr.bf16.mxu0 %v7491_v16  ;;  %v7532_v62 = vld [vmem:[%s10696_s5 + $0x3f0] sm:$0xff]  }
 0x4bf   : > { %6962 = vmatprep.subr.bf16.mxu1 %v7492_v14  ;;  %v7533_v16 = vld [vmem:[%s10696_s5 + $0x330] sm:$0xff]  }
 0x4c0   : > { %v7534_v14 = vld [vmem:[%s10696_s5 + $0x3b0] sm:$0xff]  }
 0x4c1   : > { %6941 = vmatpush3.bf16.msra.mxu0 %v7493_v7  ;;  %v7535_v7 = vld [vmem:[%s10696_s5 + $0x378] sm:$0xff]  }
 0x4c2   : > { %6963 = vmatpush3.bf16.msra.mxu1 %v7494_v8  ;;  %6942 = vmatprep.subr.bf16.mxu0 %v7495_v9  ;;  %v7536_v8 = vld [vmem:[%s10696_s5 + $0x3f8] sm:$0xff]  }
 0x4c3   : > { %6964 = vmatprep.subr.bf16.mxu1 %v7496_v42  ;;  %v7537_v9 = vld [vmem:[%s10696_s5 + $0x338] sm:$0xff]  }
 0x4c4   : > { %v7538_v42 = vld [vmem:[%s10696_s5 + $0x3b8] sm:$0xff]  }
 0x4c5   : > { %6943 = vmatpush3.bf16.msra.mxu0 %v7497_v41  ;;  %v7539_v41 = vld [vmem:[%s10696_s5 + $0x440] sm:$0xff]  }
 0x4c6   : > { %6965 = vmatpush3.bf16.msra.mxu1 %v7498_v57  ;;  %6944 = vmatprep.subr.bf16.mxu0 %v7499_v49  ;;  %v7540_v57 = vld [vmem:[%s10696_s5 + $0x4c0] sm:$0xff]  }
 0x4c7   : > { %6966 = vmatprep.subr.bf16.mxu1 %v7500_v30  ;;  %v7541_v49 = vld [vmem:[%s10696_s5 + $0x400] sm:$0xff]   ;;  %v3347_v30 = vpack.c.bf16 %v9770_v29, %v9770_v29  ;;  %v7544_v29 = vld [vmem:[%s10696_s5 + $0x4c8] sm:$0xff]  }
 0x4c9   : > { %6945 = vmatpush3.bf16.msra.mxu0 %v7501_v48  ;;  %v7542_v48 = vld [vmem:[%s10696_s5 + $0x480] sm:$0xff]  }
 0x4ca   : > { %6967 = vmatpush3.bf16.msra.mxu1 %v7502_v56  ;;  %6946 = vmatprep.subr.bf16.mxu0 %v7503_v20  ;;  %v3349_v56 = vpack.c.bf16 %v9783_v61, %v9783_v61  ;;  %v7543_v20 = vld [vmem:[%s10696_s5 + $0x448] sm:$0xff]  }
 0x4cb   : > { %6968 = vmatprep.subr.bf16.mxu1 %v7504_v28  ;;  %v3352_v28 = vpack.c.bf16 %v9792_v5, %v9792_v5  ;;  %v7545_v61 = vld [vmem:[%s10696_s5 + $0x408] sm:$0xff]   ;;  %v7547_v5 = vld [vmem:[%s10696_s5 + $0x450] sm:$0xff]  }
 0x4cd   : > { %6947 = vmatpush3.bf16.msra.mxu0 %v7505_v3  ;;  %v3354_v3 = vpack.c.bf16 %v9813_v55, %v9813_v55  ;;  %v7548_v55 = vld [vmem:[%s10696_s5 + $0x4d0] sm:$0xff]  }
 0x4ce   : > { %6969 = vmatpush3.bf16.msra.mxu1 %v7506_v44  ;;  %6976 = vmatprep.subr.bf16.mxu0 %v7507_v15  ;;  %v7546_v44 = vld [vmem:[%s10696_s5 + $0x488] sm:$0xff]   ;;  %v7549_v15 = vld [vmem:[%s10696_s5 + $0x410] sm:$0xff]  }
 0x4cf   : > { %6998 = vmatprep.subr.bf16.mxu1 %v7508_v36  ;;  %v7550_v36 = vld [vmem:[%s10696_s5 + $0x490] sm:$0xff]  }
 0x4d0   : > { %5615 = vmatmul.mubr.bf16.vlgmr.msra.gmra.mrb[104].mxu0 %v3343_v60  ;;  %v7552_v60 = vld [vmem:[%s10696_s5 + $0x4d8] sm:$0xff]  }
 0x4d1   : > { %5655 = vmatmul.mubr.bf16.vlgmr.msra.gmra.mrb[104].mxu1 %v3345_v39  ;;  %6977 = vmatpush3.bf16.msra.mxu0 %v7509_v21  ;;  %v7551_v21 = vld [vmem:[%s10696_s5 + $0x458] sm:$0xff]  }
 0x4d2   : > { %5694 = vmatprep.mubr.bf16.mxu0 %v3348_v50  ;;  %6999 = vmatpush3.bf16.msra.mxu1 %v7510_v18  ;;  %v7553_v18 = vld [vmem:[%s10696_s5 + $0x418] sm:$0xff]   ;;  %v7556_v50 = vld [vmem:[%s10696_s5 + $0x4e0] sm:$0xff]  }
 0x4d3   : > { %5734 = vmatprep.mubr.bf16.mxu1 %v3350_v22  ;;  %6978 = vmatprep.subr.bf16.mxu0 %v7511_v25  ;;  %v7554_v39 = vld [vmem:[%s10696_s5 + $0x498] sm:$0xff]   ;;  %v7555_v25 = vld [vmem:[%s10696_s5 + $0x460] sm:$0xff]  }
 0x4d4   : > { %7000 = vmatprep.subr.bf16.mxu1 %v7512_v51  ;;  %v7557_v51 = vld [vmem:[%s10696_s5 + $0x420] sm:$0xff]  }
 0x4d5   : > { %6979 = vmatpush3.bf16.msra.mxu0 %v7513_v19  ;;  %v7558_v22 = vld [vmem:[%s10696_s5 + $0x4a0] sm:$0xff]   ;;  %v7559_v19 = vld [vmem:[%s10696_s5 + $0x468] sm:$0xff]  }
 0x4d6   : > { %7001 = vmatpush3.bf16.msra.mxu1 %v7514_v2  ;;  %6980 = vmatprep.subr.bf16.mxu0 %v7515_v45  ;;  %v7560_v2 = vld [vmem:[%s10696_s5 + $0x4e8] sm:$0xff]  }
 0x4d7   : > { %7002 = vmatprep.subr.bf16.mxu1 %v7516_v12  ;;  %v7561_v45 = vld [vmem:[%s10696_s5 + $0x428] sm:$0xff]  }
 0x4d8   : > { %v7562_v12 = vld [vmem:[%s10696_s5 + $0x4a8] sm:$0xff]  }
 0x4d9   : > { %6981 = vmatpush3.bf16.msra.mxu0 %v7517_v63  ;;  %v7563_v63 = vld [vmem:[%s10696_s5 + $0x470] sm:$0xff]  }
 0x4da   : > { %7003 = vmatpush3.bf16.msra.mxu1 %v7518_v26  ;;  %6982 = vmatprep.subr.bf16.mxu0 %v7519_v23  ;;  %v7564_v26 = vld [vmem:[%s10696_s5 + $0x4f0] sm:$0xff]  }
 0x4db   : > { %7004 = vmatprep.subr.bf16.mxu1 %v7520_v54  ;;  %v7565_v23 = vld [vmem:[%s10696_s5 + $0x430] sm:$0xff]  }
 0x4dc   : > { %v7566_v54 = vld [vmem:[%s10696_s5 + $0x4b0] sm:$0xff]  }
 0x4dd   : > { %6983 = vmatpush3.bf16.msra.mxu0 %v7521_v24  ;;  %v7567_v24 = vld [vmem:[%s10696_s5 + $0x478] sm:$0xff]  }
 0x4de   : > { %7005 = vmatpush3.bf16.msra.mxu1 %v7522_v53  ;;  %6984 = vmatprep.subr.bf16.mxu0 %v7523_v52  ;;  %v7568_v53 = vld [vmem:[%s10696_s5 + $0x4f8] sm:$0xff]  }
 0x4df   : > { %7006 = vmatprep.subr.bf16.mxu1 %v7524_v40  ;;  %v7569_v52 = vld [vmem:[%s10696_s5 + $0x438] sm:$0xff]  }
 0x4e0   : > { %v7570_v40 = vld [vmem:[%s10696_s5 + $0x4b8] sm:$0xff]  }
 0x4e1   : > { %6985 = vmatpush3.bf16.msra.mxu0 %v7525_v59  ;;  %v7571_v59 = vld [vmem:[%s10696_s5 + $0x540] sm:$0xff]  }
 0x4e2   : > { %7007 = vmatpush3.bf16.msra.mxu1 %v7526_v27  ;;  %6986 = vmatprep.subr.bf16.mxu0 %v7527_v46  ;;  %v7572_v27 = vld [vmem:[%s10696_s5 + $0x5c0] sm:$0xff]  }
 0x4e3   : > { %7008 = vmatprep.subr.bf16.mxu1 %v7528_v37  ;;  %v7573_v46 = vld [vmem:[%s10696_s5 + $0x500] sm:$0xff]   ;;  %v3351_v37 = vpack.c.bf16 %v9824_v13, %v9824_v13  ;;  %v7576_v13 = vld [vmem:[%s10696_s5 + $0x5c8] sm:$0xff]  }
 0x4e5   : > { %6987 = vmatpush3.bf16.msra.mxu0 %v7529_v33  ;;  %v7574_v33 = vld [vmem:[%s10696_s5 + $0x580] sm:$0xff]  }
 0x4e6   : > { %7009 = vmatpush3.bf16.msra.mxu1 %v7530_v47  ;;  %6988 = vmatprep.subr.bf16.mxu0 %v7531_v32  ;;  %v3353_v47 = vpack.c.bf16 %v9830_v31, %v9830_v31  ;;  %v7575_v32 = vld [vmem:[%s10696_s5 + $0x548] sm:$0xff]  }
 0x4e7   : > { %7010 = vmatprep.subr.bf16.mxu1 %v7532_v62  ;;  %v3356_v62 = vpack.c.bf16 %v9833_v11, %v9833_v11  ;;  %v7577_v31 = vld [vmem:[%s10696_s5 + $0x508] sm:$0xff]   ;;  %v7579_v11 = vld [vmem:[%s10696_s5 + $0x550] sm:$0xff]  }
 0x4e9   : > { %6989 = vmatpush3.bf16.msra.mxu0 %v7533_v16  ;;  %v3358_v16 = vpack.c.bf16 %v9853_v10, %v9853_v10  ;;  %v7580_v10 = vld [vmem:[%s10696_s5 + $0x5d0] sm:$0xff]  }
 0x4ea   : > { %7011 = vmatpush3.bf16.msra.mxu1 %v7534_v14  ;;  %6990 = vmatprep.subr.bf16.mxu0 %v7535_v7  ;;  %v7578_v14 = vld [vmem:[%s10696_s5 + $0x588] sm:$0xff]   ;;  %v7581_v7 = vld [vmem:[%s10696_s5 + $0x510] sm:$0xff]  }
 0x4eb   : > { %7012 = vmatprep.subr.bf16.mxu1 %v7536_v8  ;;  %v7582_v8 = vld [vmem:[%s10696_s5 + $0x590] sm:$0xff]  }
 0x4ed   : > { %6991 = vmatpush3.bf16.msra.mxu0 %v7537_v9  ;;  %v7583_v9 = vld [vmem:[%s10696_s5 + $0x558] sm:$0xff]  }
 0x4ee   : > { %7013 = vmatpush3.bf16.msra.mxu1 %v7538_v42  ;;  %7020 = vmatprep.subr.bf16.mxu0 %v7539_v41  ;;  %v7584_v42 = vld [vmem:[%s10696_s5 + $0x5d8] sm:$0xff]  }
 0x4ef   : > { %7042 = vmatprep.subr.bf16.mxu1 %v7540_v57  ;;  %v7585_v41 = vld [vmem:[%s10696_s5 + $0x518] sm:$0xff]  }
 0x4f0   : > { %5695 = vmatmul.mubr.bf16.vlgmr.msra.gmra.mrb[108].mxu0 %v3347_v30  ;;  %v7586_v57 = vld [vmem:[%s10696_s5 + $0x598] sm:$0xff]   ;;  %v7588_v30 = vld [vmem:[%s10696_s5 + $0x5e0] sm:$0xff]  }
 0x4f1   : > { %5735 = vmatmul.mubr.bf16.vlgmr.msra.gmra.mrb[108].mxu1 %v3349_v56  ;;  %7021 = vmatpush3.bf16.msra.mxu0 %v7541_v49  ;;  %v7587_v49 = vld [vmem:[%s10696_s5 + $0x560] sm:$0xff]  }
 0x4f2   : > { %5774 = vmatprep.mubr.bf16.mxu0 %v3352_v28  ;;  %7043 = vmatpush3.bf16.msra.mxu1 %v7542_v48  ;;  %v7589_v48 = vld [vmem:[%s10696_s5 + $0x520] sm:$0xff]   ;;  %v7592_v28 = vld [vmem:[%s10696_s5 + $0x5e8] sm:$0xff]  }
 0x4f3   : > { %5814 = vmatprep.mubr.bf16.mxu1 %v3354_v3  ;;  %7022 = vmatprep.subr.bf16.mxu0 %v7543_v20  ;;  %v7590_v56 = vld [vmem:[%s10696_s5 + $0x5a0] sm:$0xff]   ;;  %v7591_v20 = vld [vmem:[%s10696_s5 + $0x568] sm:$0xff]  }
 0x4f4   : > { %7044 = vmatprep.subr.bf16.mxu1 %v7544_v29  ;;  %v7593_v29 = vld [vmem:[%s10696_s5 + $0x528] sm:$0xff]  }
 0x4f5   : > { %7023 = vmatpush3.bf16.msra.mxu0 %v7545_v61  ;;  %v7594_v3 = vld [vmem:[%s10696_s5 + $0x5a8] sm:$0xff]   ;;  %v7595_v61 = vld [vmem:[%s10696_s5 + $0x570] sm:$0xff]  }
 0x4f6   : > { %7045 = vmatpush3.bf16.msra.mxu1 %v7546_v44  ;;  %7024 = vmatprep.subr.bf16.mxu0 %v7547_v5  ;;  %v7596_v44 = vld [vmem:[%s10696_s5 + $0x5f0] sm:$0xff]  }
 0x4f7   : > { %7046 = vmatprep.subr.bf16.mxu1 %v7548_v55  ;;  %v7597_v5 = vld [vmem:[%s10696_s5 + $0x530] sm:$0xff]  }
 0x4f8   : > { %v7598_v55 = vld [vmem:[%s10696_s5 + $0x5b0] sm:$0xff]  }
 0x4f9   : > { %7025 = vmatpush3.bf16.msra.mxu0 %v7549_v15  ;;  %v7599_v15 = vld [vmem:[%s10696_s5 + $0x578] sm:$0xff]  }
 0x4fa   : > { %7047 = vmatpush3.bf16.msra.mxu1 %v7550_v36  ;;  %7026 = vmatprep.subr.bf16.mxu0 %v7551_v21  ;;  %v7600_v36 = vld [vmem:[%s10696_s5 + $0x5f8] sm:$0xff]  }
 0x4fb   : > { %7048 = vmatprep.subr.bf16.mxu1 %v7552_v60  ;;  %v7601_v21 = vld [vmem:[%s10696_s5 + $0x538] sm:$0xff]  }
 0x4fc   : > { %v7602_v60 = vld [vmem:[%s10696_s5 + $0x5b8] sm:$0xff]  }
 0x4fd   : > { %7027 = vmatpush3.bf16.msra.mxu0 %v7553_v18  ;;  %v7603_v18 = vld [vmem:[%s10696_s5 + $0x640] sm:$0xff]  }
 0x4fe   : > { %7049 = vmatpush3.bf16.msra.mxu1 %v7554_v39  ;;  %7028 = vmatprep.subr.bf16.mxu0 %v7555_v25  ;;  %v7604_v39 = vld [vmem:[%s10696_s5 + $0x6c0] sm:$0xff]  }
 0x4ff   : > { %7050 = vmatprep.subr.bf16.mxu1 %v7556_v50  ;;  %v7605_v25 = vld [vmem:[%s10696_s5 + $0x600] sm:$0xff]   ;;  %v3355_v50 = vpack.c.bf16 %v9861_v35, %v9861_v35  ;;  %v7608_v35 = vld [vmem:[%s10696_s5 + $0x6c8] sm:$0xff]  }
 0x501   : > { %7029 = vmatpush3.bf16.msra.mxu0 %v7557_v51  ;;  %v7606_v51 = vld [vmem:[%s10696_s5 + $0x680] sm:$0xff]  }
 0x502   : > { %7051 = vmatpush3.bf16.msra.mxu1 %v7558_v22  ;;  %7030 = vmatprep.subr.bf16.mxu0 %v7559_v19  ;;  %v3357_v22 = vpack.c.bf16 %v9868_v6, %v9868_v6  ;;  %v7607_v19 = vld [vmem:[%s10696_s5 + $0x648] sm:$0xff]  }
 0x503   : > { %7052 = vmatprep.subr.bf16.mxu1 %v7560_v2  ;;  %v3360_v2 = vpack.c.bf16 %v9879_v43, %v9879_v43  ;;  %v7609_v6 = vld [vmem:[%s10696_s5 + $0x608] sm:$0xff]   ;;  %v7611_v43 = vld [vmem:[%s10696_s5 + $0x650] sm:$0xff]  }
 0x505   : > { %7031 = vmatpush3.bf16.msra.mxu0 %v7561_v45  ;;  %v3362_v45 = vpack.c.bf16 %v9891_v1, %v9891_v1  ;;  %v7612_v1 = vld [vmem:[%s10696_s5 + $0x6d0] sm:$0xff]  }
 0x506   : > { %7053 = vmatpush3.bf16.msra.mxu1 %v7562_v12  ;;  %7032 = vmatprep.subr.bf16.mxu0 %v7563_v63  ;;  %v7610_v12 = vld [vmem:[%s10696_s5 + $0x688] sm:$0xff]   ;;  %v7613_v63 = vld [vmem:[%s10696_s5 + $0x610] sm:$0xff]  }
 0x507   : > { %7054 = vmatprep.subr.bf16.mxu1 %v7564_v26  ;;  %v7614_v26 = vld [vmem:[%s10696_s5 + $0x690] sm:$0xff]  }
 0x509   : > { %7033 = vmatpush3.bf16.msra.mxu0 %v7565_v23  ;;  %v7615_v23 = vld [vmem:[%s10696_s5 + $0x658] sm:$0xff]  }
 0x50a   : > { %7055 = vmatpush3.bf16.msra.mxu1 %v7566_v54  ;;  %7034 = vmatprep.subr.bf16.mxu0 %v7567_v24  ;;  %v7616_v54 = vld [vmem:[%s10696_s5 + $0x6d8] sm:$0xff]  }
 0x50b   : > { %7056 = vmatprep.subr.bf16.mxu1 %v7568_v53  ;;  %v7617_v24 = vld [vmem:[%s10696_s5 + $0x618] sm:$0xff]  }
 0x50c   : > { %v7618_v53 = vld [vmem:[%s10696_s5 + $0x698] sm:$0xff]  }
 0x50d   : > { %7035 = vmatpush3.bf16.msra.mxu0 %v7569_v52  ;;  %v7619_v52 = vld [vmem:[%s10696_s5 + $0x660] sm:$0xff]  }
 0x50e   : > { %7057 = vmatpush3.bf16.msra.mxu1 %v7570_v40  ;;  %7064 = vmatprep.subr.bf16.mxu0 %v7571_v59  ;;  %v7620_v40 = vld [vmem:[%s10696_s5 + $0x6e0] sm:$0xff]  }
 0x50f   : > { %7086 = vmatprep.subr.bf16.mxu1 %v7572_v27  ;;  %v7621_v59 = vld [vmem:[%s10696_s5 + $0x620] sm:$0xff]  }
 0x510   : > { %5775 = vmatmul.mubr.bf16.vlgmr.msra.gmra.mrb[112].mxu0 %v3351_v37  ;;  %v7622_v27 = vld [vmem:[%s10696_s5 + $0x6a0] sm:$0xff]   ;;  %v7624_v37 = vld [vmem:[%s10696_s5 + $0x6e8] sm:$0xff]  }
 0x511   : > { %5815 = vmatmul.mubr.bf16.vlgmr.msra.gmra.mrb[112].mxu1 %v3353_v47  ;;  %7065 = vmatpush3.bf16.msra.mxu0 %v7573_v46  ;;  %v7623_v46 = vld [vmem:[%s10696_s5 + $0x668] sm:$0xff]  }
 0x512   : > { %5854 = vmatprep.mubr.bf16.mxu0 %v3356_v62  ;;  %7087 = vmatpush3.bf16.msra.mxu1 %v7574_v33  ;;  %v7625_v33 = vld [vmem:[%s10696_s5 + $0x628] sm:$0xff]   ;;  %v7628_v62 = vld [vmem:[%s10696_s5 + $0x6f0] sm:$0xff]  }
 0x513   : > { %5894 = vmatprep.mubr.bf16.mxu1 %v3358_v16  ;;  %7066 = vmatprep.subr.bf16.mxu0 %v7575_v32  ;;  %v7626_v47 = vld [vmem:[%s10696_s5 + $0x6a8] sm:$0xff]   ;;  %v7627_v32 = vld [vmem:[%s10696_s5 + $0x670] sm:$0xff]  }
 0x514   : > { %7088 = vmatprep.subr.bf16.mxu1 %v7576_v13  ;;  %v7629_v13 = vld [vmem:[%s10696_s5 + $0x630] sm:$0xff]  }
 0x515   : > { %7067 = vmatpush3.bf16.msra.mxu0 %v7577_v31  ;;  %v7630_v16 = vld [vmem:[%s10696_s5 + $0x6b0] sm:$0xff]   ;;  %v7631_v31 = vld [vmem:[%s10696_s5 + $0x678] sm:$0xff]  }
 0x516   : > { %7089 = vmatpush3.bf16.msra.mxu1 %v7578_v14  ;;  %7068 = vmatprep.subr.bf16.mxu0 %v7579_v11  ;;  %v7632_v14 = vld [vmem:[%s10696_s5 + $0x6f8] sm:$0xff]  }
 0x517   : > { %7090 = vmatprep.subr.bf16.mxu1 %v7580_v10  ;;  %v7633_v11 = vld [vmem:[%s10696_s5 + $0x638] sm:$0xff]  }
 0x518   : > { %v7634_v10 = vld [vmem:[%s10696_s5 + $0x6b8] sm:$0xff]  }
 0x519   : > { %7069 = vmatpush3.bf16.msra.mxu0 %v7581_v7  ;;  %v7635_v7 = vld [vmem:[%s10696_s5 + $0x740] sm:$0xff]  }
 0x51a   : > { %7091 = vmatpush3.bf16.msra.mxu1 %v7582_v8  ;;  %7070 = vmatprep.subr.bf16.mxu0 %v7583_v9  ;;  %v7636_v8 = vld [vmem:[%s10696_s5 + $0x7c0] sm:$0xff]  }
 0x51b   : > { %7092 = vmatprep.subr.bf16.mxu1 %v7584_v42  ;;  %v7637_v9 = vld [vmem:[%s10696_s5 + $0x700] sm:$0xff]   ;;  %v3359_v42 = vpack.c.bf16 %v9900_v0, %v9900_v0  ;;  %v7640_v0 = vld [vmem:[%s10696_s5 + $0x7c8] sm:$0xff]  }
 0x51d   : > { %7071 = vmatpush3.bf16.msra.mxu0 %v7585_v41  ;;  %v7638_v41 = vld [vmem:[%s10696_s5 + $0x780] sm:$0xff]  }
 0x51e   : > { %7093 = vmatpush3.bf16.msra.mxu1 %v7586_v57  ;;  %7072 = vmatprep.subr.bf16.mxu0 %v7587_v49  ;;  %v3361_v57 = vpack.c.bf16 %v9913_v58, %v9913_v58  ;;  %v7639_v49 = vld [vmem:[%s10696_s5 + $0x748] sm:$0xff]  }
 0x51f   : > { %7094 = vmatprep.subr.bf16.mxu1 %v7588_v30  ;;  %v3364_v30 = vpack.c.bf16 %v9925_v38, %v9925_v38  ;;  %v7641_v58 = vld [vmem:[%s10696_s5 + $0x708] sm:$0xff]   ;;  %v7643_v38 = vld [vmem:[%s10696_s5 + $0x750] sm:$0xff]  }
 0x521   : > { %7073 = vmatpush3.bf16.msra.mxu0 %v7589_v48  ;;  %v3366_v48 = vpack.c.bf16 %v9932_v4, %v9932_v4  ;;  %v7644_v4 = vld [vmem:[%s10696_s5 + $0x7d0] sm:$0xff]  }
 0x522   : > { %7095 = vmatpush3.bf16.msra.mxu1 %v7590_v56  ;;  %7074 = vmatprep.subr.bf16.mxu0 %v7591_v20  ;;  %v7642_v56 = vld [vmem:[%s10696_s5 + $0x788] sm:$0xff]   ;;  %v7645_v20 = vld [vmem:[%s10696_s5 + $0x710] sm:$0xff]  }
 0x523   : > { %7096 = vmatprep.subr.bf16.mxu1 %v7592_v28  ;;  %v7646_v28 = vld [vmem:[%s10696_s5 + $0x790] sm:$0xff]  }
 0x525   : > { %7075 = vmatpush3.bf16.msra.mxu0 %v7593_v29  ;;  %v7647_v29 = vld [vmem:[%s10696_s5 + $0x758] sm:$0xff]  }
 0x526   : > { %7097 = vmatpush3.bf16.msra.mxu1 %v7594_v3  ;;  %7076 = vmatprep.subr.bf16.mxu0 %v7595_v61  ;;  %v7648_v3 = vld [vmem:[%s10696_s5 + $0x7d8] sm:$0xff]  }
 0x527   : > { %7098 = vmatprep.subr.bf16.mxu1 %v7596_v44  ;;  %v7649_v61 = vld [vmem:[%s10696_s5 + $0x718] sm:$0xff]  }
 0x528   : > { %v7650_v44 = vld [vmem:[%s10696_s5 + $0x798] sm:$0xff]  }
 0x529   : > { %7077 = vmatpush3.bf16.msra.mxu0 %v7597_v5  ;;  %v7651_v5 = vld [vmem:[%s10696_s5 + $0x760] sm:$0xff]  }
 0x52a   : > { %7099 = vmatpush3.bf16.msra.mxu1 %v7598_v55  ;;  %7078 = vmatprep.subr.bf16.mxu0 %v7599_v15  ;;  %v7652_v55 = vld [vmem:[%s10696_s5 + $0x7e0] sm:$0xff]  }
 0x52b   : > { %7100 = vmatprep.subr.bf16.mxu1 %v7600_v36  ;;  %v7653_v15 = vld [vmem:[%s10696_s5 + $0x720] sm:$0xff]  }
 0x52c   : > { %v7654_v36 = vld [vmem:[%s10696_s5 + $0x7a0] sm:$0xff]  }
 0x52d   : > { %7079 = vmatpush3.bf16.msra.mxu0 %v7601_v21  ;;  %v7655_v21 = vld [vmem:[%s10696_s5 + $0x768] sm:$0xff]  }
 0x52e   : > { %7101 = vmatpush3.bf16.msra.mxu1 %v7602_v60  ;;  %7108 = vmatprep.subr.bf16.mxu0 %v7603_v18  ;;  %v7656_v60 = vld [vmem:[%s10696_s5 + $0x7e8] sm:$0xff]  }
 0x52f   : > { %7130 = vmatprep.subr.bf16.mxu1 %v7604_v39  ;;  %v7657_v18 = vld [vmem:[%s10696_s5 + $0x728] sm:$0xff]  }
 0x530   : > { %5855 = vmatmul.mubr.bf16.vlgmr.msra.gmra.mrb[116].mxu0 %v3355_v50  ;;  %v7658_v39 = vld [vmem:[%s10696_s5 + $0x7a8] sm:$0xff]  }
 0x531   : > { %5895 = vmatmul.mubr.bf16.vlgmr.msra.gmra.mrb[116].mxu1 %v3357_v22  ;;  %7109 = vmatpush3.bf16.msra.mxu0 %v7605_v25  ;;  %v7659_v25 = vld [vmem:[%s10696_s5 + $0x770] sm:$0xff]  }
 0x532   : > { %5934 = vmatprep.mubr.bf16.mxu0 %v3360_v2  ;;  %7131 = vmatpush3.bf16.msra.mxu1 %v7606_v51  ;;  %v7660_v22 = vld [vmem:[%s10696_s5 + $0x7f0] sm:$0xff]  }
 0x533   : > { %5974 = vmatprep.mubr.bf16.mxu1 %v3362_v45  ;;  %7110 = vmatprep.subr.bf16.mxu0 %v7607_v19  ;;  %v6565_v19 = vld [vmem:[%s10697_s6] ss:$0 sm:$0xff] }
 0x534   : > { %7132 = vmatprep.subr.bf16.mxu1 %v7608_v35 }
 0x535   : > { %7111 = vmatpush3.bf16.msra.mxu0 %v7609_v6 }
 0x536   : > { %7133 = vmatpush3.bf16.msra.mxu1 %v7610_v12  ;;  %7112 = vmatprep.subr.bf16.mxu0 %v7611_v43 }
 0x537   : > { %7134 = vmatprep.subr.bf16.mxu1 %v7612_v1  ;;  %v7661_v1 = vld [vmem:[%s10696_s5 + $0x730] sm:$0xff]  }
 0x539   : > { %7113 = vmatpush3.bf16.msra.mxu0 %v7613_v63 }
 0x53a   : > { %7135 = vmatpush3.bf16.msra.mxu1 %v7614_v26  ;;  %7114 = vmatprep.subr.bf16.mxu0 %v7615_v23  ;;  %v7662_v23 = vld [vmem:[%s10696_s5 + $0x7b0] sm:$0xff]  }
 0x53b   : > { %7136 = vmatprep.subr.bf16.mxu1 %v7616_v54  ;;  %v7663_v54 = vld [vmem:[%s10696_s5 + $0x778] sm:$0xff]  }
 0x53d   : > { %7115 = vmatpush3.bf16.msra.mxu0 %v7617_v24 }
 0x53e   : > { %7137 = vmatpush3.bf16.msra.mxu1 %v7618_v53  ;;  %7116 = vmatprep.subr.bf16.mxu0 %v7619_v52  ;;  %v7664_v53 = vld [vmem:[%s10696_s5 + $0x7f8] sm:$0xff]  }
 0x53f   : > { %7138 = vmatprep.subr.bf16.mxu1 %v7620_v40  ;;  %v7665_v40 = vld [vmem:[%s10696_s5 + $0x738] sm:$0xff]  }
 0x541   : > { %7117 = vmatpush3.bf16.msra.mxu0 %v7621_v59  ;;  %v7666_v59 = vld [vmem:[%s10696_s5 + $0x7b8] sm:$0xff]  }
 0x542   : > { %7139 = vmatpush3.bf16.msra.mxu1 %v7622_v27  ;;  %7118 = vmatprep.subr.bf16.mxu0 %v7623_v46  ;;  %v3363_v27 = vpack.c.bf16 %v9943_v34, %v9943_v34  ;;  %v3365_v46 = vpack.c.bf16 %v9955_v17, %v9955_v17 }
 0x543   : > { %7140 = vmatprep.subr.bf16.mxu1 %v7624_v37 }
 0x545   : > { %7119 = vmatpush3.bf16.msra.mxu0 %v7625_v33 }
 0x546   : > { %7141 = vmatpush3.bf16.msra.mxu1 %v7626_v47  ;;  %7120 = vmatprep.subr.bf16.mxu0 %v7627_v32 }
 0x547   : > { %7142 = vmatprep.subr.bf16.mxu1 %v7628_v62 }
 0x549   : > { %7121 = vmatpush3.bf16.msra.mxu0 %v7629_v13 }
 0x54a   : > { %7143 = vmatpush3.bf16.msra.mxu1 %v7630_v16  ;;  %7122 = vmatprep.subr.bf16.mxu0 %v7631_v31 }
 0x54b   : > { %7144 = vmatprep.subr.bf16.mxu1 %v7632_v14 }
 0x54d   : > { %7123 = vmatpush3.bf16.msra.mxu0 %v7633_v11 }
 0x54e   : > { %7145 = vmatpush3.bf16.msra.mxu1 %v7634_v10  ;;  %7152 = vmatprep.subr.bf16.mxu0 %v7635_v7 }
 0x54f   : > { %7174 = vmatprep.subr.bf16.mxu1 %v7636_v8 }
 0x550   : > { %5935 = vmatmul.mubr.bf16.vlgmr.msra.gmra.mrb[120].mxu0 %v3359_v42 }
 0x551   : > { %5975 = vmatmul.mubr.bf16.vlgmr.msra.gmra.mrb[120].mxu1 %v3361_v57  ;;  %7153 = vmatpush3.bf16.msra.mxu0 %v7637_v9 }
 0x552   : > { %6014 = vmatprep.mubr.bf16.mxu0 %v3364_v30  ;;  %7175 = vmatpush3.bf16.msra.mxu1 %v7638_v41 }
 0x553   : > { %6054 = vmatprep.mubr.bf16.mxu1 %v3366_v48  ;;  %7154 = vmatprep.subr.bf16.mxu0 %v7639_v49 }
 0x554   : > { %7176 = vmatprep.subr.bf16.mxu1 %v7640_v0 }
 0x555   : > { %7155 = vmatpush3.bf16.msra.mxu0 %v7641_v58 }
 0x556   : > { %7177 = vmatpush3.bf16.msra.mxu1 %v7642_v56  ;;  %7156 = vmatprep.subr.bf16.mxu0 %v7643_v38  ;;  %v7667_v56 = vld [vmem:[%s10698_s7] sm:$0xff]   ;;  %v7757_v38 = vmov 0.0  }
 0x557   : > { %7178 = vmatprep.subr.bf16.mxu1 %v7644_v4  ;;  %v7668_v4 = vld [vmem:[%s10698_s7 + $0x8] sm:$0xff]  }
 0x559   : > { %7157 = vmatpush3.bf16.msra.mxu0 %v7645_v20  ;;  %v7669_v20 = vld [vmem:[%s10698_s7 + $0x10] sm:$0xff]  }
 0x55a   : > { %7179 = vmatpush3.bf16.msra.mxu1 %v7646_v28  ;;  %7158 = vmatprep.subr.bf16.mxu0 %v7647_v29  ;;  %v7670_v28 = vld [vmem:[%s10698_s7 + $0x18] sm:$0xff]   ;;  %v7671_v29 = vld [vmem:[%s10698_s7 + $0x20] sm:$0xff]  }
 0x55b   : > { %7180 = vmatprep.subr.bf16.mxu1 %v7648_v3 }
 0x55d   : > { %7159 = vmatpush3.bf16.msra.mxu0 %v7649_v61 }
 0x55e   : > { %7181 = vmatpush3.bf16.msra.mxu1 %v7650_v44  ;;  %7160 = vmatprep.subr.bf16.mxu0 %v7651_v5 }
 0x55f   : > { %7182 = vmatprep.subr.bf16.mxu1 %v7652_v55 }
 0x561   : > { %7161 = vmatpush3.bf16.msra.mxu0 %v7653_v15 }
 0x562   : > { %7183 = vmatpush3.bf16.msra.mxu1 %v7654_v36  ;;  %7162 = vmatprep.subr.bf16.mxu0 %v7655_v21 }
 0x563   : > { %v6860_v50 = vpop.f32.mrb[96].mxu0  ;;  %v6882_v51 = vpop.f32.mrb[96].mxu1  ;;  %7184 = vmatprep.subr.bf16.mxu1 %v7656_v60 }
 0x564   : > { %v6861_v2 = vpop.f32.mrb[97].mxu0  ;;  %v6883_v35 = vpop.f32.mrb[97].mxu1 }
 0x565   : > { %v6862_v45 = vadd.f32 %v6861_v2, %v6860_v50  ;;  %v6884_v6 = vadd.f32 %v6883_v35, %v6882_v51  ;;  %7163 = vmatpush3.bf16.msra.mxu0 %v7657_v18  ;;  %v6863_v12 = vpop.f32.mrb[98].mxu0  ;;  %v6885_v43 = vpop.f32.mrb[98].mxu1  ;;  %v7672_v50 = vld [vmem:[%s10698_s7 + $0x28] sm:$0xff]   ;;  %v7673_v51 = vld [vmem:[%s10698_s7 + $0x30] sm:$0xff]   ;;  %v7674_v2 = vld [vmem:[%s10698_s7 + $0x38] sm:$0xff]  }
 0x566   : > { %7185 = vmatpush3.bf16.msra.mxu1 %v7658_v39  ;;  %v6864_v63 = vpop.f32.mrb[99].mxu0  ;;  %v6886_v26 = vpop.f32.mrb[99].mxu1  ;;  %7164 = vmatprep.subr.bf16.mxu0 %v7659_v25  ;;  %v7677_v35 = vld [vmem:[%s10700_s9 + $0x10] sm:$0xff]   ;;  %v7680_v12 = vld [vmem:[%s10700_s9 + $0x28] sm:$0xff]  }
 0x567   : > { %v5457_v24 = vadd.f32 %v6862_v45, %v6565_v19  ;;  %7186 = vmatprep.subr.bf16.mxu1 %v7660_v22  ;;  %v7675_v22 = vld [vmem:[%s10700_s9] sm:$0xff]   ;;  %v7676_v19 = vld [vmem:[%s10700_s9 + $0x8] sm:$0xff]   ;;  %v7678_v45 = vld [vmem:[%s10700_s9 + $0x18] sm:$0xff]  }
 0x569   : > { %v5497_v52 = vadd.f32 %v6884_v6, %v5457_v24  ;;  %7165 = vmatpush3.bf16.msra.mxu0 %v7661_v1  ;;  %v7679_v6 = vld [vmem:[%s10700_s9 + $0x20] sm:$0xff]  }
 0x56a   : > { %7187 = vmatpush3.bf16.msra.mxu1 %v7662_v23  ;;  %7166 = vmatprep.subr.bf16.mxu0 %v7663_v54 }
 0x56b   : > { %7188 = vmatprep.subr.bf16.mxu1 %v7664_v53 }
 0x56d   : > { %7167 = vmatpush3.bf16.msra.mxu0 %v7665_v40 }
 0x56e   : > { %7189 = vmatpush3.bf16.msra.mxu1 %v7666_v59  ;;  %7214 = vmatprep.subr.bf16.mxu0 %v7757_v38 }
 0x56f   : > { %7234 = vmatprep.subr.bf16.mxu1 %v7757_v38 }
 0x570   : > { %6015 = vmatmul.mubr.bf16.vlgmr.msra.gmra.mrb[124].mxu0 %v3363_v27 }
 0x571   : > { %6055 = vmatmul.mubr.bf16.vlgmr.msra.gmra.mrb[124].mxu1 %v3365_v46  ;;  %7215 = vmatpush3.bf16.msra.mxu0 %v7667_v56 }
 0x572   : > { %7216 = vmatprep.subr.bf16.mxu0 %v7757_v38  ;;  %7230 = vmatprep.mubr.msk.bf16.mxu0 %vm7758_vm13, %v7757_v38 }
 0x573   : > { %7250 = vmatprep.mubr.msk.bf16.mxu1 %vm7758_vm13, %v7757_v38  ;;  %7235 = vmatpush3.bf16.msra.mxu1 %v7675_v22 }
 0x574   : > { %7236 = vmatprep.subr.bf16.mxu1 %v7757_v38 }
 0x575   : > { %7217 = vmatpush3.bf16.msra.mxu0 %v7668_v4 }
 0x576   : > { %7218 = vmatprep.subr.bf16.mxu0 %v7757_v38 }
 0x577   : > { %7237 = vmatpush3.bf16.msra.mxu1 %v7676_v19 }
 0x578   : > { %7238 = vmatprep.subr.bf16.mxu1 %v7757_v38 }
 0x579   : > { %7219 = vmatpush3.bf16.msra.mxu0 %v7669_v20 }
 0x57a   : > { %7220 = vmatprep.subr.bf16.mxu0 %v7757_v38 }
 0x57b   : > { %7239 = vmatpush3.bf16.msra.mxu1 %v7677_v35 }
 0x57c   : > { %7240 = vmatprep.subr.bf16.mxu1 %v7757_v38 }
 0x57d   : > { %7221 = vmatpush3.bf16.msra.mxu0 %v7670_v28 }
 0x57e   : > { %7222 = vmatprep.subr.bf16.mxu0 %v7757_v38 }
 0x57f   : > { %7241 = vmatpush3.bf16.msra.mxu1 %v7678_v45 }
 0x580   : > { %7242 = vmatprep.subr.bf16.mxu1 %v7757_v38 }
 0x581   : > { %7223 = vmatpush3.bf16.msra.mxu0 %v7671_v29 }
 0x582   : > { %7224 = vmatprep.subr.bf16.mxu0 %v7757_v38 }
 0x583   : > { %v6904_v37 = vpop.f32.mrb[100].mxu0  ;;  %v6926_v33 = vpop.f32.mrb[100].mxu1  ;;  %7243 = vmatpush3.bf16.msra.mxu1 %v7679_v6 }
 0x584   : > { %v6905_v47 = vpop.f32.mrb[101].mxu0  ;;  %v6927_v32 = vpop.f32.mrb[101].mxu1  ;;  %7244 = vmatprep.subr.bf16.mxu1 %v7757_v38 }
 0x585   : > { %v6906_v62 = vadd.f32 %v6905_v47, %v6904_v37  ;;  %v6928_v13 = vadd.f32 %v6927_v32, %v6926_v33  ;;  %v6907_v16 = vpop.f32.mrb[102].mxu0  ;;  %v6929_v31 = vpop.f32.mrb[102].mxu1  ;;  %7225 = vmatpush3.bf16.msra.mxu0 %v7672_v50 }
 0x586   : > { %v6908_v14 = vpop.f32.mrb[103].mxu0  ;;  %v6930_v11 = vpop.f32.mrb[103].mxu1  ;;  %7226 = vmatprep.subr.bf16.mxu0 %v7757_v38 }
 0x587   : > { %v5537_v10 = vadd.f32 %v6906_v62, %v5497_v52  ;;  %7245 = vmatpush3.bf16.msra.mxu1 %v7680_v12 }
 0x588   : > { %7246 = vmatprep.subr.bf16.mxu1 %v7757_v38 }
 0x589   : > { %v5577_v7 = vadd.f32 %v6928_v13, %v5537_v10  ;;  %7227 = vmatpush3.bf16.msra.mxu0 %v7673_v51 }
 0x58a   : > { %7228 = vmatprep.subr.bf16.mxu0 %v7757_v38 }
 0x58d   : > { %7229 = vmatpush3.bf16.msra.mxu0 %v7674_v2 }
 0x5a3   : > { %v6948_v8 = vpop.f32.mrb[104].mxu0 }
 0x5a4   : > { %v6970_v9 = vpop.f32.mrb[104].mxu1  ;;  %v6949_v34 = vpop.f32.mrb[105].mxu0 }
 0x5a5   : > { %v6950_v42 = vadd.f32 %v6949_v34, %v6948_v8  ;;  %v6971_v41 = vpop.f32.mrb[105].mxu1  ;;  %v6951_v17 = vpop.f32.mrb[106].mxu0 }
 0x5a6   : > { %v6972_v57 = vadd.f32 %v6971_v41, %v6970_v9  ;;  %v6973_v49 = vpop.f32.mrb[106].mxu1  ;;  %v6952_v30 = vpop.f32.mrb[107].mxu0 }
 0x5a7   : > { %v5617_v0 = vadd.f32 %v6950_v42, %v5577_v7  ;;  %v6974_v48 = vpop.f32.mrb[107].mxu1 }
 0x5a9   : > { %v5657_v58 = vadd.f32 %v6972_v57, %v5617_v0 }
 0x5c3   : > { %v6992_v3 = vpop.f32.mrb[108].mxu0 }
 0x5c4   : > { %v7014_v61 = vpop.f32.mrb[108].mxu1  ;;  %v6993_v44 = vpop.f32.mrb[109].mxu0 }
 0x5c5   : > { %v6994_v5 = vadd.f32 %v6993_v44, %v6992_v3  ;;  %v7015_v55 = vpop.f32.mrb[109].mxu1  ;;  %v6995_v15 = vpop.f32.mrb[110].mxu0 }
 0x5c6   : > { %v7016_v36 = vadd.f32 %v7015_v55, %v7014_v61  ;;  %v7017_v21 = vpop.f32.mrb[110].mxu1  ;;  %v6996_v60 = vpop.f32.mrb[111].mxu0 }
 0x5c7   : > { %v5697_v18 = vadd.f32 %v6994_v5, %v5657_v58  ;;  %v7018_v39 = vpop.f32.mrb[111].mxu1  ;;  %v7681_v60 = vld [vmem:[%s10700_s9 + $0x30] sm:$0xff]  }
 0x5c8   : > { %7247 = vmatpush3.bf16.msra.mxu1 %v7681_v60  ;;  %v6822_v39 = vld [vmem:[%s10699_s8] ss:$0 sm:$0xff] }
 0x5c9   : > { %v5737_v25 = vadd.f32 %v7016_v36, %v5697_v18  ;;  %v7682_v18 = vld [vmem:[%s10700_s9 + $0x38] sm:$0xff]   ;;  %7248 = vmatprep.subr.bf16.mxu1 %v7757_v38  ;;  %v6831_v38 = vld [vmem:[%s10701_s10] ss:$0 sm:$0xff] }
 0x5cc   : > { %7249 = vmatpush3.bf16.msra.mxu1 %v7682_v18 }
 0x5e3   : > { %v7036_v43 = vpop.f32.mrb[112].mxu0 }
 0x5e4   : > { %v7058_v1 = vpop.f32.mrb[112].mxu1  ;;  %v7037_v63 = vpop.f32.mrb[113].mxu0 }
 0x5e5   : > { %v7038_v26 = vadd.f32 %v7037_v63, %v7036_v43  ;;  %v7059_v23 = vpop.f32.mrb[113].mxu1  ;;  %v7039_v54 = vpop.f32.mrb[114].mxu0 }
 0x5e6   : > { %v7060_v24 = vadd.f32 %v7059_v23, %v7058_v1  ;;  %v7061_v53 = vpop.f32.mrb[114].mxu1  ;;  %v7040_v52 = vpop.f32.mrb[115].mxu0 }
 0x5e7   : > { %v5777_v40 = vadd.f32 %v7038_v26, %v5737_v25  ;;  %v7062_v59 = vpop.f32.mrb[115].mxu1 }
 0x5e9   : > { %v5817_v27 = vadd.f32 %v7060_v24, %v5777_v40 }
 0x603   : > { %v7080_v46 = vpop.f32.mrb[116].mxu0 }
 0x604   : > { %v7102_v37 = vpop.f32.mrb[116].mxu1  ;;  %v7081_v33 = vpop.f32.mrb[117].mxu0 }
 0x605   : > { %v7082_v47 = vadd.f32 %v7081_v33, %v7080_v46  ;;  %v7103_v32 = vpop.f32.mrb[117].mxu1  ;;  %v7083_v62 = vpop.f32.mrb[118].mxu0 }
 0x606   : > { %v7104_v13 = vadd.f32 %v7103_v32, %v7102_v37  ;;  %v7105_v16 = vpop.f32.mrb[118].mxu1  ;;  %v7084_v31 = vpop.f32.mrb[119].mxu0 }
 0x607   : > { %v5857_v14 = vadd.f32 %v7082_v47, %v5817_v27  ;;  %v7106_v11 = vpop.f32.mrb[119].mxu1 }
 0x609   : > { %v5897_v10 = vadd.f32 %v7104_v13, %v5857_v14 }
 0x623   : > { %v7124_v7 = vpop.f32.mrb[120].mxu0 }
 0x624   : > { %v7146_v8 = vpop.f32.mrb[120].mxu1  ;;  %v7125_v9 = vpop.f32.mrb[121].mxu0 }
 0x625   : > { %v7126_v34 = vadd.f32 %v7125_v9, %v7124_v7  ;;  %v7147_v42 = vpop.f32.mrb[121].mxu1  ;;  %v7127_v41 = vpop.f32.mrb[122].mxu0 }
 0x626   : > { %v7148_v17 = vadd.f32 %v7147_v42, %v7146_v8  ;;  %v7149_v57 = vpop.f32.mrb[122].mxu1  ;;  %v7128_v49 = vpop.f32.mrb[123].mxu0 }
 0x627   : > { %v5937_v30 = vadd.f32 %v7126_v34, %v5897_v10  ;;  %v7150_v0 = vpop.f32.mrb[123].mxu1 }
 0x629   : > { %v5977_v48 = vadd.f32 %v7148_v17, %v5937_v30 }
 0x643   : > { %v7168_v58 = vpop.f32.mrb[124].mxu0 }
 0x644   : > { %v7190_v56 = vpop.f32.mrb[124].mxu1  ;;  %v7169_v4 = vpop.f32.mrb[125].mxu0 }
 0x645   : > { %v7170_v20 = vadd.f32 %v7169_v4, %v7168_v58  ;;  %v7191_v28 = vpop.f32.mrb[125].mxu1  ;;  %v7171_v29 = vpop.f32.mrb[126].mxu0 }
 0x646   : > { %v7192_v3 = vadd.f32 %v7191_v28, %v7190_v56  ;;  %v7193_v61 = vpop.f32.mrb[126].mxu1  ;;  %v7172_v44 = vpop.f32.mrb[127].mxu0 }
 0x647   : > { %v6017_v5 = vadd.f32 %v7170_v20, %v5977_v48  ;;  %v7194_v55 = vpop.f32.mrb[127].mxu1 }
 0x649   : > { %v6057_v15 = vadd.f32 %v7192_v3, %v6017_v5 }
 0x64b   : > { %v6062_v36 = vmax.f32 %v6057_v15, 0.0 }
 0x64d   : > { %v6063_v21 = vpack.c.bf16 %v6062_v36, %v6062_v36 }
 0x64f   : > { %7231 = vmatmul.mubr.bf16.vlgmr.msra.gmra.mrb[128].mxu0 %v6063_v21 }
 0x722   : > { %v6169_v25 = vpop.f32.mrb[128].mxu0 }
 0x723   : > { %v6170_v50 = vadd.f32 %v6822_v39, %v6169_v25  ;;  %v7232_v51 = vpop.f32.mrb[129].mxu0 }
 0x724   : > { %v6172_v22 = vpop.f32.mrb[130].mxu0 }
 0x725   : > { %v6175_v19 = vmax.f32 %v6170_v50, 0.0  ;;  %v7233_v2 = vpop.f32.mrb[131].mxu0 }
 0x727   : > { %v6176_v35 = vpack.c.bf16 %v6175_v19, %v6175_v19 }
 0x729   : > { %7251 = vmatmul.mubr.bf16.vlgmr.msra.gmra.mrb[128].mxu1 %v6176_v35 }
 0x7fc   : > { %v6282_v45 = vpop.f32.mrb[128].mxu1 }
 0x7fd   : > { %v6283_v6 = vadd.f32 %v6831_v38, %v6282_v45  ;;  %v7252_v12 = vpop.f32.mrb[129].mxu1 }
 0x7fe   : > { %v6285_v43 = vpop.f32.mrb[130].mxu1 }
 0x7ff   : > { %6288 = vst [vmem:[%s379_s15] sm:$0xf] %v6283_v6  ;;  %v7253_v1 = vpop.f32.mrb[131].mxu1 }
 0x800   : > { %7697 = shalt.err (!%p7694_p3)
}
 0x801   : > { %s7698_s24 = scalar_lea.hbm %s10649_s29, 64  ;;  %s7702_s25 = scalar_lea.hbm %s10702_s11, 128 }
 0x802   : > { %p7699_p4 = scmp.ne.s32.totalorder %s10649_s29, %s7698_s24  ;;  %p7703_p9 = scmp.lt.u32.totalorder %s10649_s29, %s10702_s11 }
 0x803   : > { %p7704_p10 = scmp.lt.u32.totalorder %s7702_s25, %s7698_s24  ;;  %p7706_p12 = scmp.lt.u32.totalorder %s7698_s24, %s10649_s29 }
 0x804   : > { %p7700_p7 = pnand %p7699_p4, %p7858_p5 }
 0x805   : > { %p7705_p11 = por %p7704_p10, %p7703_p9 }
 0x806   : > { %p7701_p8 = pneg %p7700_p7 }
 0x807   : > { %p7707_p13 = por %p7706_p12, %p7705_p11 }
 0x809   : > { %p7708_p0 = pnand %p7707_p13, %p7701_p8 }
 0x80b   : > { %7711 = shalt.err (!%p7708_p0)
}
 0x80c   : > { %7319 = dma.vmem_to_hbm [thread:$0]  (%p7858_p5), %s10651_s16, 64, %s10649_s29, %s6290_s12  }
 0x80d PF: > { %p7325_p1 = scmp.ge.s32.totalorder %s7746_s20, 2  ;;  %s6315_s21 = sand.u32 1, %s7734_s17  }
 0x80e   : > { %s6316_s22 = scalar_lea.sflag [#allocation3], %s6315_s21 }
 0x80f   : > { %p7322_p2 = pnand %p7325_p1, %p7862_p6 }
 0x811   : > { %7729 = dma.done.wait (!%p7322_p2), %s6316_s22, 64  }
 0x812   : > { %7731 = vsyncadd (!%p7322_p2), %s6316_s22, 4294967232  ;;  %p21_p3 = scmp.ge.s32.totalorder %s7845_s23, 4   ;;  %s10715_s17 = smov %s7738_s18 }
 0x813   : > { %s10716_s18 = smov %s7742_s19  ;;  %s10717_s19 = smov %s7856_s26 }
 0x814   : > { %s10718_s20 = smov %s7845_s23  ;;  %23 = sbr.rel (!%p21_p3) target bundleno = 3 (0x3), region = 99 }
 0x81b   :  { %6321 = vsyncpa [#allocation3], 1 }
 0x81c   :  { %6323 = vsyncpa [#allocation3 + $0x1], 1 }

</bundles_post_ra>
